<compile_context>
chip_gen: v6e
topology: v6e:2x2x1
jax: 0.10.0
libtpu: 0.0.40
codegen_flags: <defaults>
</compile_context>

<pallas_src>
import jax
import jax.numpy as jnp
from jax import lax
from jax.experimental import pallas as pl
from jax.experimental.pallas import tpu as pltpu


def _generator_kernel(x_gates_ref,    # (maxlen, B, 4H) f32 : precomputed layer-0 input gates (+b0)
                      w0_cat_ref,     # (H, 8H)     bf16 : [W_ih1 | W_hh0]
                      w1_cat_ref,     # (H, V+4H)   bf16 : [fc_W  | W_hh1]
                      b1_ref,         # (1, 4H) f32
                      fc_b_ref,       # (1, V)  f32
                      emb_w_ref,      # (V, 4H) bf16 : fused embedding -> layer-0-gate table
                      out_ref):       # (B, maxlen, V) f32
    maxlen, B, G4 = x_gates_ref.shape
    H = G4 // 4
    V = fc_b_ref.shape[1]

    f32 = jnp.float32
    bf16 = jnp.bfloat16

    # ---- hoisted loop invariants (JAX does not CSE broadcast_in_dim) ----
    iota = lax.broadcasted_iota(jnp.int32, (B, V), 1)          # (B, V)
    b1b = jnp.broadcast_to(b1_ref[...], (B, G4))               # (B, 4H)
    fc_bb = jnp.broadcast_to(fc_b_ref[...], (B, V))            # (B, V)

    def cell(gates, c):
        # gates already contain x@W_ih^T + b + h_prev@W_hh^T (rec carried in).
        # PyTorch gate order [i | f | g | o], each H-wide; H % 128 == 0 so every
        # slice is vreg lane-aligned.
        i_g = jax.nn.sigmoid(gates[:, 0 * H:1 * H])
        f_g = jax.nn.sigmoid(gates[:, 1 * H:2 * H])
        g_g = jnp.tanh(gates[:, 2 * H:3 * H])
        o_g = jax.nn.sigmoid(gates[:, 3 * H:4 * H])
        c_new = f_g * c + i_g * g_g
        h_new = o_g * jnp.tanh(c_new)
        return h_new, c_new

    zeros_h = jnp.zeros((B, H), f32)
    zeros_g = jnp.zeros((B, G4), f32)
    c0, c1 = zeros_h, zeros_h
    rec0, rec1 = zeros_g, zeros_g       # carried h_prev @ W_hh^T (zero at step 0)

    # step 0 layer-0 input gates: keyword + noise[0] + b0 (precomputed).
    x_gate = x_gates_ref[0]

    # maxlen is small & static -> deliberate full unroll (LLO sees whole chain).
    for i in range(maxlen):
        last = (i + 1 == maxlen)

        # ---- layer 0 (dropout on the LSTM input: identity, eval mode) ----
        h0, c0 = cell(x_gate + rec0, c0)
        if last:
            # next-step recurrent columns are dead -> only the W_ih1 half.
            x1_gate = jnp.dot(h0.astype(bf16), w0_cat_ref[:, :G4],
                              preferred_element_type=f32) + b1b
        else:
            cols0 = jnp.dot(h0.astype(bf16), w0_cat_ref[...],
                            preferred_element_type=f32)          # (B, 8H)
            x1_gate = cols0[:, :G4] + b1b                        # this step
            rec0 = cols0[:, G4:]                                 # next step

        # ---- layer 1 (inter-layer dropout: identity, eval mode) ----
        h1, c1 = cell(x1_gate + rec1, c1)
        if last:
            logits = jnp.dot(h1.astype(bf16), w1_cat_ref[:, :V],
                             preferred_element_type=f32) + fc_bb
        else:
            cols1 = jnp.dot(h1.astype(bf16), w1_cat_ref[...],
                            preferred_element_type=f32)          # (B, V+4H)
            logits = cols1[:, :V] + fc_bb                        # this step
            rec1 = cols1[:, V:]                                  # next step

        # PyTorch layout directly: (B, maxlen, V); lane-dense (V % 128 == 0).
        out_ref[:, i, :] = logits

        if not last:     # last step's next-token work is dead -> skip it
            # greedy decode: first-occurrence argmax -> one-hot
            m = jnp.max(logits, axis=1, keepdims=True)                 # (B, 1)
            idx = jnp.min(jnp.where(logits == m, iota, V), axis=1)     # (B,)
            onehot = (iota == idx[:, None]).astype(bf16)               # (B, V)
            # fused embedding lookup + layer-0 input matmul, plus precomputed
            # noise/bias contribution for the next step.
            x_gate = (jnp.dot(onehot, emb_w_ref[...],
                              preferred_element_type=f32)
                      + x_gates_ref[i + 1])


def generator_forward(keyword, noise, params):
    """keyword: (B, emb_dim) f32; noise: (maxlen, B, rand_size) f32.
    Returns logits of shape (B, maxlen, n_vocabs), matching the PyTorch module."""
    maxlen, B, _ = noise.shape
    emb_dim = keyword.shape[1]
    H = params["w_hh0_t"].shape[0]
    V = params["emb"].shape[0]

    # Lane alignment: real configs with H/V not multiples of 128 should be
    # zero-padded (weights, biases, fc rows) and sliced back in the wrapper.
    assert H % 128 == 0 and V % 128 == 0, "pad hidden_size / n_vocabs to 128"

    bf16 = jnp.bfloat16
    hi = lax.Precision.HIGHEST
    w_ih0_t = params["w_ih0_t"]                        # (emb_dim + rand, 4H)

    # ---- one-time precomputation (amortized over all decode steps) ----
    # Layer-0 input-gate contributions from the noise draws (known ahead of
    # time) + b0, plus the keyword contribution for step 0.  f32 precision so
    # the greedy argmax is not perturbed by the precompute.
    noise_gate = jnp.einsum("tbr,rg->tbg", noise, w_ih0_t[emb_dim:],
                            precision=hi)                              # (T,B,4H)
    kw_gate = jnp.dot(keyword, w_ih0_t[:emb_dim], precision=hi)        # (B, 4H)
    x_gates = noise_gate + params["b0"][None]
    x_gates = x_gates.at[0].add(kw_gate)
    # fused embedding -> layer-0 gate table (cast to bf16 for the MXU)
    emb_w = jnp.dot(params["emb"], w_ih0_t[:emb_dim],
                    precision=hi).astype(bf16)                         # (V, 4H)

    # Fused weight blocks: critical columns first (W_ih1 / fc_W), recurrent
    # columns second (carried to the next decode step).
    w0_cat = jnp.concatenate([params["w_ih1_t"], params["w_hh0_t"]],
                             axis=1).astype(bf16)                      # (H, 8H)
    w1_cat = jnp.concatenate([params["fc_w_t"], params["w_hh1_t"]],
                             axis=1).astype(bf16)                      # (H, V+4H)

    args = (x_gates.astype(jnp.float32), w0_cat, w1_cat,
            params["b1"], params["fc_b"], emb_w)

    # Size the scoped-VMEM limit from the actual resident set (whole-array VMEM
    # specs: inputs + output), with 2x headroom for compiler temporaries.
    in_bytes = sum(int(a.size) * a.dtype.itemsize for a in args)
    out_bytes = B * maxlen * V * 4
    vmem_limit = min(max(2 * (in_bytes + out_bytes) + (4 << 20), 32 << 20),
                     128 << 20)

    vmem = pl.BlockSpec(memory_space=pltpu.MemorySpace.VMEM)
    out = pl.pallas_call(
        _generator_kernel,
        out_shape=jax.ShapeDtypeStruct((B, maxlen, V), jnp.float32),
        in_specs=[vmem] * len(args),
        out_specs=vmem,
        compiler_params=pltpu.CompilerParams(vmem_limit_bytes=vmem_limit),
    )(*args)
    return out


def init_params(key, emb_dim, n_vocabs, rand_size, hidden_size):
    """Deterministic synthetic parameters; PyTorch LSTM/Linear shape conventions,
    pre-transposed for x @ W^T inside the kernel."""
    ks = jax.random.split(key, 9)
    s = 1.0 / jnp.sqrt(hidden_size)
    in0 = emb_dim + rand_size

    def u(k, shape):
        return jax.random.uniform(k, shape, jnp.float32, minval=-s, maxval=s)

    return {
        # layer 0: weight_ih (4H, in0) -> (in0, 4H);  weight_hh (4H, H) -> (H, 4H)
        "w_ih0_t": u(ks[0], (in0, 4 * hidden_size)),
        "w_hh0_t": u(ks[1], (hidden_size, 4 * hidden_size)),
        "b0": u(ks[2], (1, 4 * hidden_size)),          # bias_ih + bias_hh combined
        # layer 1
        "w_ih1_t": u(ks[3], (hidden_size, 4 * hidden_size)),
        "w_hh1_t": u(ks[4], (hidden_size, 4 * hidden_size)),
        "b1": u(ks[5], (1, 4 * hidden_size)),
        # fc: (n_vocabs, H) -> (H, n_vocabs)
        "fc_w_t": u(ks[6], (hidden_size, n_vocabs)),
        "fc_b": u(ks[7], (1, n_vocabs)),
        # embedding table (n_vocabs, emb_dim)
        "emb": jax.random.normal(ks[8], (n_vocabs, emb_dim), jnp.float32),
    }


if __name__ == "__main__":
    # small, lane-aligned shapes consistent with the module
    B, emb_dim, n_vocabs = 8, 32, 256
    rand_size, hidden_size = 64, 128
    maxlen = 6

    root = jax.random.PRNGKey(0)
    k_par, k_kw, k_noise = jax.random.split(root, 3)

    params = init_params(k_par, emb_dim, n_vocabs, rand_size, hidden_size)
    keyword = jax.random.normal(k_kw, (B, emb_dim), jnp.float32)
    # one randn draw for the initial z + one per remaining step
    noise = jax.random.normal(k_noise, (maxlen, B, rand_size), jnp.float32)

    fwd = jax.jit(generator_forward)
    out = fwd(keyword, noise, params)
    jax.block_until_ready(out)
    assert out.shape == (B, maxlen, n_vocabs) and out.dtype == jnp.float32
    assert bool(jnp.all(jnp.isfinite(out)))
    print("KERNEL_OK")
</pallas_src>

<mosaic_0001>
module attributes {stable_mosaic.version = 11 : i64} {
  func.func @_generator_kernel(%arg0: memref<6x8x512xf32, #tpu.memory_space<vmem>>, %arg1: memref<128x1024xbf16, #tpu.memory_space<vmem>>, %arg2: memref<128x768xbf16, #tpu.memory_space<vmem>>, %arg3: memref<1x512xf32, #tpu.memory_space<vmem>>, %arg4: memref<1x256xf32, #tpu.memory_space<vmem>>, %arg5: memref<256x512xbf16, #tpu.memory_space<vmem>>, %arg6: memref<8x6x256xf32, #tpu.memory_space<vmem>>) attributes {dimension_semantics = [], scalar_prefetch = 0 : i64, scratch_operands = 0 : i64, tpu.core_type = #tpu.core_type<tc>} {
    %0 = tpu.iota {dimensions = array<i32: 1>} : vector<8x256xi32>
    %c0 = arith.constant 0 : index
    %c0_0 = arith.constant 0 : index
    %1 = vector.load %arg3[%c0, %c0_0] : memref<1x512xf32, #tpu.memory_space<vmem>>, vector<1x512xf32>
    %2 = vector.shape_cast %1 : vector<1x512xf32> to vector<1x512xf32>
    %3 = vector.broadcast %2 : vector<1x512xf32> to vector<8x512xf32>
    %c0_1 = arith.constant 0 : index
    %c0_2 = arith.constant 0 : index
    %4 = vector.load %arg4[%c0_1, %c0_2] : memref<1x256xf32, #tpu.memory_space<vmem>>, vector<1x256xf32>
    %5 = vector.shape_cast %4 : vector<1x256xf32> to vector<1x256xf32>
    %6 = vector.broadcast %5 : vector<1x256xf32> to vector<8x256xf32>
    %cst = arith.constant 0.000000e+00 : f32
    %7 = vector.broadcast %cst : f32 to vector<8x128xf32>
    %cst_3 = arith.constant 0.000000e+00 : f32
    %8 = vector.broadcast %cst_3 : f32 to vector<8x512xf32>
    %c0_4 = arith.constant 0 : index
    %c0_5 = arith.constant 0 : index
    %c0_6 = arith.constant 0 : index
    %9 = vector.load %arg0[%c0_4, %c0_5, %c0_6] : memref<6x8x512xf32, #tpu.memory_space<vmem>>, vector<1x8x512xf32>
    %10 = vector.shape_cast %9 : vector<1x8x512xf32> to vector<8x512xf32>
    %11 = arith.addf %10, %8 : vector<8x512xf32>
    %12 = vector.extract_strided_slice %11 {offsets = [0, 0], sizes = [8, 128], strides = [1, 1]} : vector<8x512xf32> to vector<8x128xf32>
    %13 = arith.negf %12 : vector<8x128xf32>
    %14 = math.exp %13 : vector<8x128xf32>
    %cst_7 = arith.constant 1.000000e+00 : f32
    %15 = vector.broadcast %cst_7 : f32 to vector<8x128xf32>
    %16 = arith.addf %15, %14 : vector<8x128xf32>
    %17 = arith.divf %15, %16 : vector<8x128xf32>
    %18 = vector.extract_strided_slice %11 {offsets = [0, 128], sizes = [8, 128], strides = [1, 1]} : vector<8x512xf32> to vector<8x128xf32>
    %19 = arith.negf %18 : vector<8x128xf32>
    %20 = math.exp %19 : vector<8x128xf32>
    %cst_8 = arith.constant 1.000000e+00 : f32
    %21 = vector.broadcast %cst_8 : f32 to vector<8x128xf32>
    %22 = arith.addf %21, %20 : vector<8x128xf32>
    %23 = arith.divf %21, %22 : vector<8x128xf32>
    %24 = vector.extract_strided_slice %11 {offsets = [0, 256], sizes = [8, 128], strides = [1, 1]} : vector<8x512xf32> to vector<8x128xf32>
    %25 = math.tanh %24 : vector<8x128xf32>
    %26 = vector.extract_strided_slice %11 {offsets = [0, 384], sizes = [8, 128], strides = [1, 1]} : vector<8x512xf32> to vector<8x128xf32>
    %27 = arith.negf %26 : vector<8x128xf32>
    %28 = math.exp %27 : vector<8x128xf32>
    %cst_9 = arith.constant 1.000000e+00 : f32
    %29 = vector.broadcast %cst_9 : f32 to vector<8x128xf32>
    %30 = arith.addf %29, %28 : vector<8x128xf32>
    %31 = arith.divf %29, %30 : vector<8x128xf32>
    %32 = arith.mulf %23, %7 : vector<8x128xf32>
    %33 = arith.mulf %17, %25 : vector<8x128xf32>
    %34 = arith.addf %32, %33 : vector<8x128xf32>
    %35 = math.tanh %34 : vector<8x128xf32>
    %36 = arith.mulf %31, %35 : vector<8x128xf32>
    %37 = arith.truncf %36 : vector<8x128xf32> to vector<8x128xbf16>
    %c0_10 = arith.constant 0 : index
    %c0_11 = arith.constant 0 : index
    %38 = vector.load %arg1[%c0_10, %c0_11] : memref<128x1024xbf16, #tpu.memory_space<vmem>>, vector<128x1024xbf16>
    %cst_12 = arith.constant dense<0.000000e+00> : vector<8x1024xf32>
    %39 = tpu.matmul %37, %38, %cst_12 {dimension_numbers = #tpu.dot_dimension_numbers<[1], [0], [0], [1], [0, 0, 1, 1], [], []>} : vector<8x128xbf16>, vector<128x1024xbf16>, vector<8x1024xf32> -> vector<8x1024xf32>
    %40 = vector.extract_strided_slice %39 {offsets = [0, 0], sizes = [8, 512], strides = [1, 1]} : vector<8x1024xf32> to vector<8x512xf32>
    %41 = arith.addf %40, %3 : vector<8x512xf32>
    %42 = vector.extract_strided_slice %39 {offsets = [0, 512], sizes = [8, 512], strides = [1, 1]} : vector<8x1024xf32> to vector<8x512xf32>
    %43 = arith.addf %41, %8 : vector<8x512xf32>
    %44 = vector.extract_strided_slice %43 {offsets = [0, 0], sizes = [8, 128], strides = [1, 1]} : vector<8x512xf32> to vector<8x128xf32>
    %45 = arith.negf %44 : vector<8x128xf32>
    %46 = math.exp %45 : vector<8x128xf32>
    %cst_13 = arith.constant 1.000000e+00 : f32
    %47 = vector.broadcast %cst_13 : f32 to vector<8x128xf32>
    %48 = arith.addf %47, %46 : vector<8x128xf32>
    %49 = arith.divf %47, %48 : vector<8x128xf32>
    %50 = vector.extract_strided_slice %43 {offsets = [0, 128], sizes = [8, 128], strides = [1, 1]} : vector<8x512xf32> to vector<8x128xf32>
    %51 = arith.negf %50 : vector<8x128xf32>
    %52 = math.exp %51 : vector<8x128xf32>
    %cst_14 = arith.constant 1.000000e+00 : f32
    %53 = vector.broadcast %cst_14 : f32 to vector<8x128xf32>
    %54 = arith.addf %53, %52 : vector<8x128xf32>
    %55 = arith.divf %53, %54 : vector<8x128xf32>
    %56 = vector.extract_strided_slice %43 {offsets = [0, 256], sizes = [8, 128], strides = [1, 1]} : vector<8x512xf32> to vector<8x128xf32>
    %57 = math.tanh %56 : vector<8x128xf32>
    %58 = vector.extract_strided_slice %43 {offsets = [0, 384], sizes = [8, 128], strides = [1, 1]} : vector<8x512xf32> to vector<8x128xf32>
    %59 = arith.negf %58 : vector<8x128xf32>
    %60 = math.exp %59 : vector<8x128xf32>
    %cst_15 = arith.constant 1.000000e+00 : f32
    %61 = vector.broadcast %cst_15 : f32 to vector<8x128xf32>
    %62 = arith.addf %61, %60 : vector<8x128xf32>
    %63 = arith.divf %61, %62 : vector<8x128xf32>
    %64 = arith.mulf %55, %7 : vector<8x128xf32>
    %65 = arith.mulf %49, %57 : vector<8x128xf32>
    %66 = arith.addf %64, %65 : vector<8x128xf32>
    %67 = math.tanh %66 : vector<8x128xf32>
    %68 = arith.mulf %63, %67 : vector<8x128xf32>
    %69 = arith.truncf %68 : vector<8x128xf32> to vector<8x128xbf16>
    %c0_16 = arith.constant 0 : index
    %c0_17 = arith.constant 0 : index
    %70 = vector.load %arg2[%c0_16, %c0_17] : memref<128x768xbf16, #tpu.memory_space<vmem>>, vector<128x768xbf16>
    %cst_18 = arith.constant dense<0.000000e+00> : vector<8x768xf32>
    %71 = tpu.matmul %69, %70, %cst_18 {dimension_numbers = #tpu.dot_dimension_numbers<[1], [0], [0], [1], [0, 0, 1, 1], [], []>} : vector<8x128xbf16>, vector<128x768xbf16>, vector<8x768xf32> -> vector<8x768xf32>
    %72 = vector.extract_strided_slice %71 {offsets = [0, 0], sizes = [8, 256], strides = [1, 1]} : vector<8x768xf32> to vector<8x256xf32>
    %73 = arith.addf %72, %6 : vector<8x256xf32>
    %74 = vector.extract_strided_slice %71 {offsets = [0, 256], sizes = [8, 512], strides = [1, 1]} : vector<8x768xf32> to vector<8x512xf32>
    %c0_19 = arith.constant 0 : index
    %c0_20 = arith.constant 0 : index
    %c0_21 = arith.constant 0 : index
    %75 = vector.load %arg6[%c0_19, %c0_20, %c0_21] : memref<8x6x256xf32, #tpu.memory_space<vmem>>, vector<8x1x256xf32>
    %76 = vector.shape_cast %75 : vector<8x1x256xf32> to vector<8x256xf32>
    %77 = vector.shape_cast %73 : vector<8x256xf32> to vector<8x1x256xf32>
    tpu.vector_store %arg6[%c0_19, %c0_20, %c0_21], %77 {strides = array<i32>} : memref<8x6x256xf32, #tpu.memory_space<vmem>>, vector<8x1x256xf32>,
    %cst_22 = arith.constant dense<0xFF800000> : vector<8xf32>
    %78 = vector.multi_reduction <maximumf>, %73, %cst_22 [1] : vector<8x256xf32> to vector<8xf32>
    %79 = vector.shape_cast %78 : vector<8xf32> to vector<8x1xf32>
    %80 = vector.broadcast %79 : vector<8x1xf32> to vector<8x256xf32>
    %81 = arith.cmpf oeq, %73, %80 : vector<8x256xf32>
    %c256_i32 = arith.constant 256 : i32
    %82 = vector.broadcast %c256_i32 : i32 to vector<8x256xi32>
    %83 = arith.select %81, %0, %82 : vector<8x256xi1>, vector<8x256xi32>
    %cst_23 = arith.constant dense<2147483647> : vector<8xi32>
    %84 = vector.multi_reduction <minsi>, %83, %cst_23 [1] : vector<8x256xi32> to vector<8xi32>
    %85 = vector.shape_cast %84 : vector<8xi32> to vector<8x1xi32>
    %86 = vector.broadcast %85 : vector<8x1xi32> to vector<8x256xi32>
    %87 = arith.cmpi eq, %0, %86 : vector<8x256xi32>
    %88 = arith.extui %87 : vector<8x256xi1> to vector<8x256xi32>
    %89 = arith.sitofp %88 : vector<8x256xi32> to vector<8x256xf32>
    %90 = arith.truncf %89 : vector<8x256xf32> to vector<8x256xbf16>
    %c0_24 = arith.constant 0 : index
    %c0_25 = arith.constant 0 : index
    %91 = vector.load %arg5[%c0_24, %c0_25] : memref<256x512xbf16, #tpu.memory_space<vmem>>, vector<256x512xbf16>
    %cst_26 = arith.constant dense<0.000000e+00> : vector<8x512xf32>
    %92 = tpu.matmul %90, %91, %cst_26 {dimension_numbers = #tpu.dot_dimension_numbers<[1], [0], [0], [1], [0, 0, 1, 1], [], []>} : vector<8x256xbf16>, vector<256x512xbf16>, vector<8x512xf32> -> vector<8x512xf32>
    %c1 = arith.constant 1 : index
    %c0_27 = arith.constant 0 : index
    %c0_28 = arith.constant 0 : index
    %93 = vector.load %arg0[%c1, %c0_27, %c0_28] : memref<6x8x512xf32, #tpu.memory_space<vmem>>, vector<1x8x512xf32>
    %94 = vector.shape_cast %93 : vector<1x8x512xf32> to vector<8x512xf32>
    %95 = arith.addf %92, %94 : vector<8x512xf32>
    %96 = arith.addf %95, %42 : vector<8x512xf32>
    %97 = vector.extract_strided_slice %96 {offsets = [0, 0], sizes = [8, 128], strides = [1, 1]} : vector<8x512xf32> to vector<8x128xf32>
    %98 = arith.negf %97 : vector<8x128xf32>
    %99 = math.exp %98 : vector<8x128xf32>
    %cst_29 = arith.constant 1.000000e+00 : f32
    %100 = vector.broadcast %cst_29 : f32 to vector<8x128xf32>
    %101 = arith.addf %100, %99 : vector<8x128xf32>
    %102 = arith.divf %100, %101 : vector<8x128xf32>
    %103 = vector.extract_strided_slice %96 {offsets = [0, 128], sizes = [8, 128], strides = [1, 1]} : vector<8x512xf32> to vector<8x128xf32>
    %104 = arith.negf %103 : vector<8x128xf32>
    %105 = math.exp %104 : vector<8x128xf32>
    %cst_30 = arith.constant 1.000000e+00 : f32
    %106 = vector.broadcast %cst_30 : f32 to vector<8x128xf32>
    %107 = arith.addf %106, %105 : vector<8x128xf32>
    %108 = arith.divf %106, %107 : vector<8x128xf32>
    %109 = vector.extract_strided_slice %96 {offsets = [0, 256], sizes = [8, 128], strides = [1, 1]} : vector<8x512xf32> to vector<8x128xf32>
    %110 = math.tanh %109 : vector<8x128xf32>
    %111 = vector.extract_strided_slice %96 {offsets = [0, 384], sizes = [8, 128], strides = [1, 1]} : vector<8x512xf32> to vector<8x128xf32>
    %112 = arith.negf %111 : vector<8x128xf32>
    %113 = math.exp %112 : vector<8x128xf32>
    %cst_31 = arith.constant 1.000000e+00 : f32
    %114 = vector.broadcast %cst_31 : f32 to vector<8x128xf32>
    %115 = arith.addf %114, %113 : vector<8x128xf32>
    %116 = arith.divf %114, %115 : vector<8x128xf32>
    %117 = arith.mulf %108, %34 : vector<8x128xf32>
    %118 = arith.mulf %102, %110 : vector<8x128xf32>
    %119 = arith.addf %117, %118 : vector<8x128xf32>
    %120 = math.tanh %119 : vector<8x128xf32>
    %121 = arith.mulf %116, %120 : vector<8x128xf32>
    %122 = arith.truncf %121 : vector<8x128xf32> to vector<8x128xbf16>
    %c0_32 = arith.constant 0 : index
    %c0_33 = arith.constant 0 : index
    %123 = vector.load %arg1[%c0_32, %c0_33] : memref<128x1024xbf16, #tpu.memory_space<vmem>>, vector<128x1024xbf16>
    %cst_34 = arith.constant dense<0.000000e+00> : vector<8x1024xf32>
    %124 = tpu.matmul %122, %123, %cst_34 {dimension_numbers = #tpu.dot_dimension_numbers<[1], [0], [0], [1], [0, 0, 1, 1], [], []>} : vector<8x128xbf16>, vector<128x1024xbf16>, vector<8x1024xf32> -> vector<8x1024xf32>
    %125 = vector.extract_strided_slice %124 {offsets = [0, 0], sizes = [8, 512], strides = [1, 1]} : vector<8x1024xf32> to vector<8x512xf32>
    %126 = arith.addf %125, %3 : vector<8x512xf32>
    %127 = vector.extract_strided_slice %124 {offsets = [0, 512], sizes = [8, 512], strides = [1, 1]} : vector<8x1024xf32> to vector<8x512xf32>
    %128 = arith.addf %126, %74 : vector<8x512xf32>
    %129 = vector.extract_strided_slice %128 {offsets = [0, 0], sizes = [8, 128], strides = [1, 1]} : vector<8x512xf32> to vector<8x128xf32>
    %130 = arith.negf %129 : vector<8x128xf32>
    %131 = math.exp %130 : vector<8x128xf32>
    %cst_35 = arith.constant 1.000000e+00 : f32
    %132 = vector.broadcast %cst_35 : f32 to vector<8x128xf32>
    %133 = arith.addf %132, %131 : vector<8x128xf32>
    %134 = arith.divf %132, %133 : vector<8x128xf32>
    %135 = vector.extract_strided_slice %128 {offsets = [0, 128], sizes = [8, 128], strides = [1, 1]} : vector<8x512xf32> to vector<8x128xf32>
    %136 = arith.negf %135 : vector<8x128xf32>
    %137 = math.exp %136 : vector<8x128xf32>
    %cst_36 = arith.constant 1.000000e+00 : f32
    %138 = vector.broadcast %cst_36 : f32 to vector<8x128xf32>
    %139 = arith.addf %138, %137 : vector<8x128xf32>
    %140 = arith.divf %138, %139 : vector<8x128xf32>
    %141 = vector.extract_strided_slice %128 {offsets = [0, 256], sizes = [8, 128], strides = [1, 1]} : vector<8x512xf32> to vector<8x128xf32>
    %142 = math.tanh %141 : vector<8x128xf32>
    %143 = vector.extract_strided_slice %128 {offsets = [0, 384], sizes = [8, 128], strides = [1, 1]} : vector<8x512xf32> to vector<8x128xf32>
    %144 = arith.negf %143 : vector<8x128xf32>
    %145 = math.exp %144 : vector<8x128xf32>
    %cst_37 = arith.constant 1.000000e+00 : f32
    %146 = vector.broadcast %cst_37 : f32 to vector<8x128xf32>
    %147 = arith.addf %146, %145 : vector<8x128xf32>
    %148 = arith.divf %146, %147 : vector<8x128xf32>
    %149 = arith.mulf %140, %66 : vector<8x128xf32>
    %150 = arith.mulf %134, %142 : vector<8x128xf32>
    %151 = arith.addf %149, %150 : vector<8x128xf32>
    %152 = math.tanh %151 : vector<8x128xf32>
    %153 = arith.mulf %148, %152 : vector<8x128xf32>
    %154 = arith.truncf %153 : vector<8x128xf32> to vector<8x128xbf16>
    %c0_38 = arith.constant 0 : index
    %c0_39 = arith.constant 0 : index
    %155 = vector.load %arg2[%c0_38, %c0_39] : memref<128x768xbf16, #tpu.memory_space<vmem>>, vector<128x768xbf16>
    %cst_40 = arith.constant dense<0.000000e+00> : vector<8x768xf32>
    %156 = tpu.matmul %154, %155, %cst_40 {dimension_numbers = #tpu.dot_dimension_numbers<[1], [0], [0], [1], [0, 0, 1, 1], [], []>} : vector<8x128xbf16>, vector<128x768xbf16>, vector<8x768xf32> -> vector<8x768xf32>
    %157 = vector.extract_strided_slice %156 {offsets = [0, 0], sizes = [8, 256], strides = [1, 1]} : vector<8x768xf32> to vector<8x256xf32>
    %158 = arith.addf %157, %6 : vector<8x256xf32>
    %159 = vector.extract_strided_slice %156 {offsets = [0, 256], sizes = [8, 512], strides = [1, 1]} : vector<8x768xf32> to vector<8x512xf32>
    %c0_41 = arith.constant 0 : index
    %c1_42 = arith.constant 1 : index
    %c0_43 = arith.constant 0 : index
    %160 = vector.load %arg6[%c0_41, %c1_42, %c0_43] : memref<8x6x256xf32, #tpu.memory_space<vmem>>, vector<8x1x256xf32>
    %161 = vector.shape_cast %160 : vector<8x1x256xf32> to vector<8x256xf32>
    %162 = vector.shape_cast %158 : vector<8x256xf32> to vector<8x1x256xf32>
    tpu.vector_store %arg6[%c0_41, %c1_42, %c0_43], %162 {strides = array<i32>} : memref<8x6x256xf32, #tpu.memory_space<vmem>>, vector<8x1x256xf32>,
    %cst_44 = arith.constant dense<0xFF800000> : vector<8xf32>
    %163 = vector.multi_reduction <maximumf>, %158, %cst_44 [1] : vector<8x256xf32> to vector<8xf32>
    %164 = vector.shape_cast %163 : vector<8xf32> to vector<8x1xf32>
    %165 = vector.broadcast %164 : vector<8x1xf32> to vector<8x256xf32>
    %166 = arith.cmpf oeq, %158, %165 : vector<8x256xf32>
    %c256_i32_45 = arith.constant 256 : i32
    %167 = vector.broadcast %c256_i32_45 : i32 to vector<8x256xi32>
    %168 = arith.select %166, %0, %167 : vector<8x256xi1>, vector<8x256xi32>
    %cst_46 = arith.constant dense<2147483647> : vector<8xi32>
    %169 = vector.multi_reduction <minsi>, %168, %cst_46 [1] : vector<8x256xi32> to vector<8xi32>
    %170 = vector.shape_cast %169 : vector<8xi32> to vector<8x1xi32>
    %171 = vector.broadcast %170 : vector<8x1xi32> to vector<8x256xi32>
    %172 = arith.cmpi eq, %0, %171 : vector<8x256xi32>
    %173 = arith.extui %172 : vector<8x256xi1> to vector<8x256xi32>
    %174 = arith.sitofp %173 : vector<8x256xi32> to vector<8x256xf32>
    %175 = arith.truncf %174 : vector<8x256xf32> to vector<8x256xbf16>
    %c0_47 = arith.constant 0 : index
    %c0_48 = arith.constant 0 : index
    %176 = vector.load %arg5[%c0_47, %c0_48] : memref<256x512xbf16, #tpu.memory_space<vmem>>, vector<256x512xbf16>
    %cst_49 = arith.constant dense<0.000000e+00> : vector<8x512xf32>
    %177 = tpu.matmul %175, %176, %cst_49 {dimension_numbers = #tpu.dot_dimension_numbers<[1], [0], [0], [1], [0, 0, 1, 1], [], []>} : vector<8x256xbf16>, vector<256x512xbf16>, vector<8x512xf32> -> vector<8x512xf32>
    %c2 = arith.constant 2 : index
    %c0_50 = arith.constant 0 : index
    %c0_51 = arith.constant 0 : index
    %178 = vector.load %arg0[%c2, %c0_50, %c0_51] : memref<6x8x512xf32, #tpu.memory_space<vmem>>, vector<1x8x512xf32>
    %179 = vector.shape_cast %178 : vector<1x8x512xf32> to vector<8x512xf32>
    %180 = arith.addf %177, %179 : vector<8x512xf32>
    %181 = arith.addf %180, %127 : vector<8x512xf32>
    %182 = vector.extract_strided_slice %181 {offsets = [0, 0], sizes = [8, 128], strides = [1, 1]} : vector<8x512xf32> to vector<8x128xf32>
    %183 = arith.negf %182 : vector<8x128xf32>
    %184 = math.exp %183 : vector<8x128xf32>
    %cst_52 = arith.constant 1.000000e+00 : f32
    %185 = vector.broadcast %cst_52 : f32 to vector<8x128xf32>
    %186 = arith.addf %185, %184 : vector<8x128xf32>
    %187 = arith.divf %185, %186 : vector<8x128xf32>
    %188 = vector.extract_strided_slice %181 {offsets = [0, 128], sizes = [8, 128], strides = [1, 1]} : vector<8x512xf32> to vector<8x128xf32>
    %189 = arith.negf %188 : vector<8x128xf32>
    %190 = math.exp %189 : vector<8x128xf32>
    %cst_53 = arith.constant 1.000000e+00 : f32
    %191 = vector.broadcast %cst_53 : f32 to vector<8x128xf32>
    %192 = arith.addf %191, %190 : vector<8x128xf32>
    %193 = arith.divf %191, %192 : vector<8x128xf32>
    %194 = vector.extract_strided_slice %181 {offsets = [0, 256], sizes = [8, 128], strides = [1, 1]} : vector<8x512xf32> to vector<8x128xf32>
    %195 = math.tanh %194 : vector<8x128xf32>
    %196 = vector.extract_strided_slice %181 {offsets = [0, 384], sizes = [8, 128], strides = [1, 1]} : vector<8x512xf32> to vector<8x128xf32>
    %197 = arith.negf %196 : vector<8x128xf32>
    %198 = math.exp %197 : vector<8x128xf32>
    %cst_54 = arith.constant 1.000000e+00 : f32
    %199 = vector.broadcast %cst_54 : f32 to vector<8x128xf32>
    %200 = arith.addf %199, %198 : vector<8x128xf32>
    %201 = arith.divf %199, %200 : vector<8x128xf32>
    %202 = arith.mulf %193, %119 : vector<8x128xf32>
    %203 = arith.mulf %187, %195 : vector<8x128xf32>
    %204 = arith.addf %202, %203 : vector<8x128xf32>
    %205 = math.tanh %204 : vector<8x128xf32>
    %206 = arith.mulf %201, %205 : vector<8x128xf32>
    %207 = arith.truncf %206 : vector<8x128xf32> to vector<8x128xbf16>
    %c0_55 = arith.constant 0 : index
    %c0_56 = arith.constant 0 : index
    %208 = vector.load %arg1[%c0_55, %c0_56] : memref<128x1024xbf16, #tpu.memory_space<vmem>>, vector<128x1024xbf16>
    %cst_57 = arith.constant dense<0.000000e+00> : vector<8x1024xf32>
    %209 = tpu.matmul %207, %208, %cst_57 {dimension_numbers = #tpu.dot_dimension_numbers<[1], [0], [0], [1], [0, 0, 1, 1], [], []>} : vector<8x128xbf16>, vector<128x1024xbf16>, vector<8x1024xf32> -> vector<8x1024xf32>
    %210 = vector.extract_strided_slice %209 {offsets = [0, 0], sizes = [8, 512], strides = [1, 1]} : vector<8x1024xf32> to vector<8x512xf32>
    %211 = arith.addf %210, %3 : vector<8x512xf32>
    %212 = vector.extract_strided_slice %209 {offsets = [0, 512], sizes = [8, 512], strides = [1, 1]} : vector<8x1024xf32> to vector<8x512xf32>
    %213 = arith.addf %211, %159 : vector<8x512xf32>
    %214 = vector.extract_strided_slice %213 {offsets = [0, 0], sizes = [8, 128], strides = [1, 1]} : vector<8x512xf32> to vector<8x128xf32>
    %215 = arith.negf %214 : vector<8x128xf32>
    %216 = math.exp %215 : vector<8x128xf32>
    %cst_58 = arith.constant 1.000000e+00 : f32
    %217 = vector.broadcast %cst_58 : f32 to vector<8x128xf32>
    %218 = arith.addf %217, %216 : vector<8x128xf32>
    %219 = arith.divf %217, %218 : vector<8x128xf32>
    %220 = vector.extract_strided_slice %213 {offsets = [0, 128], sizes = [8, 128], strides = [1, 1]} : vector<8x512xf32> to vector<8x128xf32>
    %221 = arith.negf %220 : vector<8x128xf32>
    %222 = math.exp %221 : vector<8x128xf32>
    %cst_59 = arith.constant 1.000000e+00 : f32
    %223 = vector.broadcast %cst_59 : f32 to vector<8x128xf32>
    %224 = arith.addf %223, %222 : vector<8x128xf32>
    %225 = arith.divf %223, %224 : vector<8x128xf32>
    %226 = vector.extract_strided_slice %213 {offsets = [0, 256], sizes = [8, 128], strides = [1, 1]} : vector<8x512xf32> to vector<8x128xf32>
    %227 = math.tanh %226 : vector<8x128xf32>
    %228 = vector.extract_strided_slice %213 {offsets = [0, 384], sizes = [8, 128], strides = [1, 1]} : vector<8x512xf32> to vector<8x128xf32>
    %229 = arith.negf %228 : vector<8x128xf32>
    %230 = math.exp %229 : vector<8x128xf32>
    %cst_60 = arith.constant 1.000000e+00 : f32
    %231 = vector.broadcast %cst_60 : f32 to vector<8x128xf32>
    %232 = arith.addf %231, %230 : vector<8x128xf32>
    %233 = arith.divf %231, %232 : vector<8x128xf32>
    %234 = arith.mulf %225, %151 : vector<8x128xf32>
    %235 = arith.mulf %219, %227 : vector<8x128xf32>
    %236 = arith.addf %234, %235 : vector<8x128xf32>
    %237 = math.tanh %236 : vector<8x128xf32>
    %238 = arith.mulf %233, %237 : vector<8x128xf32>
    %239 = arith.truncf %238 : vector<8x128xf32> to vector<8x128xbf16>
    %c0_61 = arith.constant 0 : index
    %c0_62 = arith.constant 0 : index
    %240 = vector.load %arg2[%c0_61, %c0_62] : memref<128x768xbf16, #tpu.memory_space<vmem>>, vector<128x768xbf16>
    %cst_63 = arith.constant dense<0.000000e+00> : vector<8x768xf32>
    %241 = tpu.matmul %239, %240, %cst_63 {dimension_numbers = #tpu.dot_dimension_numbers<[1], [0], [0], [1], [0, 0, 1, 1], [], []>} : vector<8x128xbf16>, vector<128x768xbf16>, vector<8x768xf32> -> vector<8x768xf32>
    %242 = vector.extract_strided_slice %241 {offsets = [0, 0], sizes = [8, 256], strides = [1, 1]} : vector<8x768xf32> to vector<8x256xf32>
    %243 = arith.addf %242, %6 : vector<8x256xf32>
    %244 = vector.extract_strided_slice %241 {offsets = [0, 256], sizes = [8, 512], strides = [1, 1]} : vector<8x768xf32> to vector<8x512xf32>
    %c0_64 = arith.constant 0 : index
    %c2_65 = arith.constant 2 : index
    %c0_66 = arith.constant 0 : index
    %245 = vector.load %arg6[%c0_64, %c2_65, %c0_66] : memref<8x6x256xf32, #tpu.memory_space<vmem>>, vector<8x1x256xf32>
    %246 = vector.shape_cast %245 : vector<8x1x256xf32> to vector<8x256xf32>
    %247 = vector.shape_cast %243 : vector<8x256xf32> to vector<8x1x256xf32>
    tpu.vector_store %arg6[%c0_64, %c2_65, %c0_66], %247 {strides = array<i32>} : memref<8x6x256xf32, #tpu.memory_space<vmem>>, vector<8x1x256xf32>,
    %cst_67 = arith.constant dense<0xFF800000> : vector<8xf32>
    %248 = vector.multi_reduction <maximumf>, %243, %cst_67 [1] : vector<8x256xf32> to vector<8xf32>
    %249 = vector.shape_cast %248 : vector<8xf32> to vector<8x1xf32>
    %250 = vector.broadcast %249 : vector<8x1xf32> to vector<8x256xf32>
    %251 = arith.cmpf oeq, %243, %250 : vector<8x256xf32>
    %c256_i32_68 = arith.constant 256 : i32
    %252 = vector.broadcast %c256_i32_68 : i32 to vector<8x256xi32>
    %253 = arith.select %251, %0, %252 : vector<8x256xi1>, vector<8x256xi32>
    %cst_69 = arith.constant dense<2147483647> : vector<8xi32>
    %254 = vector.multi_reduction <minsi>, %253, %cst_69 [1] : vector<8x256xi32> to vector<8xi32>
    %255 = vector.shape_cast %254 : vector<8xi32> to vector<8x1xi32>
    %256 = vector.broadcast %255 : vector<8x1xi32> to vector<8x256xi32>
    %257 = arith.cmpi eq, %0, %256 : vector<8x256xi32>
    %258 = arith.extui %257 : vector<8x256xi1> to vector<8x256xi32>
    %259 = arith.sitofp %258 : vector<8x256xi32> to vector<8x256xf32>
    %260 = arith.truncf %259 : vector<8x256xf32> to vector<8x256xbf16>
    %c0_70 = arith.constant 0 : index
    %c0_71 = arith.constant 0 : index
    %261 = vector.load %arg5[%c0_70, %c0_71] : memref<256x512xbf16, #tpu.memory_space<vmem>>, vector<256x512xbf16>
    %cst_72 = arith.constant dense<0.000000e+00> : vector<8x512xf32>
    %262 = tpu.matmul %260, %261, %cst_72 {dimension_numbers = #tpu.dot_dimension_numbers<[1], [0], [0], [1], [0, 0, 1, 1], [], []>} : vector<8x256xbf16>, vector<256x512xbf16>, vector<8x512xf32> -> vector<8x512xf32>
    %c3 = arith.constant 3 : index
    %c0_73 = arith.constant 0 : index
    %c0_74 = arith.constant 0 : index
    %263 = vector.load %arg0[%c3, %c0_73, %c0_74] : memref<6x8x512xf32, #tpu.memory_space<vmem>>, vector<1x8x512xf32>
    %264 = vector.shape_cast %263 : vector<1x8x512xf32> to vector<8x512xf32>
    %265 = arith.addf %262, %264 : vector<8x512xf32>
    %266 = arith.addf %265, %212 : vector<8x512xf32>
    %267 = vector.extract_strided_slice %266 {offsets = [0, 0], sizes = [8, 128], strides = [1, 1]} : vector<8x512xf32> to vector<8x128xf32>
    %268 = arith.negf %267 : vector<8x128xf32>
    %269 = math.exp %268 : vector<8x128xf32>
    %cst_75 = arith.constant 1.000000e+00 : f32
    %270 = vector.broadcast %cst_75 : f32 to vector<8x128xf32>
    %271 = arith.addf %270, %269 : vector<8x128xf32>
    %272 = arith.divf %270, %271 : vector<8x128xf32>
    %273 = vector.extract_strided_slice %266 {offsets = [0, 128], sizes = [8, 128], strides = [1, 1]} : vector<8x512xf32> to vector<8x128xf32>
    %274 = arith.negf %273 : vector<8x128xf32>
    %275 = math.exp %274 : vector<8x128xf32>
    %cst_76 = arith.constant 1.000000e+00 : f32
    %276 = vector.broadcast %cst_76 : f32 to vector<8x128xf32>
    %277 = arith.addf %276, %275 : vector<8x128xf32>
    %278 = arith.divf %276, %277 : vector<8x128xf32>
    %279 = vector.extract_strided_slice %266 {offsets = [0, 256], sizes = [8, 128], strides = [1, 1]} : vector<8x512xf32> to vector<8x128xf32>
    %280 = math.tanh %279 : vector<8x128xf32>
    %281 = vector.extract_strided_slice %266 {offsets = [0, 384], sizes = [8, 128], strides = [1, 1]} : vector<8x512xf32> to vector<8x128xf32>
    %282 = arith.negf %281 : vector<8x128xf32>
    %283 = math.exp %282 : vector<8x128xf32>
    %cst_77 = arith.constant 1.000000e+00 : f32
    %284 = vector.broadcast %cst_77 : f32 to vector<8x128xf32>
    %285 = arith.addf %284, %283 : vector<8x128xf32>
    %286 = arith.divf %284, %285 : vector<8x128xf32>
    %287 = arith.mulf %278, %204 : vector<8x128xf32>
    %288 = arith.mulf %272, %280 : vector<8x128xf32>
    %289 = arith.addf %287, %288 : vector<8x128xf32>
    %290 = math.tanh %289 : vector<8x128xf32>
    %291 = arith.mulf %286, %290 : vector<8x128xf32>
    %292 = arith.truncf %291 : vector<8x128xf32> to vector<8x128xbf16>
    %c0_78 = arith.constant 0 : index
    %c0_79 = arith.constant 0 : index
    %293 = vector.load %arg1[%c0_78, %c0_79] : memref<128x1024xbf16, #tpu.memory_space<vmem>>, vector<128x1024xbf16>
    %cst_80 = arith.constant dense<0.000000e+00> : vector<8x1024xf32>
    %294 = tpu.matmul %292, %293, %cst_80 {dimension_numbers = #tpu.dot_dimension_numbers<[1], [0], [0], [1], [0, 0, 1, 1], [], []>} : vector<8x128xbf16>, vector<128x1024xbf16>, vector<8x1024xf32> -> vector<8x1024xf32>
    %295 = vector.extract_strided_slice %294 {offsets = [0, 0], sizes = [8, 512], strides = [1, 1]} : vector<8x1024xf32> to vector<8x512xf32>
    %296 = arith.addf %295, %3 : vector<8x512xf32>
    %297 = vector.extract_strided_slice %294 {offsets = [0, 512], sizes = [8, 512], strides = [1, 1]} : vector<8x1024xf32> to vector<8x512xf32>
    %298 = arith.addf %296, %244 : vector<8x512xf32>
    %299 = vector.extract_strided_slice %298 {offsets = [0, 0], sizes = [8, 128], strides = [1, 1]} : vector<8x512xf32> to vector<8x128xf32>
    %300 = arith.negf %299 : vector<8x128xf32>
    %301 = math.exp %300 : vector<8x128xf32>
    %cst_81 = arith.constant 1.000000e+00 : f32
    %302 = vector.broadcast %cst_81 : f32 to vector<8x128xf32>
    %303 = arith.addf %302, %301 : vector<8x128xf32>
    %304 = arith.divf %302, %303 : vector<8x128xf32>
    %305 = vector.extract_strided_slice %298 {offsets = [0, 128], sizes = [8, 128], strides = [1, 1]} : vector<8x512xf32> to vector<8x128xf32>
    %306 = arith.negf %305 : vector<8x128xf32>
    %307 = math.exp %306 : vector<8x128xf32>
    %cst_82 = arith.constant 1.000000e+00 : f32
    %308 = vector.broadcast %cst_82 : f32 to vector<8x128xf32>
    %309 = arith.addf %308, %307 : vector<8x128xf32>
    %310 = arith.divf %308, %309 : vector<8x128xf32>
    %311 = vector.extract_strided_slice %298 {offsets = [0, 256], sizes = [8, 128], strides = [1, 1]} : vector<8x512xf32> to vector<8x128xf32>
    %312 = math.tanh %311 : vector<8x128xf32>
    %313 = vector.extract_strided_slice %298 {offsets = [0, 384], sizes = [8, 128], strides = [1, 1]} : vector<8x512xf32> to vector<8x128xf32>
    %314 = arith.negf %313 : vector<8x128xf32>
    %315 = math.exp %314 : vector<8x128xf32>
    %cst_83 = arith.constant 1.000000e+00 : f32
    %316 = vector.broadcast %cst_83 : f32 to vector<8x128xf32>
    %317 = arith.addf %316, %315 : vector<8x128xf32>
    %318 = arith.divf %316, %317 : vector<8x128xf32>
    %319 = arith.mulf %310, %236 : vector<8x128xf32>
    %320 = arith.mulf %304, %312 : vector<8x128xf32>
    %321 = arith.addf %319, %320 : vector<8x128xf32>
    %322 = math.tanh %321 : vector<8x128xf32>
    %323 = arith.mulf %318, %322 : vector<8x128xf32>
    %324 = arith.truncf %323 : vector<8x128xf32> to vector<8x128xbf16>
    %c0_84 = arith.constant 0 : index
    %c0_85 = arith.constant 0 : index
    %325 = vector.load %arg2[%c0_84, %c0_85] : memref<128x768xbf16, #tpu.memory_space<vmem>>, vector<128x768xbf16>
    %cst_86 = arith.constant dense<0.000000e+00> : vector<8x768xf32>
    %326 = tpu.matmul %324, %325, %cst_86 {dimension_numbers = #tpu.dot_dimension_numbers<[1], [0], [0], [1], [0, 0, 1, 1], [], []>} : vector<8x128xbf16>, vector<128x768xbf16>, vector<8x768xf32> -> vector<8x768xf32>
    %327 = vector.extract_strided_slice %326 {offsets = [0, 0], sizes = [8, 256], strides = [1, 1]} : vector<8x768xf32> to vector<8x256xf32>
    %328 = arith.addf %327, %6 : vector<8x256xf32>
    %329 = vector.extract_strided_slice %326 {offsets = [0, 256], sizes = [8, 512], strides = [1, 1]} : vector<8x768xf32> to vector<8x512xf32>
    %c0_87 = arith.constant 0 : index
    %c3_88 = arith.constant 3 : index
    %c0_89 = arith.constant 0 : index
    %330 = vector.load %arg6[%c0_87, %c3_88, %c0_89] : memref<8x6x256xf32, #tpu.memory_space<vmem>>, vector<8x1x256xf32>
    %331 = vector.shape_cast %330 : vector<8x1x256xf32> to vector<8x256xf32>
    %332 = vector.shape_cast %328 : vector<8x256xf32> to vector<8x1x256xf32>
    tpu.vector_store %arg6[%c0_87, %c3_88, %c0_89], %332 {strides = array<i32>} : memref<8x6x256xf32, #tpu.memory_space<vmem>>, vector<8x1x256xf32>,
    %cst_90 = arith.constant dense<0xFF800000> : vector<8xf32>
    %333 = vector.multi_reduction <maximumf>, %328, %cst_90 [1] : vector<8x256xf32> to vector<8xf32>
    %334 = vector.shape_cast %333 : vector<8xf32> to vector<8x1xf32>
    %335 = vector.broadcast %334 : vector<8x1xf32> to vector<8x256xf32>
    %336 = arith.cmpf oeq, %328, %335 : vector<8x256xf32>
    %c256_i32_91 = arith.constant 256 : i32
    %337 = vector.broadcast %c256_i32_91 : i32 to vector<8x256xi32>
    %338 = arith.select %336, %0, %337 : vector<8x256xi1>, vector<8x256xi32>
    %cst_92 = arith.constant dense<2147483647> : vector<8xi32>
    %339 = vector.multi_reduction <minsi>, %338, %cst_92 [1] : vector<8x256xi32> to vector<8xi32>
    %340 = vector.shape_cast %339 : vector<8xi32> to vector<8x1xi32>
    %341 = vector.broadcast %340 : vector<8x1xi32> to vector<8x256xi32>
    %342 = arith.cmpi eq, %0, %341 : vector<8x256xi32>
    %343 = arith.extui %342 : vector<8x256xi1> to vector<8x256xi32>
    %344 = arith.sitofp %343 : vector<8x256xi32> to vector<8x256xf32>
    %345 = arith.truncf %344 : vector<8x256xf32> to vector<8x256xbf16>
    %c0_93 = arith.constant 0 : index
    %c0_94 = arith.constant 0 : index
    %346 = vector.load %arg5[%c0_93, %c0_94] : memref<256x512xbf16, #tpu.memory_space<vmem>>, vector<256x512xbf16>
    %cst_95 = arith.constant dense<0.000000e+00> : vector<8x512xf32>
    %347 = tpu.matmul %345, %346, %cst_95 {dimension_numbers = #tpu.dot_dimension_numbers<[1], [0], [0], [1], [0, 0, 1, 1], [], []>} : vector<8x256xbf16>, vector<256x512xbf16>, vector<8x512xf32> -> vector<8x512xf32>
    %c4 = arith.constant 4 : index
    %c0_96 = arith.constant 0 : index
    %c0_97 = arith.constant 0 : index
    %348 = vector.load %arg0[%c4, %c0_96, %c0_97] : memref<6x8x512xf32, #tpu.memory_space<vmem>>, vector<1x8x512xf32>
    %349 = vector.shape_cast %348 : vector<1x8x512xf32> to vector<8x512xf32>
    %350 = arith.addf %347, %349 : vector<8x512xf32>
    %351 = arith.addf %350, %297 : vector<8x512xf32>
    %352 = vector.extract_strided_slice %351 {offsets = [0, 0], sizes = [8, 128], strides = [1, 1]} : vector<8x512xf32> to vector<8x128xf32>
    %353 = arith.negf %352 : vector<8x128xf32>
    %354 = math.exp %353 : vector<8x128xf32>
    %cst_98 = arith.constant 1.000000e+00 : f32
    %355 = vector.broadcast %cst_98 : f32 to vector<8x128xf32>
    %356 = arith.addf %355, %354 : vector<8x128xf32>
    %357 = arith.divf %355, %356 : vector<8x128xf32>
    %358 = vector.extract_strided_slice %351 {offsets = [0, 128], sizes = [8, 128], strides = [1, 1]} : vector<8x512xf32> to vector<8x128xf32>
    %359 = arith.negf %358 : vector<8x128xf32>
    %360 = math.exp %359 : vector<8x128xf32>
    %cst_99 = arith.constant 1.000000e+00 : f32
    %361 = vector.broadcast %cst_99 : f32 to vector<8x128xf32>
    %362 = arith.addf %361, %360 : vector<8x128xf32>
    %363 = arith.divf %361, %362 : vector<8x128xf32>
    %364 = vector.extract_strided_slice %351 {offsets = [0, 256], sizes = [8, 128], strides = [1, 1]} : vector<8x512xf32> to vector<8x128xf32>
    %365 = math.tanh %364 : vector<8x128xf32>
    %366 = vector.extract_strided_slice %351 {offsets = [0, 384], sizes = [8, 128], strides = [1, 1]} : vector<8x512xf32> to vector<8x128xf32>
    %367 = arith.negf %366 : vector<8x128xf32>
    %368 = math.exp %367 : vector<8x128xf32>
    %cst_100 = arith.constant 1.000000e+00 : f32
    %369 = vector.broadcast %cst_100 : f32 to vector<8x128xf32>
    %370 = arith.addf %369, %368 : vector<8x128xf32>
    %371 = arith.divf %369, %370 : vector<8x128xf32>
    %372 = arith.mulf %363, %289 : vector<8x128xf32>
    %373 = arith.mulf %357, %365 : vector<8x128xf32>
    %374 = arith.addf %372, %373 : vector<8x128xf32>
    %375 = math.tanh %374 : vector<8x128xf32>
    %376 = arith.mulf %371, %375 : vector<8x128xf32>
    %377 = arith.truncf %376 : vector<8x128xf32> to vector<8x128xbf16>
    %c0_101 = arith.constant 0 : index
    %c0_102 = arith.constant 0 : index
    %378 = vector.load %arg1[%c0_101, %c0_102] : memref<128x1024xbf16, #tpu.memory_space<vmem>>, vector<128x1024xbf16>
    %cst_103 = arith.constant dense<0.000000e+00> : vector<8x1024xf32>
    %379 = tpu.matmul %377, %378, %cst_103 {dimension_numbers = #tpu.dot_dimension_numbers<[1], [0], [0], [1], [0, 0, 1, 1], [], []>} : vector<8x128xbf16>, vector<128x1024xbf16>, vector<8x1024xf32> -> vector<8x1024xf32>
    %380 = vector.extract_strided_slice %379 {offsets = [0, 0], sizes = [8, 512], strides = [1, 1]} : vector<8x1024xf32> to vector<8x512xf32>
    %381 = arith.addf %380, %3 : vector<8x512xf32>
    %382 = vector.extract_strided_slice %379 {offsets = [0, 512], sizes = [8, 512], strides = [1, 1]} : vector<8x1024xf32> to vector<8x512xf32>
    %383 = arith.addf %381, %329 : vector<8x512xf32>
    %384 = vector.extract_strided_slice %383 {offsets = [0, 0], sizes = [8, 128], strides = [1, 1]} : vector<8x512xf32> to vector<8x128xf32>
    %385 = arith.negf %384 : vector<8x128xf32>
    %386 = math.exp %385 : vector<8x128xf32>
    %cst_104 = arith.constant 1.000000e+00 : f32
    %387 = vector.broadcast %cst_104 : f32 to vector<8x128xf32>
    %388 = arith.addf %387, %386 : vector<8x128xf32>
    %389 = arith.divf %387, %388 : vector<8x128xf32>
    %390 = vector.extract_strided_slice %383 {offsets = [0, 128], sizes = [8, 128], strides = [1, 1]} : vector<8x512xf32> to vector<8x128xf32>
    %391 = arith.negf %390 : vector<8x128xf32>
    %392 = math.exp %391 : vector<8x128xf32>
    %cst_105 = arith.constant 1.000000e+00 : f32
    %393 = vector.broadcast %cst_105 : f32 to vector<8x128xf32>
    %394 = arith.addf %393, %392 : vector<8x128xf32>
    %395 = arith.divf %393, %394 : vector<8x128xf32>
    %396 = vector.extract_strided_slice %383 {offsets = [0, 256], sizes = [8, 128], strides = [1, 1]} : vector<8x512xf32> to vector<8x128xf32>
    %397 = math.tanh %396 : vector<8x128xf32>
    %398 = vector.extract_strided_slice %383 {offsets = [0, 384], sizes = [8, 128], strides = [1, 1]} : vector<8x512xf32> to vector<8x128xf32>
    %399 = arith.negf %398 : vector<8x128xf32>
    %400 = math.exp %399 : vector<8x128xf32>
    %cst_106 = arith.constant 1.000000e+00 : f32
    %401 = vector.broadcast %cst_106 : f32 to vector<8x128xf32>
    %402 = arith.addf %401, %400 : vector<8x128xf32>
    %403 = arith.divf %401, %402 : vector<8x128xf32>
    %404 = arith.mulf %395, %321 : vector<8x128xf32>
    %405 = arith.mulf %389, %397 : vector<8x128xf32>
    %406 = arith.addf %404, %405 : vector<8x128xf32>
    %407 = math.tanh %406 : vector<8x128xf32>
    %408 = arith.mulf %403, %407 : vector<8x128xf32>
    %409 = arith.truncf %408 : vector<8x128xf32> to vector<8x128xbf16>
    %c0_107 = arith.constant 0 : index
    %c0_108 = arith.constant 0 : index
    %410 = vector.load %arg2[%c0_107, %c0_108] : memref<128x768xbf16, #tpu.memory_space<vmem>>, vector<128x768xbf16>
    %cst_109 = arith.constant dense<0.000000e+00> : vector<8x768xf32>
    %411 = tpu.matmul %409, %410, %cst_109 {dimension_numbers = #tpu.dot_dimension_numbers<[1], [0], [0], [1], [0, 0, 1, 1], [], []>} : vector<8x128xbf16>, vector<128x768xbf16>, vector<8x768xf32> -> vector<8x768xf32>
    %412 = vector.extract_strided_slice %411 {offsets = [0, 0], sizes = [8, 256], strides = [1, 1]} : vector<8x768xf32> to vector<8x256xf32>
    %413 = arith.addf %412, %6 : vector<8x256xf32>
    %414 = vector.extract_strided_slice %411 {offsets = [0, 256], sizes = [8, 512], strides = [1, 1]} : vector<8x768xf32> to vector<8x512xf32>
    %c0_110 = arith.constant 0 : index
    %c4_111 = arith.constant 4 : index
    %c0_112 = arith.constant 0 : index
    %415 = vector.load %arg6[%c0_110, %c4_111, %c0_112] : memref<8x6x256xf32, #tpu.memory_space<vmem>>, vector<8x1x256xf32>
    %416 = vector.shape_cast %415 : vector<8x1x256xf32> to vector<8x256xf32>
    %417 = vector.shape_cast %413 : vector<8x256xf32> to vector<8x1x256xf32>
    tpu.vector_store %arg6[%c0_110, %c4_111, %c0_112], %417 {strides = array<i32>} : memref<8x6x256xf32, #tpu.memory_space<vmem>>, vector<8x1x256xf32>,
    %cst_113 = arith.constant dense<0xFF800000> : vector<8xf32>
    %418 = vector.multi_reduction <maximumf>, %413, %cst_113 [1] : vector<8x256xf32> to vector<8xf32>
    %419 = vector.shape_cast %418 : vector<8xf32> to vector<8x1xf32>
    %420 = vector.broadcast %419 : vector<8x1xf32> to vector<8x256xf32>
    %421 = arith.cmpf oeq, %413, %420 : vector<8x256xf32>
    %c256_i32_114 = arith.constant 256 : i32
    %422 = vector.broadcast %c256_i32_114 : i32 to vector<8x256xi32>
    %423 = arith.select %421, %0, %422 : vector<8x256xi1>, vector<8x256xi32>
    %cst_115 = arith.constant dense<2147483647> : vector<8xi32>
    %424 = vector.multi_reduction <minsi>, %423, %cst_115 [1] : vector<8x256xi32> to vector<8xi32>
    %425 = vector.shape_cast %424 : vector<8xi32> to vector<8x1xi32>
    %426 = vector.broadcast %425 : vector<8x1xi32> to vector<8x256xi32>
    %427 = arith.cmpi eq, %0, %426 : vector<8x256xi32>
    %428 = arith.extui %427 : vector<8x256xi1> to vector<8x256xi32>
    %429 = arith.sitofp %428 : vector<8x256xi32> to vector<8x256xf32>
    %430 = arith.truncf %429 : vector<8x256xf32> to vector<8x256xbf16>
    %c0_116 = arith.constant 0 : index
    %c0_117 = arith.constant 0 : index
    %431 = vector.load %arg5[%c0_116, %c0_117] : memref<256x512xbf16, #tpu.memory_space<vmem>>, vector<256x512xbf16>
    %cst_118 = arith.constant dense<0.000000e+00> : vector<8x512xf32>
    %432 = tpu.matmul %430, %431, %cst_118 {dimension_numbers = #tpu.dot_dimension_numbers<[1], [0], [0], [1], [0, 0, 1, 1], [], []>} : vector<8x256xbf16>, vector<256x512xbf16>, vector<8x512xf32> -> vector<8x512xf32>
    %c5 = arith.constant 5 : index
    %c0_119 = arith.constant 0 : index
    %c0_120 = arith.constant 0 : index
    %433 = vector.load %arg0[%c5, %c0_119, %c0_120] : memref<6x8x512xf32, #tpu.memory_space<vmem>>, vector<1x8x512xf32>
    %434 = vector.shape_cast %433 : vector<1x8x512xf32> to vector<8x512xf32>
    %435 = arith.addf %432, %434 : vector<8x512xf32>
    %436 = arith.addf %435, %382 : vector<8x512xf32>
    %437 = vector.extract_strided_slice %436 {offsets = [0, 0], sizes = [8, 128], strides = [1, 1]} : vector<8x512xf32> to vector<8x128xf32>
    %438 = arith.negf %437 : vector<8x128xf32>
    %439 = math.exp %438 : vector<8x128xf32>
    %cst_121 = arith.constant 1.000000e+00 : f32
    %440 = vector.broadcast %cst_121 : f32 to vector<8x128xf32>
    %441 = arith.addf %440, %439 : vector<8x128xf32>
    %442 = arith.divf %440, %441 : vector<8x128xf32>
    %443 = vector.extract_strided_slice %436 {offsets = [0, 128], sizes = [8, 128], strides = [1, 1]} : vector<8x512xf32> to vector<8x128xf32>
    %444 = arith.negf %443 : vector<8x128xf32>
    %445 = math.exp %444 : vector<8x128xf32>
    %cst_122 = arith.constant 1.000000e+00 : f32
    %446 = vector.broadcast %cst_122 : f32 to vector<8x128xf32>
    %447 = arith.addf %446, %445 : vector<8x128xf32>
    %448 = arith.divf %446, %447 : vector<8x128xf32>
    %449 = vector.extract_strided_slice %436 {offsets = [0, 256], sizes = [8, 128], strides = [1, 1]} : vector<8x512xf32> to vector<8x128xf32>
    %450 = math.tanh %449 : vector<8x128xf32>
    %451 = vector.extract_strided_slice %436 {offsets = [0, 384], sizes = [8, 128], strides = [1, 1]} : vector<8x512xf32> to vector<8x128xf32>
    %452 = arith.negf %451 : vector<8x128xf32>
    %453 = math.exp %452 : vector<8x128xf32>
    %cst_123 = arith.constant 1.000000e+00 : f32
    %454 = vector.broadcast %cst_123 : f32 to vector<8x128xf32>
    %455 = arith.addf %454, %453 : vector<8x128xf32>
    %456 = arith.divf %454, %455 : vector<8x128xf32>
    %457 = arith.mulf %448, %374 : vector<8x128xf32>
    %458 = arith.mulf %442, %450 : vector<8x128xf32>
    %459 = arith.addf %457, %458 : vector<8x128xf32>
    %460 = math.tanh %459 : vector<8x128xf32>
    %461 = arith.mulf %456, %460 : vector<8x128xf32>
    %462 = arith.truncf %461 : vector<8x128xf32> to vector<8x128xbf16>
    %c0_124 = arith.constant 0 : index
    %c0_125 = arith.constant 0 : index
    %463 = vector.load %arg1[%c0_124, %c0_125] : memref<128x1024xbf16, #tpu.memory_space<vmem>>, vector<128x512xbf16>
    %cst_126 = arith.constant dense<0.000000e+00> : vector<8x512xf32>
    %464 = tpu.matmul %462, %463, %cst_126 {dimension_numbers = #tpu.dot_dimension_numbers<[1], [0], [0], [1], [0, 0, 1, 1], [], []>} : vector<8x128xbf16>, vector<128x512xbf16>, vector<8x512xf32> -> vector<8x512xf32>
    %465 = arith.addf %464, %3 : vector<8x512xf32>
    %466 = arith.addf %465, %414 : vector<8x512xf32>
    %467 = vector.extract_strided_slice %466 {offsets = [0, 0], sizes = [8, 128], strides = [1, 1]} : vector<8x512xf32> to vector<8x128xf32>
    %468 = arith.negf %467 : vector<8x128xf32>
    %469 = math.exp %468 : vector<8x128xf32>
    %cst_127 = arith.constant 1.000000e+00 : f32
    %470 = vector.broadcast %cst_127 : f32 to vector<8x128xf32>
    %471 = arith.addf %470, %469 : vector<8x128xf32>
    %472 = arith.divf %470, %471 : vector<8x128xf32>
    %473 = vector.extract_strided_slice %466 {offsets = [0, 128], sizes = [8, 128], strides = [1, 1]} : vector<8x512xf32> to vector<8x128xf32>
    %474 = arith.negf %473 : vector<8x128xf32>
    %475 = math.exp %474 : vector<8x128xf32>
    %cst_128 = arith.constant 1.000000e+00 : f32
    %476 = vector.broadcast %cst_128 : f32 to vector<8x128xf32>
    %477 = arith.addf %476, %475 : vector<8x128xf32>
    %478 = arith.divf %476, %477 : vector<8x128xf32>
    %479 = vector.extract_strided_slice %466 {offsets = [0, 256], sizes = [8, 128], strides = [1, 1]} : vector<8x512xf32> to vector<8x128xf32>
    %480 = math.tanh %479 : vector<8x128xf32>
    %481 = vector.extract_strided_slice %466 {offsets = [0, 384], sizes = [8, 128], strides = [1, 1]} : vector<8x512xf32> to vector<8x128xf32>
    %482 = arith.negf %481 : vector<8x128xf32>
    %483 = math.exp %482 : vector<8x128xf32>
    %cst_129 = arith.constant 1.000000e+00 : f32
    %484 = vector.broadcast %cst_129 : f32 to vector<8x128xf32>
    %485 = arith.addf %484, %483 : vector<8x128xf32>
    %486 = arith.divf %484, %485 : vector<8x128xf32>
    %487 = arith.mulf %478, %406 : vector<8x128xf32>
    %488 = arith.mulf %472, %480 : vector<8x128xf32>
    %489 = arith.addf %487, %488 : vector<8x128xf32>
    %490 = math.tanh %489 : vector<8x128xf32>
    %491 = arith.mulf %486, %490 : vector<8x128xf32>
    %492 = arith.truncf %491 : vector<8x128xf32> to vector<8x128xbf16>
    %c0_130 = arith.constant 0 : index
    %c0_131 = arith.constant 0 : index
    %493 = vector.load %arg2[%c0_130, %c0_131] : memref<128x768xbf16, #tpu.memory_space<vmem>>, vector<128x256xbf16>
    %cst_132 = arith.constant dense<0.000000e+00> : vector<8x256xf32>
    %494 = tpu.matmul %492, %493, %cst_132 {dimension_numbers = #tpu.dot_dimension_numbers<[1], [0], [0], [1], [0, 0, 1, 1], [], []>} : vector<8x128xbf16>, vector<128x256xbf16>, vector<8x256xf32> -> vector<8x256xf32>
    %495 = arith.addf %494, %6 : vector<8x256xf32>
    %c0_133 = arith.constant 0 : index
    %c5_134 = arith.constant 5 : index
    %c0_135 = arith.constant 0 : index
    %496 = vector.load %arg6[%c0_133, %c5_134, %c0_135] : memref<8x6x256xf32, #tpu.memory_space<vmem>>, vector<8x1x256xf32>
    %497 = vector.shape_cast %496 : vector<8x1x256xf32> to vector<8x256xf32>
    %498 = vector.shape_cast %495 : vector<8x256xf32> to vector<8x1x256xf32>
    tpu.vector_store %arg6[%c0_133, %c5_134, %c0_135], %498 {strides = array<i32>} : memref<8x6x256xf32, #tpu.memory_space<vmem>>, vector<8x1x256xf32>,
    return
  }
}

</mosaic_0001>

<bundles_post_ra>
// kernel: generator_forward.1
= control target key start
LH: loop header
LB: loop body
LE: loop exit
PB: predicated region body
PF: predicated region fallthrough
CT: control target
= control target key end

     0   :  { %v10810_v3 = vmov 0   ;;  %s14459_s1 = inlined_call_operand.vmem [shape: bf16[128,1024], index: 1, kind: input, shape index: {}]   ;;  %s14460_s0 = inlined_call_operand.vmem [shape: f32[6,8,512], index: 0, kind: input, shape index: {}]   ;;  %s14461_s2 = inlined_call_operand.vmem [shape: bf16[128,768], index: 2, kind: input, shape index: {}]   ;;  %s14462_s3 = inlined_call_operand.vmem [shape: f32[1,512], index: 3, kind: input, shape index: {}]   ;;  %s14463_s4 = inlined_call_operand.vmem [shape: f32[1,256], index: 4, kind: input, shape index: {}]   ;;  %s14464_s6 = inlined_call_operand.vmem [shape: f32[8,6,256], index: 6, kind: output, shape index: {}]   ;;  %s14465_s5 = inlined_call_operand.vmem [shape: bf16[256,512], index: 5, kind: input, shape index: {}]  }
   0x1   :  { %v150_v0 = vld [vmem:[%s14459_s1 + $0x1c0] sm:$0xff]  ;;  %510 = vmatprep.mubr.bf16.mxu0 %v10810_v3  ;;  %551 = vmatprep.mubr.bf16.mxu1 %v10810_v3  ;;  %v151_v10 = vld [vmem:[%s14459_s1 + $0x1c8] sm:$0xff]  ;;  %v64_v47 = vld [vmem:[%s14460_s0 + $0x18] sm:$0xff] }
   0x2   :  { %v154_v1 = vld [vmem:[%s14459_s1 + $0x1e0] sm:$0xff]  ;;  %v155_v11 = vld [vmem:[%s14459_s1 + $0x1e8] sm:$0xff]  ;;  %v8672_v54 = vmul.f32 -1.442695, %v64_v47  ;;  %v63_v61 = vld [vmem:[%s14460_s0 + $0x10] sm:$0xff] }
   0x3   :  { %v142_v2 = vld [vmem:[%s14459_s1 + $0x180] sm:$0xff]  ;;  %v8730_v4 = vcombine.high %v150_v0, %v154_v1  ;;  %v8729_v5 = vcombine.low %v150_v0, %v154_v1  ;;  %v8732_v13 = vcombine.high %v151_v10, %v155_v11  ;;  %v8731_v14 = vcombine.low %v151_v10, %v155_v11  ;;  %v143_v15 = vld [vmem:[%s14459_s1 + $0x188] sm:$0xff]  ;;  %v156_v10 = vld [vmem:[%s14459_s1 + $0x1f0] sm:$0xff] }
   0x4   :  { %v146_v6 = vld [vmem:[%s14459_s1 + $0x1a0] sm:$0xff]  ;;  %v147_v16 = vld [vmem:[%s14459_s1 + $0x1a8] sm:$0xff] }
   0x5   :  { %v8722_v7 = vcombine.high %v142_v2, %v146_v6  ;;  %v134_v8 = vld [vmem:[%s14459_s1 + $0x140] sm:$0xff]  ;;  %478 = vmatprep.subr.bf16.mxu0 %v8730_v4  ;;  %v8721_v12 = vcombine.low %v142_v2, %v146_v6  ;;  %v8724_v18 = vcombine.high %v143_v15, %v147_v16  ;;  %v135_v19 = vld [vmem:[%s14459_s1 + $0x148] sm:$0xff]  ;;  %519 = vmatprep.subr.bf16.mxu1 %v8732_v13 }
   0x6   :  { %v138_v9 = vld [vmem:[%s14459_s1 + $0x160] sm:$0xff]  ;;  %479 = vmatpush1.bf16.msra.mxu0 %v8729_v5  ;;  %v139_v20 = vld [vmem:[%s14459_s1 + $0x168] sm:$0xff]  ;;  %520 = vmatpush1.bf16.msra.mxu1 %v8731_v14  ;;  %v8723_v23 = vcombine.low %v143_v15, %v147_v16  ;;  %v153_v15 = vld [vmem:[%s14459_s1 + $0x1d8] sm:$0xff] }
   0x7   :  { %480 = vmatprep.subr.bf16.mxu0 %v8722_v7  ;;  %v8714_v17 = vcombine.high %v134_v8, %v138_v9  ;;  %v126_v21 = vld [vmem:[%s14459_s1 + $0x100] sm:$0xff]  ;;  %v8713_v24 = vcombine.low %v134_v8, %v138_v9  ;;  %521 = vmatprep.subr.bf16.mxu1 %v8724_v18  ;;  %v8716_v25 = vcombine.high %v135_v19, %v139_v20  ;;  %v127_v28 = vld [vmem:[%s14459_s1 + $0x108] sm:$0xff]  ;;  %v152_v9 = vld [vmem:[%s14459_s1 + $0x1d0] sm:$0xff] }
   0x8   :  { %v130_v22 = vld [vmem:[%s14459_s1 + $0x120] sm:$0xff]  ;;  %v131_v29 = vld [vmem:[%s14459_s1 + $0x128] sm:$0xff]  ;;  %v8715_v35 = vcombine.low %v135_v19, %v139_v20  ;;  %v8734_v14 = vcombine.high %v152_v9, %v156_v10  ;;  %v157_v16 = vld [vmem:[%s14459_s1 + $0x1f8] sm:$0xff] }
   0x9   :  { %v61_v26 = vld [vmem:[%s14460_s0] sm:$0xff]  ;;  %v8706_v27 = vcombine.high %v126_v21, %v130_v22  ;;  %v62_v30 = vld [vmem:[%s14460_s0 + $0x8] sm:$0xff]  ;;  %v8705_v36 = vcombine.low %v126_v21, %v130_v22  ;;  %v8708_v37 = vcombine.high %v127_v28, %v131_v29  ;;  %v8707_v43 = vcombine.low %v127_v28, %v131_v29  ;;  %v144_v28 = vld [vmem:[%s14459_s1 + $0x190] sm:$0xff] }
   0xa   :  { %481 = vmatpush1.bf16.msra.mxu0 %v8721_v12  ;;  %v8670_v31 = vmul.f32 -1.442695, %v61_v26  ;;  %v118_v32 = vld [vmem:[%s14459_s1 + $0xc0] sm:$0xff]  ;;  %v8671_v34 = vmul.f32 -1.442695, %v62_v30  ;;  %522 = vmatpush1.bf16.msra.mxu1 %v8723_v23  ;;  %v119_v39 = vld [vmem:[%s14459_s1 + $0xc8] sm:$0xff]  ;;  %v8736_v18 = vcombine.high %v153_v15, %v157_v16 }
   0xb   :  { %482 = vmatprep.subr.bf16.mxu0 %v8714_v17  ;;  %v122_v33 = vld [vmem:[%s14459_s1 + $0xe0] sm:$0xff]  ;;  %523 = vmatprep.subr.bf16.mxu1 %v8716_v25  ;;  %v123_v40 = vld [vmem:[%s14459_s1 + $0xe8] sm:$0xff]  ;;  %v148_v30 = vld [vmem:[%s14459_s1 + $0x1b0] sm:$0xff] }
   0xc   :  { %10618 = vpow2.f32 %v8670_v31  ;;  %v8698_v38 = vcombine.high %v118_v32, %v122_v33  ;;  %v110_v41 = vld [vmem:[%s14459_s1 + $0x80] sm:$0xff]  ;;  %v8697_v44 = vcombine.low %v118_v32, %v122_v33  ;;  %v8700_v45 = vcombine.high %v119_v39, %v123_v40  ;;  %v111_v48 = vld [vmem:[%s14459_s1 + $0x88] sm:$0xff]  ;;  %v145_v31 = vld [vmem:[%s14459_s1 + $0x198] sm:$0xff] }
   0xd   :  { %10620 = vpow2.f32 %v8671_v34  ;;  %v114_v42 = vld [vmem:[%s14459_s1 + $0xa0] sm:$0xff]  ;;  %v115_v49 = vld [vmem:[%s14459_s1 + $0xa8] sm:$0xff]  ;;  %v8699_v52 = vcombine.low %v119_v39, %v123_v40  ;;  %v149_v32 = vld [vmem:[%s14459_s1 + $0x1b8] sm:$0xff]  ;;  %v8733_v34 = vcombine.low %v152_v9, %v156_v10 }
   0xe   :  { %483 = vmatpush1.bf16.msra.mxu0 %v8713_v24  ;;  %524 = vmatpush1.bf16.msra.mxu1 %v8715_v35  ;;  %v8690_v46 = vcombine.high %v110_v41, %v114_v42  ;;  %v102_v50 = vld [vmem:[%s14459_s1 + $0x40] sm:$0xff]  ;;  %v8689_v53 = vcombine.low %v110_v41, %v114_v42  ;;  %v8692_v55 = vcombine.high %v111_v48, %v115_v49  ;;  %v103_v57 = vld [vmem:[%s14459_s1 + $0x48] sm:$0xff]  ;;  %10622 = vpow2.f32 %v8672_v54  ;;  %v136_v39 = vld [vmem:[%s14459_s1 + $0x150] sm:$0xff] }
   0xf   :  { %484 = vmatprep.subr.bf16.mxu0 %v8706_v27  ;;  %525 = vmatprep.subr.bf16.mxu1 %v8708_v37  ;;  %v106_v51 = vld [vmem:[%s14459_s1 + $0x60] sm:$0xff]  ;;  %v107_v58 = vld [vmem:[%s14459_s1 + $0x68] sm:$0xff]  ;;  %v8691_v62 = vcombine.low %v111_v48, %v115_v49  ;;  %10624 = vtanh.f32 %v63_v61  ;;  %v8735_v35 = vcombine.low %v153_v15, %v157_v16  ;;  %v8726_v37 = vcombine.high %v144_v28, %v148_v30  ;;  %v140_v40 = vld [vmem:[%s14459_s1 + $0x170] sm:$0xff] }
  0x10   :  { %v8682_v56 = vcombine.high %v102_v50, %v106_v51  ;;  %v94_v59 = vld [vmem:[%s14459_s1] sm:$0xff]  ;;  %v8681_v0 = vcombine.low %v102_v50, %v106_v51  ;;  %v8684_v1 = vcombine.high %v103_v57, %v107_v58  ;;  %v95_v6 = vld [vmem:[%s14459_s1 + $0x8] sm:$0xff]  ;;  %v8683_v11 = vcombine.low %v103_v57, %v107_v58  ;;  %v137_v48 = vld [vmem:[%s14459_s1 + $0x158] sm:$0xff] }
  0x11   :  { %v98_v60 = vld [vmem:[%s14459_s1 + $0x20] sm:$0xff]  ;;  %v99_v7 = vld [vmem:[%s14459_s1 + $0x28] sm:$0xff]  ;;  %v8725_v41 = vcombine.low %v144_v28, %v148_v30  ;;  %v8727_v42 = vcombine.low %v145_v31, %v149_v32  ;;  %v141_v49 = vld [vmem:[%s14459_s1 + $0x178] sm:$0xff] }
  0x12   :  { %485 = vmatpush1.bf16.msra.mxu0 %v8705_v36  ;;  %526 = vmatpush1.bf16.msra.mxu1 %v8707_v43  ;;  %v8674_v4 = vcombine.high %v94_v59, %v98_v60  ;;  %v8673_v12 = vcombine.low %v94_v59, %v98_v60  ;;  %v8676_v13 = vcombine.high %v95_v6, %v99_v7  ;;  %v124_v54 = vld [vmem:[%s14459_s1 + $0xf0] sm:$0xff]  ;;  %v133_v57 = vld [vmem:[%s14459_s1 + $0x138] sm:$0xff] }
  0x13   :  { %486 = vmatprep.subr.bf16.mxu0 %v8698_v38  ;;  %527 = vmatprep.subr.bf16.mxu1 %v8700_v45  ;;  %v8675_v17 = vcombine.low %v95_v6, %v99_v7  ;;  %v8728_v38 = vcombine.high %v145_v31, %v149_v32  ;;  %v8718_v43 = vcombine.high %v136_v39, %v140_v40  ;;  %v128_v45 = vld [vmem:[%s14459_s1 + $0x110] sm:$0xff]  ;;  %v113_v9 = vld [vmem:[%s14459_s1 + $0x98] sm:$0xff] }
  0x14   :  { %v8720_v51 = vcombine.high %v137_v48, %v141_v49  ;;  %v112_v61 = vld [vmem:[%s14459_s1 + $0x90] sm:$0xff]  ;;  %v117_v10 = vld [vmem:[%s14459_s1 + $0xb8] sm:$0xff] }
  0x15   :  { %v104_v6 = vld [vmem:[%s14459_s1 + $0x50] sm:$0xff]  ;;  %v9762_v31 = vld [vmem:[%s14461_s2 + $0x124] ss:$24 sps:$4 sm:$0xff]   ;;  %v9760_v32 = vld [vmem:[%s14461_s2 + $0x120] ss:$24 sps:$4 sm:$0xff]  }
  0x16   :  { %487 = vmatpush1.bf16.msra.mxu0 %v8697_v44  ;;  %528 = vmatpush1.bf16.msra.mxu1 %v8699_v52  ;;  %v8717_v44 = vcombine.low %v136_v39, %v140_v40  ;;  %v8719_v52 = vcombine.low %v137_v48, %v141_v49  ;;  %v108_v7 = vld [vmem:[%s14459_s1 + $0x70] sm:$0xff]  ;;  %v9774_v39 = vld [vmem:[%s14461_s2 + $0xc4] ss:$24 sps:$4 sm:$0xff]   ;;  %v9772_v40 = vld [vmem:[%s14461_s2 + $0xc0] ss:$24 sps:$4 sm:$0xff]  }
  0x17   :  { %488 = vmatprep.subr.bf16.mxu0 %v8690_v46  ;;  %529 = vmatprep.subr.bf16.mxu1 %v8692_v55  ;;  %v132_v46 = vld [vmem:[%s14459_s1 + $0x130] sm:$0xff]  ;;  %v9784_v48 = vld [vmem:[%s14461_s2 + $0x60] ss:$24 sps:$4 sm:$0xff]   ;;  %v9789_v49 = vld [vmem:[%s14461_s2 + $0x6c] ss:$24 sps:$4 sm:$0xff]  }
  0x18   :  { %v8710_v47 = vcombine.high %v128_v45, %v132_v46  ;;  %v8709_v50 = vcombine.low %v128_v45, %v132_v46  ;;  %v100_v15 = vld [vmem:[%s14459_s1 + $0x30] sm:$0xff] }
  0x19   :  { %v10619_v63 = vpop.eup %10618  ;;  %v9754_v28 = vld [vmem:[%s14461_s2 + $0x150] ss:$24 sps:$4 sm:$0xff]   ;;  %v9759_v30 = vld [vmem:[%s14461_s2 + $0x15c] ss:$24 sps:$4 sm:$0xff]  }
  0x1a   :  { %489 = vmatpush1.bf16.msra.mxu0 %v8689_v53  ;;  %v10621_v2 = vpop.eup %10620  ;;  %v72_v5 = vadd.f32 1.0, %v10619_v63  ;;  %530 = vmatpush1.bf16.msra.mxu1 %v8691_v62  ;;  %v120_v53 = vld [vmem:[%s14459_s1 + $0xd0] sm:$0xff] }
  0x1b   :  { %490 = vmatprep.subr.bf16.mxu0 %v8682_v56  ;;  %v78_v8 = vadd.f32 1.0, %v10621_v2  ;;  %531 = vmatprep.subr.bf16.mxu1 %v8684_v1  ;;  %v10623_v19 = vpop.eup %10622  ;;  %v8702_v55 = vcombine.high %v120_v53, %v124_v54  ;;  %v129_v56 = vld [vmem:[%s14459_s1 + $0x118] sm:$0xff]  ;;  %v8701_v58 = vcombine.low %v120_v53, %v124_v54  ;;  %v116_v62 = vld [vmem:[%s14459_s1 + $0xb0] sm:$0xff] }
  0x1c   :  { %10626 = vrcp.f32 %v72_v5  ;;  %v10625_v20 = vpop.eup %10624  ;;  %v85_v22 = vadd.f32 1.0, %v10623_v19  ;;  %v8712_v59 = vcombine.high %v129_v56, %v133_v57  ;;  %v8711_v60 = vcombine.low %v129_v56, %v133_v57  ;;  %v125_v1 = vld [vmem:[%s14459_s1 + $0xf8] sm:$0xff]  ;;  %v9801_v56 = vld [vmem:[%s14461_s2 + $0xc] ss:$24 sps:$4 sm:$0xff]  }
  0x1d   :  { %10628 = vrcp.f32 %v78_v8  ;;  %v8694_v63 = vcombine.high %v112_v61, %v116_v62  ;;  %v8693_v2 = vcombine.low %v112_v61, %v116_v62  ;;  %v8686_v8 = vcombine.high %v104_v6, %v108_v7  ;;  %v9781_v45 = vld [vmem:[%s14461_s2 + $0x98] ss:$24 sps:$4 sm:$0xff]   ;;  %v9783_v46 = vld [vmem:[%s14461_s2 + $0x9c] ss:$24 sps:$4 sm:$0xff]   ;;  %v27_v62 = vld [vmem:[%s14462_s3] sm:$0xf] }
  0x1e   :  { %491 = vmatpush1.bf16.msra.mxu0 %v8681_v0  ;;  %532 = vmatpush1.bf16.msra.mxu1 %v8683_v11  ;;  %10630 = vrcp.f32 %v85_v22  ;;  %v121_v0 = vld [vmem:[%s14459_s1 + $0xd8] sm:$0xff]  ;;  %v8685_v11 = vcombine.low %v104_v6, %v108_v7 }
  0x1f   :  { %492 = vmatprep.subr.bf16.mxu0 %v8674_v4  ;;  %533 = vmatprep.subr.bf16.mxu1 %v8676_v13  ;;  %v8704_v4 = vcombine.high %v121_v0, %v125_v1  ;;  %v8703_v5 = vcombine.low %v121_v0, %v125_v1  ;;  %v8695_v13 = vcombine.low %v113_v9, %v117_v10  ;;  %v97_v22 = vld [vmem:[%s14459_s1 + $0x18] sm:$0xff] }
  0x20   :  { %v9795_v53 = vld [vmem:[%s14461_s2 + $0x3c] ss:$24 sps:$4 sm:$0xff]   ;;  %v9796_v57 = vld [vmem:[%s14461_s2] ss:$24 sps:$4 sm:$0xff]  }
  0x21   :  { %v9798_v54 = vld [vmem:[%s14461_s2 + $0x4] ss:$24 sps:$4 sm:$0xff]  }
  0x22   :  { %493 = vmatpush1.bf16.msra.mxu0 %v8673_v12  ;;  %534 = vmatpush1.bf16.msra.mxu1 %v8675_v17  ;;  %v8696_v12 = vcombine.high %v113_v9, %v117_v10  ;;  %v105_v17 = vld [vmem:[%s14459_s1 + $0x58] sm:$0xff] }
  0x23   :  { %560 = vmatprep.subr.bf16.mxu0 %v8734_v14  ;;  %601 = vmatprep.subr.bf16.mxu1 %v8736_v18  ;;  %v96_v14 = vld [vmem:[%s14459_s1 + $0x10] sm:$0xff]  ;;  %v109_v18 = vld [vmem:[%s14459_s1 + $0x78] sm:$0xff] }
  0x24   :  { %v8678_v16 = vcombine.high %v96_v14, %v100_v15  ;;  %v8677_v19 = vcombine.low %v96_v14, %v100_v15 }
  0x29   :  { %v10627_v21 = vpop.eup %10626 }
  0x2a   :  { %v10629_v23 = vpop.eup %10628  ;;  %v89_v24 = vmul.f32 %v10627_v21, %v10625_v20  ;;  %v8688_v20 = vcombine.high %v105_v17, %v109_v18  ;;  %v8687_v21 = vcombine.low %v105_v17, %v109_v18 }
  0x2b   :  { %v88_v25 = vmul.f32 0.0, %v10629_v23  ;;  %v10631_v27 = vpop.eup %10630  ;;  %v101_v23 = vld [vmem:[%s14459_s1 + $0x38] sm:$0xff] }
  0x2d   :  { %v10970_v26 = vadd.f32 %v89_v24, %v88_v25  ;;  %v8680_v24 = vcombine.high %v97_v22, %v101_v23  ;;  %v8679_v25 = vcombine.low %v97_v22, %v101_v23 }
  0x2f   :  { %10632 = vtanh.f32 %v10970_v26 }
  0x3c   :  { %v10633_v29 = vpop.eup %10632 }
  0x3d   :  { %v92_v33 = vmul.f32 %v10633_v29, %v10631_v27  ;;  %v9756_v27 = vld [vmem:[%s14461_s2 + $0x154] ss:$24 sps:$4 sm:$0xff]   ;;  %v9757_v29 = vld [vmem:[%s14461_s2 + $0x158] ss:$24 sps:$4 sm:$0xff]  }
  0x3f   :  { %v10985_v36 = vpack.c.bf16 %v92_v33, %v92_v33  ;;  %v9765_v33 = vld [vmem:[%s14461_s2 + $0x12c] ss:$24 sps:$4 sm:$0xff]  }
  0x41   :  { %511 = vmatmul.mubr.bf16.vlgmr.msra.gmra.mxu0 %v10985_v36  ;;  %552 = vmatmul.mubr.bf16.vlgmr.msra.gmra.mxu1 %v10985_v36 }
  0x42   :  { %561 = vmatpush1.bf16.msra.mxu0 %v8733_v34  ;;  %602 = vmatpush1.bf16.msra.mxu1 %v8735_v35  ;;  %v9763_v34 = vld [vmem:[%s14461_s2 + $0x128] ss:$24 sps:$4 sm:$0xff]   ;;  %v9768_v35 = vld [vmem:[%s14461_s2 + $0xf4] ss:$24 sps:$4 sm:$0xff]  }
  0x43   :  { %562 = vmatprep.subr.bf16.mxu0 %v8726_v37  ;;  %603 = vmatprep.subr.bf16.mxu1 %v8728_v38  ;;  %v9771_v37 = vld [vmem:[%s14461_s2 + $0xfc] ss:$24 sps:$4 sm:$0xff]   ;;  %v9769_v38 = vld [vmem:[%s14461_s2 + $0xf8] ss:$24 sps:$4 sm:$0xff]  }
  0x44   :  { %592 = vmatprep.mubr.bf16.mxu0 %v10810_v3  ;;  %633 = vmatprep.mubr.bf16.mxu1 %v10810_v3 }
  0x46   :  { %563 = vmatpush1.bf16.msra.mxu0 %v8725_v41  ;;  %604 = vmatpush1.bf16.msra.mxu1 %v8727_v42  ;;  %v9777_v41 = vld [vmem:[%s14461_s2 + $0xcc] ss:$24 sps:$4 sm:$0xff]   ;;  %v9775_v42 = vld [vmem:[%s14461_s2 + $0xc8] ss:$24 sps:$4 sm:$0xff]  }
  0x47   :  { %564 = vmatprep.subr.bf16.mxu0 %v8718_v43  ;;  %605 = vmatprep.subr.bf16.mxu1 %v8720_v51  ;;  %v9780_v43 = vld [vmem:[%s14461_s2 + $0x94] ss:$24 sps:$4 sm:$0xff]   ;;  %v9787_v51 = vld [vmem:[%s14461_s2 + $0x68] ss:$24 sps:$4 sm:$0xff]  }
  0x4a   :  { %565 = vmatpush1.bf16.msra.mxu0 %v8717_v44  ;;  %606 = vmatpush1.bf16.msra.mxu1 %v8719_v52  ;;  %v9778_v44 = vld [vmem:[%s14461_s2 + $0x90] ss:$24 sps:$4 sm:$0xff]  }
  0x4b   :  { %566 = vmatprep.subr.bf16.mxu0 %v8710_v47  ;;  %607 = vmatprep.subr.bf16.mxu1 %v8712_v59  ;;  %v9786_v47 = vld [vmem:[%s14461_s2 + $0x64] ss:$24 sps:$4 sm:$0xff]   ;;  %v9790_v52 = vld [vmem:[%s14461_s2 + $0x30] ss:$24 sps:$4 sm:$0xff]  }
  0x4c   :  { %v9799_v59 = vld [vmem:[%s14461_s2 + $0x8] ss:$24 sps:$4 sm:$0xff]  }
  0x4e   :  { %567 = vmatpush1.bf16.msra.mxu0 %v8709_v50  ;;  %608 = vmatpush1.bf16.msra.mxu1 %v8711_v60  ;;  %v9792_v50 = vld [vmem:[%s14461_s2 + $0x34] ss:$24 sps:$4 sm:$0xff]   ;;  %v24_v60 = vlaneseq }
  0x4f   :  { %568 = vmatprep.subr.bf16.mxu0 %v8702_v55  ;;  %609 = vmatprep.subr.bf16.mxu1 %v8704_v4  ;;  %v9793_v55 = vld [vmem:[%s14461_s2 + $0x38] ss:$24 sps:$4 sm:$0xff]  }
  0x50   :  { %v11167_v61 = vshrl.u32 %v24_v60, 7  ;;  %vm11272_vm0 = vcmp.lt.s32.totalorder %v24_v60, 256 }
  0x52   :  { %569 = vmatpush1.bf16.msra.mxu0 %v8701_v58  ;;  %610 = vmatpush1.bf16.msra.mxu1 %v8703_v5  ;;  %v9804_v58 = vld [vmem:[%s14461_s2 + $0x164] ss:$24 sps:$4 sm:$0xff]   ;;  %v35_v0 = vsub.s32 1, %v11167_v61  ;;  %v39_v17 = vsub.s32 2, %v11167_v61 }
  0x53   :  { %570 = vmatprep.subr.bf16.mxu0 %v8694_v63  ;;  %611 = vmatprep.subr.bf16.mxu1 %v8696_v12  ;;  %v31_v63 = vsub.s32 0, %v11167_v61  ;;  %v43_v12 = vsub.s32 3, %v11167_v61 }
  0x55   :  { %v11176_v1 = vrot.slane %v27_v62, %v31_v63  ;;  %v11186_v18 = vrot.slane %v27_v62, %v43_v12 }
  0x56   :  { %571 = vmatpush1.bf16.msra.mxu0 %v8693_v2  ;;  %612 = vmatpush1.bf16.msra.mxu1 %v8695_v13  ;;  %v11180_v2 = vrot.slane %v27_v62, %v35_v0 }
  0x57   :  { %572 = vmatprep.subr.bf16.mxu0 %v8686_v8  ;;  %613 = vmatprep.subr.bf16.mxu1 %v8688_v20 }
  0x5a   :  { %573 = vmatpush1.bf16.msra.mxu0 %v8685_v11  ;;  %614 = vmatpush1.bf16.msra.mxu1 %v8687_v21 }
  0x5b   :  { %574 = vmatprep.subr.bf16.mxu0 %v8678_v16  ;;  %615 = vmatprep.subr.bf16.mxu1 %v8680_v24 }
  0x5e   :  { %575 = vmatpush1.bf16.msra.mxu0 %v8677_v19  ;;  %616 = vmatpush1.bf16.msra.mxu1 %v8679_v25  ;;  %v11188_v19 = vrot.slane %v27_v62, %v39_v17 }
  0x5f   :  { %963 = vmatprep.subr.bf16.mxu0 %v9756_v27  ;;  %1004 = vmatprep.subr.bf16.mxu1 %v9759_v30 }
  0x61   :  { %593 = vmatmul.mubr.bf16.vlgmr.msra.gmra.mxu0 %v10985_v36  ;;  %634 = vmatmul.mubr.bf16.vlgmr.msra.gmra.mxu1 %v10985_v36  ;;  %v9766_v36 = vld [vmem:[%s14461_s2 + $0xf0] ss:$24 sps:$4 sm:$0xff]  }
  0x62   :  { %995 = vmatprep.mubr.bf16.mxu0 %v10810_v3  ;;  %964 = vmatpush1.bf16.msra.mxu0 %v9754_v28 }
  0x63   :  { %1036 = vmatprep.mubr.bf16.mxu1 %v10810_v3  ;;  %1005 = vmatpush1.bf16.msra.mxu1 %v9757_v29 }
  0x64   :  { %965 = vmatprep.subr.bf16.mxu0 %v9762_v31  ;;  %1006 = vmatprep.subr.bf16.mxu1 %v9765_v33 }
  0x66   :  { %966 = vmatpush1.bf16.msra.mxu0 %v9760_v32 }
  0x67   :  { %1007 = vmatpush1.bf16.msra.mxu1 %v9763_v34  ;;  %967 = vmatprep.subr.bf16.mxu0 %v9768_v35 }
  0x68   :  { %1008 = vmatprep.subr.bf16.mxu1 %v9771_v37 }
  0x6a   :  { %968 = vmatpush1.bf16.msra.mxu0 %v9766_v36 }
  0x6b   :  { %1009 = vmatpush1.bf16.msra.mxu1 %v9769_v38  ;;  %969 = vmatprep.subr.bf16.mxu0 %v9774_v39  ;;  %v9802_v39 = vld [vmem:[%s14461_s2 + $0x160] ss:$24 sps:$4 sm:$0xff]  }
  0x6c   :  { %1010 = vmatprep.subr.bf16.mxu1 %v9777_v41  ;;  %v9807_v41 = vld [vmem:[%s14461_s2 + $0x134] ss:$24 sps:$4 sm:$0xff]  }
  0x6e   :  { %970 = vmatpush1.bf16.msra.mxu0 %v9772_v40 }
  0x6f   :  { %1011 = vmatpush1.bf16.msra.mxu1 %v9775_v42  ;;  %971 = vmatprep.subr.bf16.mxu0 %v9780_v43  ;;  %v9805_v42 = vld [vmem:[%s14461_s2 + $0x130] ss:$24 sps:$4 sm:$0xff]   ;;  %v9810_v43 = vld [vmem:[%s14461_s2 + $0x104] ss:$24 sps:$4 sm:$0xff]  }
  0x70   :  { %1012 = vmatprep.subr.bf16.mxu1 %v9783_v46  ;;  %v9811_v46 = vld [vmem:[%s14461_s2 + $0xd0] ss:$24 sps:$4 sm:$0xff]  }
  0x72   :  { %972 = vmatpush1.bf16.msra.mxu0 %v9778_v44  ;;  %v9808_v44 = vld [vmem:[%s14461_s2 + $0x100] ss:$24 sps:$4 sm:$0xff]  }
  0x73   :  { %973 = vmatprep.subr.bf16.mxu0 %v9786_v47  ;;  %1013 = vmatpush1.bf16.msra.mxu1 %v9781_v45  ;;  %v9813_v45 = vld [vmem:[%s14461_s2 + $0xd4] ss:$24 sps:$4 sm:$0xff]   ;;  %v9816_v47 = vld [vmem:[%s14461_s2 + $0xa4] ss:$24 sps:$4 sm:$0xff]  }
  0x74   :  { %1014 = vmatprep.subr.bf16.mxu1 %v9789_v49  ;;  %v9819_v49 = vld [vmem:[%s14461_s2 + $0x74] ss:$24 sps:$4 sm:$0xff]  }
  0x76   :  { %974 = vmatpush1.bf16.msra.mxu0 %v9784_v48  ;;  %v9814_v48 = vld [vmem:[%s14461_s2 + $0xa0] ss:$24 sps:$4 sm:$0xff]  }
  0x77   :  { %975 = vmatprep.subr.bf16.mxu0 %v9792_v50  ;;  %1015 = vmatpush1.bf16.msra.mxu1 %v9787_v51  ;;  %v9817_v50 = vld [vmem:[%s14461_s2 + $0x70] ss:$24 sps:$4 sm:$0xff]   ;;  %v9822_v51 = vld [vmem:[%s14461_s2 + $0x44] ss:$24 sps:$4 sm:$0xff]  }
  0x78   :  { %1016 = vmatprep.subr.bf16.mxu1 %v9795_v53  ;;  %v9825_v53 = vld [vmem:[%s14461_s2 + $0x14] ss:$24 sps:$4 sm:$0xff]  }
  0x7a   :  { %976 = vmatpush1.bf16.msra.mxu0 %v9790_v52  ;;  %v9820_v52 = vld [vmem:[%s14461_s2 + $0x40] ss:$24 sps:$4 sm:$0xff]  }
  0x7b   :  { %977 = vmatprep.subr.bf16.mxu0 %v9798_v54  ;;  %1017 = vmatpush1.bf16.msra.mxu1 %v9793_v55  ;;  %v9823_v54 = vld [vmem:[%s14461_s2 + $0x10] ss:$24 sps:$4 sm:$0xff]  }
  0x7c   :  { %1018 = vmatprep.subr.bf16.mxu1 %v9801_v56 }
  0x7e   :  { %978 = vmatpush1.bf16.msra.mxu0 %v9796_v57 }
  0x7f   :  { %1045 = vmatprep.subr.bf16.mxu0 %v9804_v58  ;;  %1019 = vmatpush1.bf16.msra.mxu1 %v9799_v59 }
 0x101   :  { %v512_v4 = vpop.f32.mrf.mxu0  ;;  %v553_v5 = vpop.f32.mrf.mxu1 }
 0x102   :  { %v642_v6 = vadd.f32 %v512_v4, %v11176_v1  ;;  %v644_v21 = vadd.f32 %v553_v5, %v11188_v19 }
 0x103   :  { %v514_v7 = vpop.f32.mrf.mxu0  ;;  %v555_v8 = vpop.f32.mrf.mxu1 }
 0x104   :  { %v8737_v9 = vmul.f32 -1.442695, %v642_v6  ;;  %v643_v10 = vadd.f32 %v514_v7, %v11180_v2  ;;  %v645_v20 = vadd.f32 %v555_v8, %v11186_v18  ;;  %v10811_v6 = vmov 1966171168   ;;  %v49_v8 = vld [vmem:[%s14463_s4] sm:$0x3] }
 0x105   :  { %v516_v11 = vpop.f32.mrf.mxu0  ;;  %v557_v13 = vpop.f32.mrf.mxu1  ;;  %v1093_v7 = vunpack.c.l.s4 %v10811_v6  ;;  %v9840_v6 = vld [vmem:[%s14465_s5 + $0xa4] ss:$16 sps:$4 sm:$0xff]  }
 0x106   :  { %10634 = vpow2.f32 %v8737_v9  ;;  %v8738_v14 = vmul.f32 -1.442695, %v643_v10  ;;  %v8739_v22 = vmul.f32 -1.442695, %v645_v20  ;;  %v11254_v10 = vrot.slane %v49_v8, %v31_v63 }
 0x107   :  { %v517_v15 = vpop.f32.mrf.mxu0  ;;  %v558_v16 = vpop.f32.mrf.mxu1  ;;  %v1094_v9 = vunpack.c.0.s8 %v1093_v7  ;;  %v11258_v11 = vrot.slane %v49_v8, %v35_v0  ;;  %v9838_v7 = vld [vmem:[%s14465_s5 + $0xa0] ss:$16 sps:$4 sm:$0xff]   ;;  %v9843_v8 = vld [vmem:[%s14465_s5 + $0xac] ss:$16 sps:$4 sm:$0xff]  }
 0x108   :  { %10636 = vpow2.f32 %v8738_v14 }
 0x109   :  { %10638 = vtanh.f32 %v644_v21  ;;  %v11265_v16 = vsub.s32 %v1094_v9, %v11167_v61  ;;  %v9841_v9 = vld [vmem:[%s14465_s5 + $0xa8] ss:$16 sps:$4 sm:$0xff]  }
 0x10a   :  { %10640 = vpow2.f32 %v8739_v22 }
 0x113   :  { %v10635_v23 = vpop.eup %10634 }
 0x114   :  { %v653_v24 = vadd.f32 1.0, %v10635_v23 }
 0x115   :  { %v10637_v25 = vpop.eup %10636 }
 0x116   :  { %10642 = vrcp.f32 %v653_v24  ;;  %v659_v27 = vadd.f32 1.0, %v10637_v25  ;;  %v10639_v28 = vpop.eup %10638 }
 0x117   :  { %v10641_v29 = vpop.eup %10640 }
 0x118   :  { %10644 = vrcp.f32 %v659_v27  ;;  %v666_v32 = vadd.f32 1.0, %v10641_v29 }
 0x11a   :  { %10646 = vrcp.f32 %v666_v32 }
 0x121   :  { %v11241_v55 = vpop.f32.mrf.mxu0  ;;  %v11245_v58 = vpop.f32.mrf.mxu1 }
 0x123   :  { %v10643_v30 = vpop.eup %10642  ;;  %v11243_v56 = vpop.f32.mrf.mxu0 }
 0x124   :  { %v670_v34 = vmul.f32 %v10643_v30, %v10639_v28  ;;  %v11247_v62 = vpop.f32.mrf.mxu1 }
 0x125   :  { %v10645_v31 = vpop.eup %10644  ;;  %v598_v57 = vpop.f32.mrf.mxu0 }
 0x126   :  { %v669_v33 = vmul.f32 0.0, %v10645_v31  ;;  %v639_v4 = vpop.f32.mrf.mxu1  ;;  %v9832_v57 = vld [vmem:[%s14465_s5 + $0xc0] ss:$16 sps:$4 sm:$0xff]  }
 0x127   :  { %v10647_v36 = vpop.eup %10646  ;;  %v599_v59 = vpop.f32.mrf.mxu0  ;;  %v9835_v4 = vld [vmem:[%s14465_s5 + $0xc8] ss:$16 sps:$4 sm:$0xff]  }
 0x128   :  { %v11192_v35 = vadd.f32 %v670_v34, %v669_v33  ;;  %v640_v5 = vpop.f32.mrf.mxu1  ;;  %v9834_v59 = vld [vmem:[%s14465_s5 + $0xc4] ss:$16 sps:$4 sm:$0xff]  }
 0x129   :  { %v9837_v5 = vld [vmem:[%s14465_s5 + $0xcc] ss:$16 sps:$4 sm:$0xff]  }
 0x12a   :  { %10648 = vtanh.f32 %v11192_v35 }
 0x137   :  { %v10649_v37 = vpop.eup %10648 }
 0x138   :  { %v673_v38 = vmul.f32 %v10649_v37, %v10647_v36 }
 0x13a   :  { %v674_v40 = vpack.c.bf16 %v673_v38, %v673_v38 }
 0x13c   :  { %996 = vmatmul.mubr.bf16.vlgmr.msra.gmra.mxu0 %v674_v40  ;;  %1037 = vmatmul.mubr.bf16.vlgmr.msra.gmra.mxu1 %v674_v40 }
 0x13d   :  { %1046 = vmatpush1.bf16.msra.mxu0 %v9802_v39  ;;  %1077 = vmatprep.mubr.bf16.mxu0 %v10810_v3 }
 0x13e   :  { %1047 = vmatprep.subr.bf16.mxu0 %v9807_v41 }
 0x141   :  { %1048 = vmatpush1.bf16.msra.mxu0 %v9805_v42 }
 0x142   :  { %1049 = vmatprep.subr.bf16.mxu0 %v9810_v43 }
 0x145   :  { %1050 = vmatpush1.bf16.msra.mxu0 %v9808_v44  ;;  %v11325_v44 = vand.u32 127, %v24_v60  ;;  %v9826_v60 = vld [vmem:[%s14465_s5 + $0xe0] ss:$16 sps:$4 sm:$0xff]  }
 0x146   :  { %1051 = vmatprep.subr.bf16.mxu0 %v9813_v45 }
 0x147   :  { %v11328_v45 = vadd.s32 128, %v11325_v44 }
 0x149   :  { %1052 = vmatpush1.bf16.msra.mxu0 %v9811_v46 }
 0x14a   :  { %1053 = vmatprep.subr.bf16.mxu0 %v9816_v47 }
 0x14d   :  { %1054 = vmatpush1.bf16.msra.mxu0 %v9814_v48 }
 0x14e   :  { %1055 = vmatprep.subr.bf16.mxu0 %v9819_v49 }
 0x151   :  { %1056 = vmatpush1.bf16.msra.mxu0 %v9817_v50 }
 0x152   :  { %1057 = vmatprep.subr.bf16.mxu0 %v9822_v51 }
 0x155   :  { %1058 = vmatpush1.bf16.msra.mxu0 %v9820_v52  ;;  %v9828_v52 = vld [vmem:[%s14465_s5 + $0xe4] ss:$16 sps:$4 sm:$0xff]  }
 0x156   :  { %1059 = vmatprep.subr.bf16.mxu0 %v9825_v53  ;;  %v9829_v53 = vld [vmem:[%s14465_s5 + $0xe8] ss:$16 sps:$4 sm:$0xff]   ;;  %1595 = vmatprep.subr.bf16.mxu1 %v9828_v52  ;;  %v9891_v52 = vld [vmem:[%s14465_s5 + $0x1ac] ss:$16 sps:$4 sm:$0xff]  }
 0x157   :  { %1596 = vmatpush1.bf16.msra.mxu1 %v9826_v60  ;;  %v9886_v60 = vld [vmem:[%s14465_s5 + $0x1a0] ss:$16 sps:$4 sm:$0xff]  }
 0x158   :  { %1597 = vmatprep.subr.bf16.mxu1 %v9834_v59  ;;  %v9892_v59 = vld [vmem:[%s14465_s5 + $0x180] ss:$16 sps:$4 sm:$0xff]  }
 0x159   :  { %1060 = vmatpush1.bf16.msra.mxu0 %v9823_v54  ;;  %v9831_v54 = vld [vmem:[%s14465_s5 + $0xec] ss:$16 sps:$4 sm:$0xff]  }
 0x15a   :  { %1636 = vmatprep.subr.bf16.mxu0 %v9831_v54  ;;  %v9894_v54 = vld [vmem:[%s14465_s5 + $0x184] ss:$16 sps:$4 sm:$0xff]  }
 0x15b   :  { %1598 = vmatpush1.bf16.msra.mxu1 %v9832_v57  ;;  %v9897_v57 = vld [vmem:[%s14465_s5 + $0x18c] ss:$16 sps:$4 sm:$0xff]  }
 0x15c   :  { %1078 = vmatmul.mubr.bf16.vlgmr.msra.gmra.mxu0 %v674_v40  ;;  %1599 = vmatprep.subr.bf16.mxu1 %v9840_v6  ;;  %v9903_v6 = vld [vmem:[%s14465_s5 + $0x16c] ss:$16 sps:$4 sm:$0xff]  }
 0x15d   :  { %1637 = vmatpush1.bf16.msra.mxu0 %v9829_v53  ;;  %v9889_v53 = vld [vmem:[%s14465_s5 + $0x1a8] ss:$16 sps:$4 sm:$0xff]  }
 0x15e   :  { %1638 = vmatprep.subr.bf16.mxu0 %v9837_v5  ;;  %v9900_v5 = vld [vmem:[%s14465_s5 + $0x164] ss:$16 sps:$4 sm:$0xff]  }
 0x15f   :  { %1600 = vmatpush1.bf16.msra.mxu1 %v9838_v7  ;;  %v9898_v7 = vld [vmem:[%s14465_s5 + $0x160] ss:$16 sps:$4 sm:$0xff]  }
 0x161   :  { %1639 = vmatpush1.bf16.msra.mxu0 %v9835_v4  ;;  %v9895_v4 = vld [vmem:[%s14465_s5 + $0x188] ss:$16 sps:$4 sm:$0xff]  }
 0x162   :  { %1640 = vmatprep.subr.bf16.mxu0 %v9843_v8  ;;  %v9901_v8 = vld [vmem:[%s14465_s5 + $0x168] ss:$16 sps:$4 sm:$0xff]  }
 0x165   :  { %1641 = vmatpush1.bf16.msra.mxu0 %v9841_v9  ;;  %v9906_v9 = vld [vmem:[%s14465_s5 + $0x144] ss:$16 sps:$4 sm:$0xff]  }
 0x1fc   :  { %v997_v12 = vpop.f32.mrf.mxu0  ;;  %v11260_v13 = vpop.f32.mrf.mxu1 }
 0x1fd   :  { %v1086_v17 = vadd.f32 %v997_v12, %v11254_v10  ;;  %v9846_v12 = vld [vmem:[%s14465_s5 + $0x84] ss:$16 sps:$4 sm:$0xff]  }
 0x1fe   :  { %v999_v14 = vpop.f32.mrf.mxu0  ;;  %v11262_v15 = vpop.f32.mrf.mxu1  ;;  %1601 = vmatprep.subr.bf16.mxu1 %v9846_v12  ;;  %v9909_v12 = vld [vmem:[%s14465_s5 + $0x14c] ss:$16 sps:$4 sm:$0xff]  }
 0x1ff   :  { %v1087_v20 = vadd.f32 %v999_v14, %v11258_v11  ;;  %v9849_v14 = vld [vmem:[%s14465_s5 + $0x8c] ss:$16 sps:$4 sm:$0xff]  }
 0x200   :  { %v1001_v21 = vpop.f32.mrf.mxu0  ;;  %v1042_v63 = vpop.f32.mrf.mxu1  ;;  %1642 = vmatprep.subr.bf16.mxu0 %v9849_v14  ;;  %v9904_v14 = vld [vmem:[%s14465_s5 + $0x140] ss:$16 sps:$4 sm:$0xff]  }
 0x201   :  { %v1090_v22 = vcombine.low %v1086_v17, %v1087_v20  ;;  %v1091_v23 = vcombine.high %v1086_v17, %v1087_v20  ;;  %v1175_v24 = vmax.f32 %v1086_v17, %v1087_v20  ;;  %v9852_v21 = vld [vmem:[%s14465_s5 + $0x64] ss:$16 sps:$4 sm:$0xff]   ;;  %v9855_v63 = vld [vmem:[%s14465_s5 + $0x6c] ss:$16 sps:$4 sm:$0xff]  }
 0x202   :  { %v1002_v0 = vpop.f32.mrf.mxu0  ;;  %v1043_v25 = vpop.f32.mrf.mxu1 }
 0x203   :  { %v1098_v27 = vrot.slane %v1090_v22, %v11265_v16  ;;  %v1105_v28 = vrot.slane %v1091_v23, %v11265_v16  ;;  %1176 = vmax.xlane.f32.xlu0 %v1175_v24  ;;  %v9850_v22 = vld [vmem:[%s14465_s5 + $0x60] ss:$16 sps:$4 sm:$0xff]   ;;  %v9853_v23 = vld [vmem:[%s14465_s5 + $0x68] ss:$16 sps:$4 sm:$0xff]   ;;  %v9858_v24 = vld [vmem:[%s14465_s5 + $0x44] ss:$16 sps:$4 sm:$0xff]  }
 0x204   :  { %v9861_v0 = vld [vmem:[%s14465_s5 + $0x4c] ss:$16 sps:$4 sm:$0xff]   ;;  %v9856_v25 = vld [vmem:[%s14465_s5 + $0x40] ss:$16 sps:$4 sm:$0xff]  }
 0x205   :  { %v1106_v29 = vcombine.high %v1098_v27, %v1098_v27  ;;  %v1107_v30 = vcombine.high %v1105_v28, %v1105_v28  ;;  %v1114_v31 = vrot.slane %v1098_v27, %v11265_v16  ;;  %v1121_v32 = vrot.slane %v1105_v28, %v11265_v16  ;;  %v9859_v27 = vld [vmem:[%s14465_s5 + $0x48] ss:$16 sps:$4 sm:$0xff]   ;;  %v9864_v28 = vld [vmem:[%s14465_s5 + $0x24] ss:$16 sps:$4 sm:$0xff]  }
 0x207   :  { %v1128_v33 = vrot.slane %v1106_v29, %v11265_v16  ;;  %v1135_v34 = vrot.slane %v1107_v30, %v11265_v16  ;;  %v1136_v36 = vcombine.high %v1114_v31, %v1114_v31  ;;  %v1137_v37 = vcombine.high %v1121_v32, %v1121_v32  ;;  %1152 = vst.msk [vmem:[%s14464_s6] ss:$8 sm:$0x3] %vm11272_vm0, %v1114_v31  ;;  %v9867_v29 = vld [vmem:[%s14465_s5 + $0x2c] ss:$16 sps:$4 sm:$0xff]  }
 0x208   :  { %8791 = vst.msk [vmem:[%s14464_s6 + $0x40] ss:$8 sm:$0x3] %vm11272_vm0, %v1121_v32  ;;  %v9862_v30 = vld [vmem:[%s14465_s5 + $0x20] ss:$16 sps:$4 sm:$0xff]  }
 0x209   :  { %v1138_v38 = vcombine.high %v1128_v33, %v1128_v33  ;;  %v1139_v39 = vcombine.high %v1135_v34, %v1135_v34  ;;  %8788 = vst.msk [vmem:[%s14464_s6 + $0x10] ss:$8 sm:$0x3] %vm11272_vm0, %v1128_v33  ;;  %8789 = vst.msk [vmem:[%s14464_s6 + $0x20] ss:$8 sm:$0x3] %vm11272_vm0, %v1136_v36 }
 0x20a   :  { %8792 = vst.msk [vmem:[%s14464_s6 + $0x50] ss:$8 sm:$0x3] %vm11272_vm0, %v1135_v34  ;;  %8793 = vst.msk [vmem:[%s14464_s6 + $0x60] ss:$8 sm:$0x3] %vm11272_vm0, %v1137_v37 }
 0x20b   :  { %8790 = vst.msk [vmem:[%s14464_s6 + $0x30] ss:$8 sm:$0x3] %vm11272_vm0, %v1138_v38  ;;  %8794 = vst.msk [vmem:[%s14464_s6 + $0x70] ss:$8 sm:$0x3] %vm11272_vm0, %v1139_v39 }
 0x20c   :  { %v9865_v31 = vld [vmem:[%s14465_s5 + $0x28] ss:$16 sps:$4 sm:$0xff]   ;;  %v9870_v32 = vld [vmem:[%s14465_s5 + $0x4] ss:$16 sps:$4 sm:$0xff]   ;;  %v9873_v33 = vld [vmem:[%s14465_s5 + $0xc] ss:$16 sps:$4 sm:$0xff]  }
 0x20d   :  { %v9868_v34 = vld [vmem:[%s14465_s5] ss:$16 sps:$4 sm:$0xff]   ;;  %v9871_v36 = vld [vmem:[%s14465_s5 + $0x8] ss:$16 sps:$4 sm:$0xff]   ;;  %v9876_v37 = vld [vmem:[%s14465_s5 + $0x1e4] ss:$16 sps:$4 sm:$0xff]  }
 0x20e   :  { %v9879_v38 = vld [vmem:[%s14465_s5 + $0x1ec] ss:$16 sps:$4 sm:$0xff]   ;;  %v9874_v39 = vld [vmem:[%s14465_s5 + $0x1e0] ss:$16 sps:$4 sm:$0xff]  }
 0x21c   :  { %v11320_v40 = vpop.f32.mrf.mxu0 }
 0x21e   :  { %v11322_v41 = vpop.f32.mrf.mxu0 }
 0x220   :  { %v1083_v42 = vpop.f32.mrf.mxu0 }
 0x221   :  { %v9877_v42 = vld [vmem:[%s14465_s5 + $0x1e8] ss:$16 sps:$4 sm:$0xff]  }
 0x222   :  { %v1084_v43 = vpop.f32.mrf.mxu0 }
 0x223   :  { %v9882_v43 = vld [vmem:[%s14465_s5 + $0x1c4] ss:$16 sps:$4 sm:$0xff]  }
 0x28c   :  { %v1177_v46 = vpop.xlane.xlu0 %1176 }
 0x28d   :  { %vm1178_vm1 = vcmp.eq.f32.partialorder %v1086_v17, %v1177_v46  ;;  %vm1179_vm2 = vcmp.eq.f32.partialorder %v1087_v20, %v1177_v46  ;;  %v9844_v17 = vld [vmem:[%s14465_s5 + $0x80] ss:$16 sps:$4 sm:$0xff]   ;;  %v9847_v20 = vld [vmem:[%s14465_s5 + $0x88] ss:$16 sps:$4 sm:$0xff]   ;;  %v9885_v46 = vld [vmem:[%s14465_s5 + $0x1cc] ss:$16 sps:$4 sm:$0xff]  }
 0x28e   :  { %v1180_v47 = vsel %vm1178_vm1, %v11325_v44, 256  ;;  %v1181_v48 = vsel %vm1179_vm2, %v11328_v45, 256  ;;  %1602 = vmatpush1.bf16.msra.mxu1 %v9844_v17  ;;  %1643 = vmatpush1.bf16.msra.mxu0 %v9847_v20  ;;  %v9907_v17 = vld [vmem:[%s14465_s5 + $0x148] ss:$16 sps:$4 sm:$0xff]   ;;  %v9912_v20 = vld [vmem:[%s14465_s5 + $0x124] ss:$16 sps:$4 sm:$0xff]  }
 0x28f   :  { %vm1182_vm3 = vcmp.lt.s32.totalorder %v1180_v47, %v1181_v48  ;;  %1603 = vmatprep.subr.bf16.mxu1 %v9852_v21  ;;  %1644 = vmatprep.subr.bf16.mxu0 %v9855_v63  ;;  %v9915_v21 = vld [vmem:[%s14465_s5 + $0x12c] ss:$16 sps:$4 sm:$0xff]   ;;  %v9910_v63 = vld [vmem:[%s14465_s5 + $0x120] ss:$16 sps:$4 sm:$0xff]  }
 0x290   :  { %v11332_v49 = vsel %vm1182_vm3, %v1180_v47, %v1181_v48  ;;  %v9880_v47 = vld [vmem:[%s14465_s5 + $0x1c0] ss:$16 sps:$4 sm:$0xff]   ;;  %v9883_v48 = vld [vmem:[%s14465_s5 + $0x1c8] ss:$16 sps:$4 sm:$0xff]  }
 0x291   :  { %v1185_v50 = vshra.s32 %v11332_v49, 16 }
 0x292   :  { %1604 = vmatpush1.bf16.msra.mxu1 %v9850_v22  ;;  %1645 = vmatpush1.bf16.msra.mxu0 %v9853_v23  ;;  %v9913_v22 = vld [vmem:[%s14465_s5 + $0x128] ss:$16 sps:$4 sm:$0xff]   ;;  %v1184_v23 = vand.u32 65535, %v11332_v49 }
 0x293   :  { %v11335_v51 = vcvt.s32.f32 %v1185_v50  ;;  %1605 = vmatprep.subr.bf16.mxu1 %v9858_v24  ;;  %1646 = vmatprep.subr.bf16.mxu0 %v9861_v0  ;;  %v9888_v50 = vld [vmem:[%s14465_s5 + $0x1a4] ss:$16 sps:$4 sm:$0xff]   ;;  %v9919_v49 = vld [vmem:[%s14465_s5 + $0x108] ss:$16 sps:$4 sm:$0xff]  }
 0x294   :  { %v1186_v0 = vcvt.s32.f32 %v1184_v23 }
 0x295   :  { %1188 = vmin.xlane.f32.xlu0 %v11335_v51 }
 0x296   :  { %1606 = vmatpush1.bf16.msra.mxu1 %v9856_v25  ;;  %1647 = vmatpush1.bf16.msra.mxu0 %v9859_v27  ;;  %v9918_v27 = vld [vmem:[%s14465_s5 + $0x104] ss:$16 sps:$4 sm:$0xff]  }
 0x297   :  { %1607 = vmatprep.subr.bf16.mxu1 %v9864_v28  ;;  %1648 = vmatprep.subr.bf16.mxu0 %v9867_v29  ;;  %v9921_v28 = vld [vmem:[%s14465_s5 + $0x10c] ss:$16 sps:$4 sm:$0xff]   ;;  %v9916_v29 = vld [vmem:[%s14465_s5 + $0x100] ss:$16 sps:$4 sm:$0xff]  }
 0x29a   :  { %1608 = vmatpush1.bf16.msra.mxu1 %v9862_v30  ;;  %1649 = vmatpush1.bf16.msra.mxu0 %v9865_v31 }
 0x29b   :  { %1609 = vmatprep.subr.bf16.mxu1 %v9870_v32  ;;  %1650 = vmatprep.subr.bf16.mxu0 %v9873_v33 }
 0x29e   :  { %1610 = vmatpush1.bf16.msra.mxu1 %v9868_v34  ;;  %1651 = vmatpush1.bf16.msra.mxu0 %v9871_v36  ;;  %v10812_v34 = vmov 1.0|1.0   ;;  %v1762_v36 = vld [vmem:[%s14459_s1 + $0x1c0] sm:$0xff] }
 0x29f   :  { %1611 = vmatprep.subr.bf16.mxu1 %v9876_v37  ;;  %1652 = vmatprep.subr.bf16.mxu0 %v9879_v38  ;;  %v1766_v37 = vld [vmem:[%s14459_s1 + $0x1e0] sm:$0xff]  ;;  %v1763_v38 = vld [vmem:[%s14459_s1 + $0x1c8] sm:$0xff] }
 0x2a2   :  { %1612 = vmatpush2.bf16.msra.mxu1 %v9874_v39  ;;  %1653 = vmatpush2.bf16.msra.mxu0 %v9877_v42  ;;  %v8933_v39 = vcombine.high %v1762_v36, %v1766_v37  ;;  %v1767_v42 = vld [vmem:[%s14459_s1 + $0x1e8] sm:$0xff] }
 0x2a3   :  { %1613 = vmatprep.subr.bf16.mxu1 %v9882_v43  ;;  %1654 = vmatprep.subr.bf16.mxu0 %v9885_v46  ;;  %v8932_v43 = vcombine.low %v1762_v36, %v1766_v37  ;;  %v8934_v46 = vcombine.low %v1763_v38, %v1767_v42  ;;  %v1723_v37 = vld [vmem:[%s14459_s1 + $0x88] sm:$0xff] }
 0x2a6   :  { %1614 = vmatpush2.bf16.msra.mxu1 %v9880_v47  ;;  %1655 = vmatpush2.bf16.msra.mxu0 %v9883_v48  ;;  %v8935_v47 = vcombine.high %v1763_v38, %v1767_v42  ;;  %v1754_v48 = vld [vmem:[%s14459_s1 + $0x180] sm:$0xff]  ;;  %v1727_v38 = vld [vmem:[%s14459_s1 + $0xa8] sm:$0xff] }
 0x2a7   :  { %1615 = vmatprep.subr.bf16.mxu1 %v9888_v50  ;;  %1656 = vmatprep.subr.bf16.mxu0 %v9891_v52  ;;  %v1758_v50 = vld [vmem:[%s14459_s1 + $0x1a0] sm:$0xff] }
 0x2a8   :  { %v8925_v52 = vcombine.high %v1754_v48, %v1758_v50  ;;  %v1714_v42 = vld [vmem:[%s14459_s1 + $0x40] sm:$0xff] }
 0x2aa   :  { %1616 = vmatpush2.bf16.msra.mxu1 %v9886_v60  ;;  %1657 = vmatpush2.bf16.msra.mxu0 %v9889_v53  ;;  %v1755_v60 = vld [vmem:[%s14459_s1 + $0x188] sm:$0xff] }
 0x2ab   :  { %1617 = vmatprep.subr.bf16.mxu1 %v9894_v54  ;;  %1658 = vmatprep.subr.bf16.mxu0 %v9897_v57  ;;  %v1759_v53 = vld [vmem:[%s14459_s1 + $0x1a8] sm:$0xff]  ;;  %v8924_v54 = vcombine.low %v1754_v48, %v1758_v50  ;;  %v11627_v50 = vld [vmem:[%s14459_s1 + $0x1d0] sm:$0xff] }
 0x2ac   :  { %v8926_v57 = vcombine.low %v1755_v60, %v1759_v53 }
 0x2ae   :  { %1618 = vmatpush2.bf16.msra.mxu1 %v9892_v59  ;;  %1659 = vmatpush2.bf16.msra.mxu0 %v9895_v4  ;;  %v8927_v59 = vcombine.high %v1755_v60, %v1759_v53  ;;  %v1746_v4 = vld [vmem:[%s14459_s1 + $0x140] sm:$0xff]  ;;  %v11632_v60 = vld [vmem:[%s14459_s1 + $0x1f0] sm:$0xff] }
 0x2af   :  { %1619 = vmatprep.subr.bf16.mxu1 %v9900_v5  ;;  %1660 = vmatprep.subr.bf16.mxu0 %v9903_v6  ;;  %v1750_v5 = vld [vmem:[%s14459_s1 + $0x160] sm:$0xff]  ;;  %v1747_v6 = vld [vmem:[%s14459_s1 + $0x148] sm:$0xff] }
 0x2b2   :  { %1620 = vmatpush2.bf16.msra.mxu1 %v9898_v7  ;;  %1661 = vmatpush2.bf16.msra.mxu0 %v9901_v8  ;;  %v8917_v7 = vcombine.high %v1746_v4, %v1750_v5  ;;  %v1751_v8 = vld [vmem:[%s14459_s1 + $0x168] sm:$0xff] }
 0x2b3   :  { %1621 = vmatprep.subr.bf16.mxu1 %v9906_v9  ;;  %1662 = vmatprep.subr.bf16.mxu0 %v9909_v12  ;;  %v8916_v9 = vcombine.low %v1746_v4, %v1750_v5  ;;  %v8918_v12 = vcombine.low %v1747_v6, %v1751_v8  ;;  %v1706_v5 = vld [vmem:[%s14459_s1] sm:$0xff] }
 0x2b6   :  { %1622 = vmatpush2.bf16.msra.mxu1 %v9904_v14  ;;  %1663 = vmatpush2.bf16.msra.mxu0 %v9907_v17  ;;  %v8919_v14 = vcombine.high %v1747_v6, %v1751_v8  ;;  %v1738_v17 = vld [vmem:[%s14459_s1 + $0x100] sm:$0xff]  ;;  %v1707_v8 = vld [vmem:[%s14459_s1 + $0x8] sm:$0xff] }
 0x2b7   :  { %1623 = vmatprep.subr.bf16.mxu1 %v9912_v20  ;;  %1664 = vmatprep.subr.bf16.mxu0 %v9915_v21  ;;  %v1742_v20 = vld [vmem:[%s14459_s1 + $0x120] sm:$0xff]  ;;  %v1739_v21 = vld [vmem:[%s14459_s1 + $0x108] sm:$0xff] }
 0x2b8   :  { %v8908_v23 = vcombine.low %v1738_v17, %v1742_v20  ;;  %v1710_v6 = vld [vmem:[%s14459_s1 + $0x20] sm:$0xff] }
 0x2ba   :  { %1624 = vmatpush2.bf16.msra.mxu1 %v9910_v63  ;;  %1665 = vmatpush2.bf16.msra.mxu0 %v9913_v22  ;;  %v8909_v63 = vcombine.high %v1738_v17, %v1742_v20  ;;  %v1743_v22 = vld [vmem:[%s14459_s1 + $0x128] sm:$0xff]  ;;  %v8877_v17 = vcombine.high %v1706_v5, %v1710_v6 }
 0x2bb   :  { %1625 = vmatprep.subr.bf16.mxu1 %v9918_v27  ;;  %1666 = vmatprep.subr.bf16.mxu0 %v9921_v28  ;;  %v1734_v27 = vld [vmem:[%s14459_s1 + $0xe0] sm:$0xff]  ;;  %v1731_v28 = vld [vmem:[%s14459_s1 + $0xc8] sm:$0xff] }
 0x2be   :  { %1626 = vmatpush2.bf16.msra.mxu1 %v9916_v29  ;;  %1667 = vmatpush2.bf16.msra.mxu0 %v9919_v49 }
 0x2bf   :  { %2090 = vmatprep.subr.bf16.mxu1 %v8933_v39  ;;  %2131 = vmatprep.subr.bf16.mxu0 %v8935_v47  ;;  %v8895_v39 = vcombine.high %v1723_v37, %v1727_v38  ;;  %v1719_v47 = vld [vmem:[%s14459_s1 + $0x68] sm:$0xff] }
 0x31e   :  { %v1189_v24 = vpop.xlane.xlu0 %1188 }
 0x31f   :  { %vm1190_vm4 = vcmp.eq.f32.partialorder %v11335_v51, %v1189_v24  ;;  %v1195_v51 = vcvt.f32.s32 %v1189_v24  ;;  %v8910_v24 = vcombine.low %v1739_v21, %v1743_v22 }
 0x320   :  { %v1191_v25 = vsel %vm1190_vm4, %v1186_v0, inf  ;;  %v8911_v0 = vcombine.high %v1739_v21, %v1743_v22  ;;  %v8876_v21 = vcombine.low %v1706_v5, %v1710_v6  ;;  %v8937_v22 = vcombine.high %v11627_v50, %v11632_v60 }
 0x321   :  { %1192 = vmin.xlane.f32.xlu1 %v1191_v25  ;;  %v1196_v31 = vshll.u32 %v1195_v51, 16  ;;  %v1730_v25 = vld [vmem:[%s14459_s1 + $0xc0] sm:$0xff]  ;;  %v1735_v51 = vld [vmem:[%s14459_s1 + $0xe8] sm:$0xff] }
 0x322   :  { %v8900_v29 = vcombine.low %v1730_v25, %v1734_v27  ;;  %v8901_v49 = vcombine.high %v1730_v25, %v1734_v27  ;;  %v8798_v27 = vld [vmem:[%s14460_s0 + $0x28] sm:$0xff] }
 0x3aa   :  { %v1193_v30 = vpop.xlane.xlu1 %1192 }
 0x3ab   :  { %v1194_v32 = vcvt.f32.s32 %v1193_v30  ;;  %v1722_v30 = vld [vmem:[%s14459_s1 + $0x80] sm:$0xff] }
 0x3ad   :  { %v1197_v33 = vadd.s32 %v1196_v31, %v1194_v32  ;;  %v1726_v31 = vld [vmem:[%s14459_s1 + $0xa0] sm:$0xff]  ;;  %v8902_v32 = vcombine.low %v1731_v28, %v1735_v51 }
 0x3ae   :  { %v8893_v36 = vcombine.high %v1722_v30, %v1726_v31  ;;  %v8892_v48 = vcombine.low %v1722_v30, %v1726_v31 }
 0x3af   :  { %vm1198_vm5 = vcmp.eq.s32.totalorder %v11325_v44, %v1197_v33  ;;  %vm1199_vm6 = vcmp.eq.s32.totalorder %v11328_v45, %v1197_v33  ;;  %v8903_v33 = vcombine.high %v1731_v28, %v1735_v51 }
 0x3b0   :  { %vm8867_vm7 = vmpackc.low %vm1198_vm5, %vm1198_vm5 }
 0x3b1   :  { %vm8865_vm8 = vmpackc.low %vm1199_vm6, %vm1199_vm6 }
 0x3b2   :  { %8866 = vmatprep.mubr.msk.bf16.mxu1 %vm8865_vm8, %v10812_v34  ;;  %8870 = vmatprep.mubr.msk.bf16.mxu0 %vm8865_vm8, %v10812_v34 }
 0x3b3   :  { %8868 = vmatmul.mubr.msk.bf16.vlgmr.msra.gmra.mxu1 %vm8867_vm7, %v10812_v34  ;;  %8872 = vmatmul.mubr.msk.bf16.vlgmr.msra.gmra.mxu0 %vm8867_vm7, %v10812_v34 }
 0x3b4   :  { %2122 = vmatprep.mubr.bf16.mxu1 %v10810_v3  ;;  %2163 = vmatprep.mubr.bf16.mxu0 %v10810_v3 }
 0x3b5   :  { %2091 = vmatpush1.bf16.msra.mxu1 %v8932_v43  ;;  %2132 = vmatpush1.bf16.msra.mxu0 %v8934_v46  ;;  %v1718_v43 = vld [vmem:[%s14459_s1 + $0x60] sm:$0xff]  ;;  %v1715_v46 = vld [vmem:[%s14459_s1 + $0x48] sm:$0xff] }
 0x3b6   :  { %2092 = vmatprep.subr.bf16.mxu1 %v8925_v52  ;;  %2133 = vmatprep.subr.bf16.mxu0 %v8927_v59  ;;  %v8894_v52 = vcombine.low %v1723_v37, %v1727_v38  ;;  %v8885_v53 = vcombine.high %v1714_v42, %v1718_v43  ;;  %v11644_v59 = vld [vmem:[%s14459_s1 + $0x1f8] sm:$0xff]  ;;  %v8887_v4 = vcombine.high %v1715_v46, %v1719_v47 }
 0x3b9   :  { %2093 = vmatpush1.bf16.msra.mxu1 %v8924_v54  ;;  %2134 = vmatpush1.bf16.msra.mxu0 %v8926_v57  ;;  %v8936_v54 = vcombine.low %v11627_v50, %v11632_v60  ;;  %v11639_v57 = vld [vmem:[%s14459_s1 + $0x1d8] sm:$0xff] }
 0x3ba   :  { %2094 = vmatprep.subr.bf16.mxu1 %v8917_v7  ;;  %2135 = vmatprep.subr.bf16.mxu0 %v8919_v14  ;;  %v8938_v7 = vcombine.low %v11639_v57, %v11644_v59  ;;  %v8886_v14 = vcombine.low %v1715_v46, %v1719_v47  ;;  %v1741_v50 = vld [vmem:[%s14459_s1 + $0x118] sm:$0xff] }
 0x3bb   :  { %v1745_v60 = vld [vmem:[%s14459_s1 + $0x138] sm:$0xff] }
 0x3bd   :  { %2095 = vmatpush1.bf16.msra.mxu1 %v8916_v9  ;;  %2136 = vmatpush1.bf16.msra.mxu0 %v8918_v12  ;;  %v1711_v9 = vld [vmem:[%s14459_s1 + $0x28] sm:$0xff]  ;;  %v8884_v12 = vcombine.low %v1714_v42, %v1718_v43  ;;  %v8800_v42 = vld [vmem:[%s14460_s0 + $0x38] sm:$0xff] }
 0x3be   :  { %2096 = vmatprep.subr.bf16.mxu1 %v8909_v63  ;;  %2137 = vmatprep.subr.bf16.mxu0 %v8911_v0  ;;  %v8879_v20 = vcombine.high %v1707_v8, %v1711_v9  ;;  %v8878_v63 = vcombine.low %v1707_v8, %v1711_v9 }
 0x3c1   :  { %2097 = vmatpush1.bf16.msra.mxu1 %v8908_v23  ;;  %2138 = vmatpush1.bf16.msra.mxu0 %v8910_v24  ;;  %v8939_v23 = vcombine.high %v11639_v57, %v11644_v59  ;;  %v8797_v24 = vld [vmem:[%s14460_s0 + $0x20] sm:$0xff] }
 0x3c2   :  { %2098 = vmatprep.subr.bf16.mxu1 %v8901_v49  ;;  %2139 = vmatprep.subr.bf16.mxu0 %v8903_v33 }
 0x3c5   :  { %2099 = vmatpush1.bf16.msra.mxu1 %v8900_v29  ;;  %2140 = vmatpush1.bf16.msra.mxu0 %v8902_v32 }
 0x3c6   :  { %2100 = vmatprep.subr.bf16.mxu1 %v8893_v36  ;;  %2141 = vmatprep.subr.bf16.mxu0 %v8895_v39 }
 0x3c9   :  { %2101 = vmatpush1.bf16.msra.mxu1 %v8892_v48  ;;  %2142 = vmatpush1.bf16.msra.mxu0 %v8894_v52 }
 0x3ca   :  { %2102 = vmatprep.subr.bf16.mxu1 %v8885_v53  ;;  %2143 = vmatprep.subr.bf16.mxu0 %v8887_v4 }
 0x3cd   :  { %2103 = vmatpush1.bf16.msra.mxu1 %v8884_v12  ;;  %2144 = vmatpush1.bf16.msra.mxu0 %v8886_v14 }
 0x3ce   :  { %2104 = vmatprep.subr.bf16.mxu1 %v8877_v17  ;;  %2145 = vmatprep.subr.bf16.mxu0 %v8879_v20 }
 0x3d1   :  { %2105 = vmatpush1.bf16.msra.mxu1 %v8876_v21  ;;  %2146 = vmatpush1.bf16.msra.mxu0 %v8878_v63  ;;  %v1756_v21 = vld [vmem:[%s14459_s1 + $0x190] sm:$0xff] }
 0x3d2   :  { %2172 = vmatprep.subr.bf16.mxu1 %v8937_v22  ;;  %2213 = vmatprep.subr.bf16.mxu0 %v8939_v23  ;;  %v1760_v22 = vld [vmem:[%s14459_s1 + $0x1b0] sm:$0xff]  ;;  %v1757_v23 = vld [vmem:[%s14459_s1 + $0x198] sm:$0xff] }
 0x473   :  { %v1629_v0 = vpop.f32.mrf.mxu1  ;;  %v1670_v25 = vpop.f32.mrf.mxu0 }
 0x474   :  { %v1630_v28 = vadd.f32 %v8797_v24, %v1629_v0 }
 0x475   :  { %v1631_v29 = vpop.f32.mrf.mxu1  ;;  %v1672_v49 = vpop.f32.mrf.mxu0 }
 0x476   :  { %v1677_v51 = vadd.f32 %v1630_v28, %v11241_v55  ;;  %v1632_v30 = vadd.f32 %v8798_v27, %v1631_v29  ;;  %v1673_v43 = vadd.f32 %v8800_v42, %v1672_v49  ;;  %v8799_v55 = vld [vmem:[%s14460_s0 + $0x30] sm:$0xff]  ;;  %v1749_v49 = vld [vmem:[%s14459_s1 + $0x158] sm:$0xff] }
 0x477   :  { %v1633_v31 = vpop.f32.mrf.mxu1  ;;  %v1674_v32 = vpop.f32.mrf.mxu0  ;;  %v1671_v47 = vadd.f32 %v8799_v55, %v1670_v25  ;;  %v8929_v25 = vcombine.high %v1756_v21, %v1760_v22  ;;  %v1748_v28 = vld [vmem:[%s14459_s1 + $0x150] sm:$0xff]  ;;  %v1733_v42 = vld [vmem:[%s14459_s1 + $0xd8] sm:$0xff] }
 0x478   :  { %v8873_v33 = vmul.f32 -1.442695, %v1677_v51  ;;  %v1678_v36 = vadd.f32 %v1632_v30, %v11243_v56  ;;  %v1680_v46 = vadd.f32 %v1673_v43, %v11247_v62  ;;  %v1752_v29 = vld [vmem:[%s14459_s1 + $0x170] sm:$0xff]  ;;  %v1753_v51 = vld [vmem:[%s14459_s1 + $0x178] sm:$0xff]  ;;  %v8928_v30 = vcombine.low %v1756_v21, %v1760_v22 }
 0x479   :  { %v1634_v37 = vpop.f32.mrf.mxu1  ;;  %v1675_v38 = vpop.f32.mrf.mxu0  ;;  %v1679_v56 = vadd.f32 %v1671_v47, %v11245_v58  ;;  %v8921_v32 = vcombine.high %v1748_v28, %v1752_v29  ;;  %v8922_v57 = vcombine.low %v1749_v49, %v1753_v51  ;;  %v1737_v43 = vld [vmem:[%s14459_s1 + $0xf8] sm:$0xff] }
 0x47a   :  { %10650 = vpow2.f32 %v8873_v33  ;;  %v8874_v39 = vmul.f32 -1.442695, %v1678_v36  ;;  %v8875_v48 = vmul.f32 -1.442695, %v1680_v46  ;;  %v8923_v33 = vcombine.high %v1749_v49, %v1753_v51  ;;  %v1740_v36 = vld [vmem:[%s14459_s1 + $0x110] sm:$0xff] }
 0x47b   :  { %v1744_v37 = vld [vmem:[%s14459_s1 + $0x130] sm:$0xff]  ;;  %v8914_v46 = vcombine.low %v1741_v50, %v1745_v60 }
 0x47c   :  { %10652 = vpow2.f32 %v8874_v39  ;;  %v8913_v59 = vcombine.high %v1740_v36, %v1744_v37  ;;  %v1732_v38 = vld [vmem:[%s14459_s1 + $0xd0] sm:$0xff]  ;;  %v8912_v55 = vcombine.low %v1740_v36, %v1744_v37  ;;  %v9930_v36 = vld [vmem:[%s14461_s2 + $0x124] ss:$24 sps:$4 sm:$0xff]   ;;  %v9928_v37 = vld [vmem:[%s14461_s2 + $0x120] ss:$24 sps:$4 sm:$0xff]  }
 0x47d   :  { %10654 = vpow2.f32 %v8875_v48  ;;  %v1736_v39 = vld [vmem:[%s14459_s1 + $0xf0] sm:$0xff]  ;;  %v8907_v48 = vcombine.high %v1733_v42, %v1737_v43 }
 0x47e   :  { %v8905_v47 = vcombine.high %v1732_v38, %v1736_v39 }
 0x487   :  { %v10651_v52 = vpop.eup %10650 }
 0x488   :  { %v1684_v53 = vadd.f32 1.0, %v10651_v52  ;;  %v1724_v52 = vld [vmem:[%s14459_s1 + $0x90] sm:$0xff] }
 0x489   :  { %v10653_v4 = vpop.eup %10652 }
 0x48a   :  { %10656 = vrcp.f32 %v1684_v53  ;;  %v1690_v5 = vadd.f32 1.0, %v10653_v4  ;;  %v10655_v6 = vpop.eup %10654  ;;  %v1725_v53 = vld [vmem:[%s14459_s1 + $0x98] sm:$0xff] }
 0x48b   :  { %10658 = vtanh.f32 %v1679_v56  ;;  %v1697_v14 = vadd.f32 1.0, %v10655_v6  ;;  %v1728_v56 = vld [vmem:[%s14459_s1 + $0xb0] sm:$0xff]  ;;  %v1729_v4 = vld [vmem:[%s14459_s1 + $0xb8] sm:$0xff]  ;;  %v8906_v6 = vcombine.low %v1733_v42, %v1737_v43  ;;  %v9945_v42 = vld [vmem:[%s14461_s2 + $0xcc] ss:$24 sps:$4 sm:$0xff]  }
 0x48c   :  { %10660 = vrcp.f32 %v1690_v5  ;;  %v8904_v5 = vcombine.low %v1732_v38, %v1736_v39  ;;  %v8898_v21 = vcombine.low %v1725_v53, %v1729_v4  ;;  %v9942_v38 = vld [vmem:[%s14461_s2 + $0xc4] ss:$24 sps:$4 sm:$0xff]   ;;  %v9940_v39 = vld [vmem:[%s14461_s2 + $0xc0] ss:$24 sps:$4 sm:$0xff]  }
 0x48d   :  { %10662 = vrcp.f32 %v1697_v14  ;;  %v1720_v14 = vld [vmem:[%s14459_s1 + $0x70] sm:$0xff]  ;;  %v9943_v43 = vld [vmem:[%s14461_s2 + $0xc8] ss:$24 sps:$4 sm:$0xff]  }
 0x497   :  { %v10657_v8 = vpop.eup %10656 }
 0x498   :  { %v10659_v9 = vpop.eup %10658 }
 0x499   :  { %v10661_v12 = vpop.eup %10660  ;;  %v1701_v17 = vmul.f32 %v10659_v9, %v10657_v8  ;;  %v8897_v8 = vcombine.high %v1724_v52, %v1728_v56  ;;  %v8899_v9 = vcombine.high %v1725_v53, %v1729_v4  ;;  %v9952_v53 = vld [vmem:[%s14461_s2 + $0x60] ss:$24 sps:$4 sm:$0xff]  }
 0x49a   :  { %v1700_v62 = vmul.f32 %v10661_v12, %v10970_v26  ;;  %v10663_v58 = vpop.eup %10662  ;;  %v1761_v26 = vld [vmem:[%s14459_s1 + $0x1b8] sm:$0xff]  ;;  %v1716_v12 = vld [vmem:[%s14459_s1 + $0x50] sm:$0xff]  ;;  %v9955_v4 = vld [vmem:[%s14461_s2 + $0x68] ss:$24 sps:$4 sm:$0xff]  }
 0x49b   :  { %v8931_v27 = vcombine.high %v1757_v23, %v1761_v26  ;;  %v8930_v31 = vcombine.low %v1757_v23, %v1761_v26  ;;  %v1708_v23 = vld [vmem:[%s14459_s1 + $0x10] sm:$0xff] }
 0x49c   :  { %v11681_v20 = vadd.f32 %v1701_v17, %v1700_v62  ;;  %v1717_v17 = vld [vmem:[%s14459_s1 + $0x58] sm:$0xff]  ;;  %v1712_v26 = vld [vmem:[%s14459_s1 + $0x30] sm:$0xff] }
 0x49d   :  { %v1721_v62 = vld [vmem:[%s14459_s1 + $0x78] sm:$0xff]  ;;  %v8880_v51 = vcombine.low %v1708_v23, %v1712_v26 }
 0x49e   :  { %10664 = vtanh.f32 %v11681_v20  ;;  %v8891_v22 = vcombine.high %v1717_v17, %v1721_v62 }
 0x4ab   :  { %v10665_v63 = vpop.eup %10664 }
 0x4ac   :  { %v1704_v24 = vmul.f32 %v10665_v63, %v10663_v58  ;;  %v8896_v58 = vcombine.low %v1724_v52, %v1728_v56  ;;  %v8889_v63 = vcombine.high %v1716_v12, %v1720_v14  ;;  %v9954_v52 = vld [vmem:[%s14461_s2 + $0x64] ss:$24 sps:$4 sm:$0xff]  }
 0x4ad   :  { %v9957_v56 = vld [vmem:[%s14461_s2 + $0x6c] ss:$24 sps:$4 sm:$0xff]  }
 0x4ae   :  { %v11696_v0 = vpack.c.bf16 %v1704_v24, %v1704_v24  ;;  %v1709_v24 = vld [vmem:[%s14459_s1 + $0x18] sm:$0xff] }
 0x4b0   :  { %2123 = vmatmul.mubr.bf16.vlgmr.msra.gmra.mxu1 %v11696_v0  ;;  %2164 = vmatmul.mubr.bf16.vlgmr.msra.gmra.mxu0 %v11696_v0 }
 0x4b1   :  { %2173 = vmatpush1.bf16.msra.mxu1 %v8936_v54  ;;  %2214 = vmatpush1.bf16.msra.mxu0 %v8938_v7  ;;  %v8920_v54 = vcombine.low %v1748_v28, %v1752_v29  ;;  %v8915_v7 = vcombine.high %v1741_v50, %v1745_v60  ;;  %v8890_v28 = vcombine.low %v1717_v17, %v1721_v62  ;;  %v9933_v50 = vld [vmem:[%s14461_s2 + $0x12c] ss:$24 sps:$4 sm:$0xff]   ;;  %v9931_v60 = vld [vmem:[%s14461_s2 + $0x128] ss:$24 sps:$4 sm:$0xff]  }
 0x4b2   :  { %2174 = vmatprep.subr.bf16.mxu1 %v8929_v25  ;;  %2215 = vmatprep.subr.bf16.mxu0 %v8931_v27  ;;  %v1713_v25 = vld [vmem:[%s14459_s1 + $0x38] sm:$0xff]  ;;  %v8888_v27 = vcombine.low %v1716_v12, %v1720_v14  ;;  %v8881_v29 = vcombine.high %v1708_v23, %v1712_v26  ;;  %v9969_v14 = vld [vmem:[%s14461_s2 + $0xc] ss:$24 sps:$4 sm:$0xff]   ;;  %v9967_v62 = vld [vmem:[%s14461_s2 + $0x8] ss:$24 sps:$4 sm:$0xff]  }
 0x4b3   :  { %2204 = vmatprep.mubr.bf16.mxu1 %v10810_v3  ;;  %2245 = vmatprep.mubr.bf16.mxu0 %v10810_v3  ;;  %v8883_v49 = vcombine.high %v1709_v24, %v1713_v25  ;;  %v9966_v12 = vld [vmem:[%s14461_s2 + $0x4] ss:$24 sps:$4 sm:$0xff]   ;;  %v9964_v17 = vld [vmem:[%s14461_s2] ss:$24 sps:$4 sm:$0xff]  }
 0x4b5   :  { %2175 = vmatpush1.bf16.msra.mxu1 %v8928_v30  ;;  %2216 = vmatpush1.bf16.msra.mxu0 %v8930_v31  ;;  %v8882_v30 = vcombine.low %v1709_v24, %v1713_v25  ;;  %v9924_v31 = vld [vmem:[%s14461_s2 + $0x154] ss:$24 sps:$4 sm:$0xff]  }
 0x4b6   :  { %2176 = vmatprep.subr.bf16.mxu1 %v8921_v32  ;;  %2217 = vmatprep.subr.bf16.mxu0 %v8923_v33  ;;  %v9922_v32 = vld [vmem:[%s14461_s2 + $0x150] ss:$24 sps:$4 sm:$0xff]   ;;  %v9927_v33 = vld [vmem:[%s14461_s2 + $0x15c] ss:$24 sps:$4 sm:$0xff]  }
 0x4b9   :  { %2177 = vmatpush1.bf16.msra.mxu1 %v8920_v54  ;;  %2218 = vmatpush1.bf16.msra.mxu0 %v8922_v57  ;;  %v9936_v54 = vld [vmem:[%s14461_s2 + $0xf4] ss:$24 sps:$4 sm:$0xff]   ;;  %v9934_v57 = vld [vmem:[%s14461_s2 + $0xf0] ss:$24 sps:$4 sm:$0xff]  }
 0x4ba   :  { %2178 = vmatprep.subr.bf16.mxu1 %v8913_v59  ;;  %2219 = vmatprep.subr.bf16.mxu0 %v8915_v7  ;;  %v9939_v59 = vld [vmem:[%s14461_s2 + $0xfc] ss:$24 sps:$4 sm:$0xff]   ;;  %v9937_v7 = vld [vmem:[%s14461_s2 + $0xf8] ss:$24 sps:$4 sm:$0xff]  }
 0x4bd   :  { %2179 = vmatpush1.bf16.msra.mxu1 %v8912_v55  ;;  %2220 = vmatpush1.bf16.msra.mxu0 %v8914_v46  ;;  %v9948_v55 = vld [vmem:[%s14461_s2 + $0x94] ss:$24 sps:$4 sm:$0xff]   ;;  %v9946_v46 = vld [vmem:[%s14461_s2 + $0x90] ss:$24 sps:$4 sm:$0xff]  }
 0x4be   :  { %2180 = vmatprep.subr.bf16.mxu1 %v8905_v47  ;;  %2221 = vmatprep.subr.bf16.mxu0 %v8907_v48  ;;  %v9951_v47 = vld [vmem:[%s14461_s2 + $0x9c] ss:$24 sps:$4 sm:$0xff]   ;;  %v9949_v48 = vld [vmem:[%s14461_s2 + $0x98] ss:$24 sps:$4 sm:$0xff]  }
 0x4c1   :  { %2181 = vmatpush1.bf16.msra.mxu1 %v8904_v5  ;;  %2222 = vmatpush1.bf16.msra.mxu0 %v8906_v6  ;;  %v9960_v5 = vld [vmem:[%s14461_s2 + $0x34] ss:$24 sps:$4 sm:$0xff]  }
 0x4c2   :  { %2182 = vmatprep.subr.bf16.mxu1 %v8897_v8  ;;  %2223 = vmatprep.subr.bf16.mxu0 %v8899_v9  ;;  %v9963_v6 = vld [vmem:[%s14461_s2 + $0x3c] ss:$24 sps:$4 sm:$0xff]   ;;  %v9958_v8 = vld [vmem:[%s14461_s2 + $0x30] ss:$24 sps:$4 sm:$0xff]  }
 0x4c3   :  { %v9961_v9 = vld [vmem:[%s14461_s2 + $0x38] ss:$24 sps:$4 sm:$0xff]  }
 0x4c5   :  { %2183 = vmatpush1.bf16.msra.mxu1 %v8896_v58  ;;  %2224 = vmatpush1.bf16.msra.mxu0 %v8898_v21  ;;  %v9972_v58 = vld [vmem:[%s14461_s2 + $0x164] ss:$24 sps:$4 sm:$0xff]  }
 0x4c6   :  { %2184 = vmatprep.subr.bf16.mxu1 %v8889_v63  ;;  %2225 = vmatprep.subr.bf16.mxu0 %v8891_v22 }
 0x4c9   :  { %2185 = vmatpush1.bf16.msra.mxu1 %v8888_v27  ;;  %2226 = vmatpush1.bf16.msra.mxu0 %v8890_v28 }
 0x4ca   :  { %2186 = vmatprep.subr.bf16.mxu1 %v8881_v29  ;;  %2227 = vmatprep.subr.bf16.mxu0 %v8883_v49 }
 0x4cd   :  { %2187 = vmatpush1.bf16.msra.mxu1 %v8880_v51  ;;  %2228 = vmatpush1.bf16.msra.mxu0 %v8882_v30 }
 0x4ce   :  { %2575 = vmatprep.subr.bf16.mxu1 %v9924_v31  ;;  %2616 = vmatprep.subr.bf16.mxu0 %v9927_v33 }
 0x4d0   :  { %2205 = vmatmul.mubr.bf16.vlgmr.msra.gmra.mxu1 %v11696_v0  ;;  %2246 = vmatmul.mubr.bf16.vlgmr.msra.gmra.mxu0 %v11696_v0  ;;  %v9925_v0 = vld [vmem:[%s14461_s2 + $0x158] ss:$24 sps:$4 sm:$0xff]  }
 0x4d1   :  { %2607 = vmatprep.mubr.bf16.mxu1 %v10810_v3  ;;  %2648 = vmatprep.mubr.bf16.mxu0 %v10810_v3 }
 0x4d2   :  { %2576 = vmatpush1.bf16.msra.mxu1 %v9922_v32  ;;  %2617 = vmatpush1.bf16.msra.mxu0 %v9925_v0 }
 0x4d3   :  { %2577 = vmatprep.subr.bf16.mxu1 %v9930_v36  ;;  %2618 = vmatprep.subr.bf16.mxu0 %v9933_v50 }
 0x4d6   :  { %2578 = vmatpush1.bf16.msra.mxu1 %v9928_v37  ;;  %2619 = vmatpush1.bf16.msra.mxu0 %v9931_v60 }
 0x4d7   :  { %2579 = vmatprep.subr.bf16.mxu1 %v9936_v54  ;;  %2620 = vmatprep.subr.bf16.mxu0 %v9939_v59 }
 0x4da   :  { %2580 = vmatpush1.bf16.msra.mxu1 %v9934_v57  ;;  %2621 = vmatpush1.bf16.msra.mxu0 %v9937_v7 }
 0x4db   :  { %2581 = vmatprep.subr.bf16.mxu1 %v9942_v38  ;;  %2622 = vmatprep.subr.bf16.mxu0 %v9945_v42 }
 0x4de   :  { %2582 = vmatpush1.bf16.msra.mxu1 %v9940_v39  ;;  %2623 = vmatpush1.bf16.msra.mxu0 %v9943_v43 }
 0x4df   :  { %2583 = vmatprep.subr.bf16.mxu1 %v9948_v55  ;;  %2624 = vmatprep.subr.bf16.mxu0 %v9951_v47 }
 0x4e2   :  { %2584 = vmatpush1.bf16.msra.mxu1 %v9946_v46  ;;  %2625 = vmatpush1.bf16.msra.mxu0 %v9949_v48 }
 0x4e3   :  { %2585 = vmatprep.subr.bf16.mxu1 %v9954_v52  ;;  %2626 = vmatprep.subr.bf16.mxu0 %v9957_v56 }
 0x4e6   :  { %2586 = vmatpush1.bf16.msra.mxu1 %v9952_v53  ;;  %2627 = vmatpush1.bf16.msra.mxu0 %v9955_v4 }
 0x4e7   :  { %2587 = vmatprep.subr.bf16.mxu1 %v9960_v5  ;;  %2628 = vmatprep.subr.bf16.mxu0 %v9963_v6  ;;  %v9970_v6 = vld [vmem:[%s14461_s2 + $0x160] ss:$24 sps:$4 sm:$0xff]  }
 0x4ea   :  { %2588 = vmatpush1.bf16.msra.mxu1 %v9958_v8  ;;  %2629 = vmatpush1.bf16.msra.mxu0 %v9961_v9  ;;  %v9975_v9 = vld [vmem:[%s14461_s2 + $0x134] ss:$24 sps:$4 sm:$0xff]  }
 0x4eb   :  { %2589 = vmatprep.subr.bf16.mxu1 %v9966_v12  ;;  %2630 = vmatprep.subr.bf16.mxu0 %v9969_v14  ;;  %v9978_v12 = vld [vmem:[%s14461_s2 + $0x104] ss:$24 sps:$4 sm:$0xff]   ;;  %v9976_v14 = vld [vmem:[%s14461_s2 + $0x100] ss:$24 sps:$4 sm:$0xff]  }
 0x4ee   :  { %2590 = vmatpush1.bf16.msra.mxu1 %v9964_v17  ;;  %2631 = vmatpush1.bf16.msra.mxu0 %v9967_v62  ;;  %v9981_v17 = vld [vmem:[%s14461_s2 + $0xd4] ss:$24 sps:$4 sm:$0xff]   ;;  %v9979_v62 = vld [vmem:[%s14461_s2 + $0xd0] ss:$24 sps:$4 sm:$0xff]  }
 0x4ef   :  { %2657 = vmatprep.subr.bf16.mxu1 %v9972_v58  ;;  %v9984_v58 = vld [vmem:[%s14461_s2 + $0xa4] ss:$24 sps:$4 sm:$0xff]  }
 0x570   :  { %v2124_v21 = vpop.f32.mrf.mxu1  ;;  %v2165_v63 = vpop.f32.mrf.mxu0 }
 0x571   :  { %v2254_v22 = vadd.f32 %v2124_v21, %v11176_v1  ;;  %v2256_v0 = vadd.f32 %v2165_v63, %v11188_v19  ;;  %v9982_v21 = vld [vmem:[%s14461_s2 + $0xa0] ss:$24 sps:$4 sm:$0xff]   ;;  %v9987_v63 = vld [vmem:[%s14461_s2 + $0x74] ss:$24 sps:$4 sm:$0xff]  }
 0x572   :  { %v2126_v23 = vpop.f32.mrf.mxu1  ;;  %v2167_v26 = vpop.f32.mrf.mxu0 }
 0x573   :  { %v2258_v24 = vadd.f32 %v2254_v22, %v11260_v13  ;;  %v2255_v25 = vadd.f32 %v2126_v23, %v11180_v2  ;;  %v2257_v32 = vadd.f32 %v2167_v26, %v11186_v18  ;;  %v2260_v37 = vadd.f32 %v2256_v0, %v11320_v40  ;;  %v9985_v22 = vld [vmem:[%s14461_s2 + $0x70] ss:$24 sps:$4 sm:$0xff]   ;;  %v9990_v23 = vld [vmem:[%s14461_s2 + $0x44] ss:$24 sps:$4 sm:$0xff]   ;;  %v9988_v26 = vld [vmem:[%s14461_s2 + $0x40] ss:$24 sps:$4 sm:$0xff]  }
 0x574   :  { %v2128_v27 = vpop.f32.mrf.mxu1  ;;  %v2169_v28 = vpop.f32.mrf.mxu0 }
 0x575   :  { %v8940_v29 = vmul.f32 -1.442695, %v2258_v24  ;;  %v2259_v49 = vadd.f32 %v2255_v25, %v11262_v15  ;;  %v2261_v33 = vadd.f32 %v2257_v32, %v11322_v41  ;;  %v9993_v24 = vld [vmem:[%s14461_s2 + $0x14] ss:$24 sps:$4 sm:$0xff]   ;;  %v9991_v25 = vld [vmem:[%s14461_s2 + $0x10] ss:$24 sps:$4 sm:$0xff]  }
 0x576   :  { %v2129_v51 = vpop.f32.mrf.mxu1  ;;  %v2170_v30 = vpop.f32.mrf.mxu0 }
 0x577   :  { %10666 = vpow2.f32 %v8940_v29  ;;  %v8941_v31 = vmul.f32 -1.442695, %v2259_v49  ;;  %v8942_v36 = vmul.f32 -1.442695, %v2261_v33 }
 0x579   :  { %10668 = vpow2.f32 %v8941_v31 }
 0x57a   :  { %10670 = vpow2.f32 %v8942_v36 }
 0x584   :  { %v10667_v13 = vpop.eup %10666 }
 0x585   :  { %v2265_v50 = vadd.f32 1.0, %v10667_v13 }
 0x586   :  { %v10669_v60 = vpop.eup %10668 }
 0x587   :  { %10672 = vrcp.f32 %v2265_v50  ;;  %v2271_v15 = vadd.f32 1.0, %v10669_v60  ;;  %v10671_v7 = vpop.eup %10670 }
 0x588   :  { %10674 = vtanh.f32 %v2260_v37  ;;  %v2278_v55 = vadd.f32 1.0, %v10671_v7 }
 0x589   :  { %10676 = vrcp.f32 %v2271_v15 }
 0x58a   :  { %10678 = vrcp.f32 %v2278_v55 }
 0x590   :  { %v11891_v54 = vpop.f32.mrf.mxu1  ;;  %v11893_v57 = vpop.f32.mrf.mxu0 }
 0x592   :  { %v11895_v59 = vpop.f32.mrf.mxu1  ;;  %v11897_v41 = vpop.f32.mrf.mxu0 }
 0x594   :  { %v10673_v38 = vpop.eup %10672  ;;  %v2210_v39 = vpop.f32.mrf.mxu1 }
 0x595   :  { %v2251_v42 = vpop.f32.mrf.mxu0  ;;  %v10675_v40 = vpop.eup %10674 }
 0x596   :  { %v10677_v43 = vpop.eup %10676  ;;  %v2211_v46 = vpop.f32.mrf.mxu1  ;;  %v2282_v48 = vmul.f32 %v10675_v40, %v10673_v38 }
 0x597   :  { %v2252_v47 = vpop.f32.mrf.mxu0  ;;  %v2281_v52 = vmul.f32 %v10677_v43, %v11192_v35  ;;  %v10679_v53 = vpop.eup %10678  ;;  %v9973_v35 = vld [vmem:[%s14461_s2 + $0x130] ss:$24 sps:$4 sm:$0xff]  }
 0x599   :  { %v11900_v56 = vadd.f32 %v2282_v48, %v2281_v52 }
 0x59b   :  { %10680 = vtanh.f32 %v11900_v56 }
 0x5a8   :  { %v10681_v4 = vpop.eup %10680 }
 0x5a9   :  { %v2285_v5 = vmul.f32 %v10681_v4, %v10679_v53 }
 0x5ab   :  { %v2286_v8 = vpack.c.bf16 %v2285_v5, %v2285_v5 }
 0x5ad   :  { %2608 = vmatmul.mubr.bf16.vlgmr.msra.gmra.mxu1 %v2286_v8  ;;  %2649 = vmatmul.mubr.bf16.vlgmr.msra.gmra.mxu0 %v2286_v8 }
 0x5ae   :  { %2658 = vmatpush1.bf16.msra.mxu1 %v9970_v6  ;;  %2689 = vmatprep.mubr.bf16.mxu1 %v10810_v3 }
 0x5af   :  { %2659 = vmatprep.subr.bf16.mxu1 %v9975_v9 }
 0x5b2   :  { %2660 = vmatpush1.bf16.msra.mxu1 %v9973_v35 }
 0x5b3   :  { %2661 = vmatprep.subr.bf16.mxu1 %v9978_v12 }
 0x5b6   :  { %2662 = vmatpush1.bf16.msra.mxu1 %v9976_v14  ;;  %v9994_v14 = vld [vmem:[%s14465_s5 + $0xe0] ss:$16 sps:$4 sm:$0xff]  }
 0x5b7   :  { %2663 = vmatprep.subr.bf16.mxu1 %v9981_v17  ;;  %v9996_v17 = vld [vmem:[%s14465_s5 + $0xe4] ss:$16 sps:$4 sm:$0xff]  }
 0x5b8   :  { %3204 = vmatprep.subr.bf16.mxu0 %v9996_v17  ;;  %v10059_v17 = vld [vmem:[%s14465_s5 + $0x1ac] ss:$16 sps:$4 sm:$0xff]  }
 0x5b9   :  { %3205 = vmatpush1.bf16.msra.mxu0 %v9994_v14  ;;  %v10056_v14 = vld [vmem:[%s14465_s5 + $0x1a4] ss:$16 sps:$4 sm:$0xff]  }
 0x5ba   :  { %2664 = vmatpush1.bf16.msra.mxu1 %v9979_v62  ;;  %v9997_v62 = vld [vmem:[%s14465_s5 + $0xe8] ss:$16 sps:$4 sm:$0xff]  }
 0x5bb   :  { %2665 = vmatprep.subr.bf16.mxu1 %v9984_v58  ;;  %v9999_v58 = vld [vmem:[%s14465_s5 + $0xec] ss:$16 sps:$4 sm:$0xff]  }
 0x5be   :  { %2666 = vmatpush1.bf16.msra.mxu1 %v9982_v21  ;;  %v10002_v21 = vld [vmem:[%s14465_s5 + $0xc4] ss:$16 sps:$4 sm:$0xff]  }
 0x5bf   :  { %2667 = vmatprep.subr.bf16.mxu1 %v9987_v63  ;;  %v10005_v63 = vld [vmem:[%s14465_s5 + $0xcc] ss:$16 sps:$4 sm:$0xff]   ;;  %3206 = vmatprep.subr.bf16.mxu0 %v10002_v21  ;;  %v10062_v21 = vld [vmem:[%s14465_s5 + $0x184] ss:$16 sps:$4 sm:$0xff]  }
 0x5c2   :  { %2668 = vmatpush1.bf16.msra.mxu1 %v9985_v22  ;;  %v10000_v22 = vld [vmem:[%s14465_s5 + $0xc0] ss:$16 sps:$4 sm:$0xff]  }
 0x5c3   :  { %2669 = vmatprep.subr.bf16.mxu1 %v9990_v23  ;;  %v10003_v23 = vld [vmem:[%s14465_s5 + $0xc8] ss:$16 sps:$4 sm:$0xff]   ;;  %3207 = vmatpush1.bf16.msra.mxu0 %v10000_v22  ;;  %v10060_v22 = vld [vmem:[%s14465_s5 + $0x180] ss:$16 sps:$4 sm:$0xff]  }
 0x5c6   :  { %2670 = vmatpush1.bf16.msra.mxu1 %v9988_v26  ;;  %v10008_v26 = vld [vmem:[%s14465_s5 + $0xa4] ss:$16 sps:$4 sm:$0xff]  }
 0x5c7   :  { %2671 = vmatprep.subr.bf16.mxu1 %v9993_v24  ;;  %v10011_v24 = vld [vmem:[%s14465_s5 + $0xac] ss:$16 sps:$4 sm:$0xff]   ;;  %3208 = vmatprep.subr.bf16.mxu0 %v10008_v26  ;;  %v10068_v26 = vld [vmem:[%s14465_s5 + $0x164] ss:$16 sps:$4 sm:$0xff]  }
 0x5ca   :  { %2672 = vmatpush1.bf16.msra.mxu1 %v9991_v25  ;;  %v10006_v25 = vld [vmem:[%s14465_s5 + $0xa0] ss:$16 sps:$4 sm:$0xff]  }
 0x5cb   :  { %3245 = vmatprep.subr.bf16.mxu1 %v9999_v58  ;;  %3209 = vmatpush1.bf16.msra.mxu0 %v10006_v25  ;;  %v10057_v58 = vld [vmem:[%s14465_s5 + $0x1a8] ss:$16 sps:$4 sm:$0xff]   ;;  %v10066_v25 = vld [vmem:[%s14465_s5 + $0x160] ss:$16 sps:$4 sm:$0xff]  }
 0x5cd   :  { %2690 = vmatmul.mubr.bf16.vlgmr.msra.gmra.mxu1 %v2286_v8 }
 0x5ce   :  { %3246 = vmatpush1.bf16.msra.mxu1 %v9997_v62  ;;  %v10054_v62 = vld [vmem:[%s14465_s5 + $0x1a0] ss:$16 sps:$4 sm:$0xff]  }
 0x5cf   :  { %3247 = vmatprep.subr.bf16.mxu1 %v10005_v63  ;;  %v10065_v63 = vld [vmem:[%s14465_s5 + $0x18c] ss:$16 sps:$4 sm:$0xff]  }
 0x5d2   :  { %3248 = vmatpush1.bf16.msra.mxu1 %v10003_v23  ;;  %v10063_v23 = vld [vmem:[%s14465_s5 + $0x188] ss:$16 sps:$4 sm:$0xff]  }
 0x5d3   :  { %3249 = vmatprep.subr.bf16.mxu1 %v10011_v24  ;;  %v10071_v24 = vld [vmem:[%s14465_s5 + $0x16c] ss:$16 sps:$4 sm:$0xff]  }
 0x66d   :  { %v2609_v27 = vpop.f32.mrf.mxu1  ;;  %v11949_v28 = vpop.f32.mrf.mxu0 }
 0x66e   :  { %v2698_v51 = vadd.f32 %v2609_v27, %v11254_v10  ;;  %v10009_v27 = vld [vmem:[%s14465_s5 + $0xa8] ss:$16 sps:$4 sm:$0xff]  }
 0x66f   :  { %v2611_v29 = vpop.f32.mrf.mxu1  ;;  %v11951_v49 = vpop.f32.mrf.mxu0  ;;  %3250 = vmatpush1.bf16.msra.mxu1 %v10009_v27  ;;  %v10069_v27 = vld [vmem:[%s14465_s5 + $0x168] ss:$16 sps:$4 sm:$0xff]  }
 0x670   :  { %v2699_v30 = vadd.f32 %v2611_v29, %v11258_v11  ;;  %v10014_v29 = vld [vmem:[%s14465_s5 + $0x84] ss:$16 sps:$4 sm:$0xff]  }
 0x671   :  { %v2613_v31 = vpop.f32.mrf.mxu1  ;;  %v2654_v32 = vpop.f32.mrf.mxu0  ;;  %3210 = vmatprep.subr.bf16.mxu0 %v10014_v29  ;;  %v10074_v29 = vld [vmem:[%s14465_s5 + $0x144] ss:$16 sps:$4 sm:$0xff]  }
 0x672   :  { %v2702_v33 = vcombine.low %v2698_v51, %v2699_v30  ;;  %v2703_v0 = vcombine.high %v2698_v51, %v2699_v30  ;;  %v2784_v36 = vmax.f32 %v2698_v51, %v2699_v30  ;;  %v10015_v31 = vld [vmem:[%s14465_s5 + $0x88] ss:$16 sps:$4 sm:$0xff]   ;;  %v10020_v32 = vld [vmem:[%s14465_s5 + $0x64] ss:$16 sps:$4 sm:$0xff]  }
 0x673   :  { %v2614_v13 = vpop.f32.mrf.mxu1  ;;  %v2655_v37 = vpop.f32.mrf.mxu0 }
 0x674   :  { %v2710_v50 = vrot.slane %v2702_v33, %v11265_v16  ;;  %v2717_v60 = vrot.slane %v2703_v0, %v11265_v16  ;;  %2785 = vmax.xlane.f32.xlu1 %v2784_v36  ;;  %v10023_v33 = vld [vmem:[%s14465_s5 + $0x6c] ss:$16 sps:$4 sm:$0xff]   ;;  %v10018_v0 = vld [vmem:[%s14465_s5 + $0x60] ss:$16 sps:$4 sm:$0xff]   ;;  %v10021_v36 = vld [vmem:[%s14465_s5 + $0x68] ss:$16 sps:$4 sm:$0xff]  }
 0x675   :  { %v10026_v13 = vld [vmem:[%s14465_s5 + $0x44] ss:$16 sps:$4 sm:$0xff]   ;;  %v10029_v37 = vld [vmem:[%s14465_s5 + $0x4c] ss:$16 sps:$4 sm:$0xff]  }
 0x676   :  { %v2718_v15 = vcombine.high %v2710_v50, %v2710_v50  ;;  %v2719_v7 = vcombine.high %v2717_v60, %v2717_v60  ;;  %v2726_v38 = vrot.slane %v2710_v50, %v11265_v16  ;;  %v2733_v39 = vrot.slane %v2717_v60, %v11265_v16  ;;  %v10024_v50 = vld [vmem:[%s14465_s5 + $0x40] ss:$16 sps:$4 sm:$0xff]   ;;  %v10027_v60 = vld [vmem:[%s14465_s5 + $0x48] ss:$16 sps:$4 sm:$0xff]  }
 0x678   :  { %v2740_v42 = vrot.slane %v2718_v15, %v11265_v16  ;;  %v2747_v40 = vrot.slane %v2719_v7, %v11265_v16  ;;  %v2748_v43 = vcombine.high %v2726_v38, %v2726_v38  ;;  %v2749_v55 = vcombine.high %v2733_v39, %v2733_v39  ;;  %8991 = vst.msk [vmem:[%s14464_s6 + $0x1] ss:$8 sm:$0x3] %vm11272_vm0, %v2726_v38  ;;  %v10032_v15 = vld [vmem:[%s14465_s5 + $0x24] ss:$16 sps:$4 sm:$0xff]  }
 0x679   :  { %8995 = vst.msk [vmem:[%s14464_s6 + $0x41] ss:$8 sm:$0x3] %vm11272_vm0, %v2733_v39  ;;  %v10035_v7 = vld [vmem:[%s14465_s5 + $0x2c] ss:$16 sps:$4 sm:$0xff]  }
 0x67a   :  { %v2750_v46 = vcombine.high %v2740_v42, %v2740_v42  ;;  %v2751_v47 = vcombine.high %v2747_v40, %v2747_v40  ;;  %8992 = vst.msk [vmem:[%s14464_s6 + $0x11] ss:$8 sm:$0x3] %vm11272_vm0, %v2740_v42  ;;  %8993 = vst.msk [vmem:[%s14464_s6 + $0x21] ss:$8 sm:$0x3] %vm11272_vm0, %v2748_v43 }
 0x67b   :  { %8996 = vst.msk [vmem:[%s14464_s6 + $0x51] ss:$8 sm:$0x3] %vm11272_vm0, %v2747_v40  ;;  %8997 = vst.msk [vmem:[%s14464_s6 + $0x61] ss:$8 sm:$0x3] %vm11272_vm0, %v2749_v55 }
 0x67c   :  { %8994 = vst.msk [vmem:[%s14464_s6 + $0x31] ss:$8 sm:$0x3] %vm11272_vm0, %v2750_v46  ;;  %8998 = vst.msk [vmem:[%s14464_s6 + $0x71] ss:$8 sm:$0x3] %vm11272_vm0, %v2751_v47 }
 0x67d   :  { %v10030_v38 = vld [vmem:[%s14465_s5 + $0x20] ss:$16 sps:$4 sm:$0xff]   ;;  %v10033_v39 = vld [vmem:[%s14465_s5 + $0x28] ss:$16 sps:$4 sm:$0xff]   ;;  %v10038_v42 = vld [vmem:[%s14465_s5 + $0x4] ss:$16 sps:$4 sm:$0xff]  }
 0x67e   :  { %v10041_v40 = vld [vmem:[%s14465_s5 + $0xc] ss:$16 sps:$4 sm:$0xff]   ;;  %v10036_v43 = vld [vmem:[%s14465_s5] ss:$16 sps:$4 sm:$0xff]   ;;  %v10039_v55 = vld [vmem:[%s14465_s5 + $0x8] ss:$16 sps:$4 sm:$0xff]  }
 0x67f   :  { %v10044_v46 = vld [vmem:[%s14465_s5 + $0x1e4] ss:$16 sps:$4 sm:$0xff]   ;;  %v10047_v47 = vld [vmem:[%s14465_s5 + $0x1ec] ss:$16 sps:$4 sm:$0xff]  }
 0x68d   :  { %v12001_v48 = vpop.f32.mrf.mxu1 }
 0x68f   :  { %v12003_v52 = vpop.f32.mrf.mxu1 }
 0x691   :  { %v2695_v53 = vpop.f32.mrf.mxu1 }
 0x692   :  { %v10042_v53 = vld [vmem:[%s14465_s5 + $0x1e0] ss:$16 sps:$4 sm:$0xff]  }
 0x693   :  { %v2696_v4 = vpop.f32.mrf.mxu1 }
 0x694   :  { %v10045_v4 = vld [vmem:[%s14465_s5 + $0x1e8] ss:$16 sps:$4 sm:$0xff]  }
 0x6fd   :  { %v2786_v5 = vpop.xlane.xlu1 %2785 }
 0x6fe   :  { %vm2787_vm9 = vcmp.eq.f32.partialorder %v2698_v51, %v2786_v5  ;;  %vm2788_vm10 = vcmp.eq.f32.partialorder %v2699_v30, %v2786_v5  ;;  %v10017_v51 = vld [vmem:[%s14465_s5 + $0x8c] ss:$16 sps:$4 sm:$0xff]   ;;  %v10012_v30 = vld [vmem:[%s14465_s5 + $0x80] ss:$16 sps:$4 sm:$0xff]   ;;  %v10050_v5 = vld [vmem:[%s14465_s5 + $0x1c4] ss:$16 sps:$4 sm:$0xff]  }
 0x6ff   :  { %v2789_v6 = vsel %vm2787_vm9, %v11325_v44, 256  ;;  %v2790_v8 = vsel %vm2788_vm10, %v11328_v45, 256  ;;  %3251 = vmatprep.subr.bf16.mxu1 %v10017_v51  ;;  %3211 = vmatpush1.bf16.msra.mxu0 %v10012_v30  ;;  %v10077_v51 = vld [vmem:[%s14465_s5 + $0x14c] ss:$16 sps:$4 sm:$0xff]   ;;  %v10072_v30 = vld [vmem:[%s14465_s5 + $0x140] ss:$16 sps:$4 sm:$0xff]  }
 0x700   :  { %vm2791_vm11 = vcmp.lt.s32.totalorder %v2789_v6, %v2790_v8  ;;  %3252 = vmatpush1.bf16.msra.mxu1 %v10015_v31  ;;  %3212 = vmatprep.subr.bf16.mxu0 %v10020_v32  ;;  %v10075_v31 = vld [vmem:[%s14465_s5 + $0x148] ss:$16 sps:$4 sm:$0xff]   ;;  %v10080_v32 = vld [vmem:[%s14465_s5 + $0x124] ss:$16 sps:$4 sm:$0xff]  }
 0x701   :  { %v12007_v9 = vsel %vm2791_vm11, %v2789_v6, %v2790_v8  ;;  %3253 = vmatprep.subr.bf16.mxu1 %v10023_v33  ;;  %v10053_v6 = vld [vmem:[%s14465_s5 + $0x1cc] ss:$16 sps:$4 sm:$0xff]   ;;  %v10048_v8 = vld [vmem:[%s14465_s5 + $0x1c0] ss:$16 sps:$4 sm:$0xff]  }
 0x702   :  { %v2794_v35 = vshra.s32 %v12007_v9, 16  ;;  %v10083_v33 = vld [vmem:[%s14465_s5 + $0x12c] ss:$16 sps:$4 sm:$0xff]  }
 0x703   :  { %3213 = vmatpush1.bf16.msra.mxu0 %v10018_v0  ;;  %v10078_v0 = vld [vmem:[%s14465_s5 + $0x120] ss:$16 sps:$4 sm:$0xff]  }
 0x704   :  { %v12010_v12 = vcvt.s32.f32 %v2794_v35  ;;  %3254 = vmatpush1.bf16.msra.mxu1 %v10021_v36  ;;  %3214 = vmatprep.subr.bf16.mxu0 %v10026_v13  ;;  %v10051_v35 = vld [vmem:[%s14465_s5 + $0x1c8] ss:$16 sps:$4 sm:$0xff]   ;;  %v2793_v13 = vand.u32 65535, %v12007_v9 }
 0x705   :  { %3255 = vmatprep.subr.bf16.mxu1 %v10029_v37  ;;  %v10081_v36 = vld [vmem:[%s14465_s5 + $0x128] ss:$16 sps:$4 sm:$0xff]  }
 0x706   :  { %2797 = vmin.xlane.f32.xlu0 %v12010_v12  ;;  %v10087_v9 = vld [vmem:[%s14465_s5 + $0x108] ss:$16 sps:$4 sm:$0xff]  }
 0x707   :  { %3215 = vmatpush1.bf16.msra.mxu0 %v10024_v50  ;;  %v2795_v50 = vcvt.s32.f32 %v2793_v13 }
 0x708   :  { %3256 = vmatpush1.bf16.msra.mxu1 %v10027_v60  ;;  %3216 = vmatprep.subr.bf16.mxu0 %v10032_v15  ;;  %v10086_v15 = vld [vmem:[%s14465_s5 + $0x104] ss:$16 sps:$4 sm:$0xff]  }
 0x709   :  { %3257 = vmatprep.subr.bf16.mxu1 %v10035_v7  ;;  %v10089_v7 = vld [vmem:[%s14465_s5 + $0x10c] ss:$16 sps:$4 sm:$0xff]  }
 0x70b   :  { %3217 = vmatpush1.bf16.msra.mxu0 %v10030_v38  ;;  %v10084_v38 = vld [vmem:[%s14465_s5 + $0x100] ss:$16 sps:$4 sm:$0xff]  }
 0x70c   :  { %3258 = vmatpush1.bf16.msra.mxu1 %v10033_v39  ;;  %3218 = vmatprep.subr.bf16.mxu0 %v10038_v42 }
 0x70d   :  { %3259 = vmatprep.subr.bf16.mxu1 %v10041_v40 }
 0x70f   :  { %3219 = vmatpush1.bf16.msra.mxu0 %v10036_v43 }
 0x710   :  { %3260 = vmatpush1.bf16.msra.mxu1 %v10039_v55  ;;  %3220 = vmatprep.subr.bf16.mxu0 %v10044_v46  ;;  %v3371_v55 = vld [vmem:[%s14459_s1 + $0x1c0] sm:$0xff] }
 0x711   :  { %3261 = vmatprep.subr.bf16.mxu1 %v10047_v47  ;;  %v3375_v46 = vld [vmem:[%s14459_s1 + $0x1e0] sm:$0xff]  ;;  %v3372_v47 = vld [vmem:[%s14459_s1 + $0x1c8] sm:$0xff] }
 0x713   :  { %3221 = vmatpush2.bf16.msra.mxu0 %v10042_v53  ;;  %v9137_v53 = vcombine.high %v3371_v55, %v3375_v46 }
 0x714   :  { %3262 = vmatpush2.bf16.msra.mxu1 %v10045_v4  ;;  %3222 = vmatprep.subr.bf16.mxu0 %v10050_v5  ;;  %v3376_v4 = vld [vmem:[%s14459_s1 + $0x1e8] sm:$0xff]  ;;  %v9136_v5 = vcombine.low %v3371_v55, %v3375_v46 }
 0x715   :  { %3263 = vmatprep.subr.bf16.mxu1 %v10053_v6  ;;  %v9138_v6 = vcombine.low %v3372_v47, %v3376_v4  ;;  %v3332_v46 = vld [vmem:[%s14459_s1 + $0x88] sm:$0xff] }
 0x717   :  { %3223 = vmatpush2.bf16.msra.mxu0 %v10048_v8  ;;  %v9139_v8 = vcombine.high %v3372_v47, %v3376_v4  ;;  %v3336_v47 = vld [vmem:[%s14459_s1 + $0xa8] sm:$0xff]  ;;  %v3323_v4 = vld [vmem:[%s14459_s1 + $0x40] sm:$0xff] }
 0x718   :  { %3264 = vmatpush2.bf16.msra.mxu1 %v10051_v35  ;;  %3224 = vmatprep.subr.bf16.mxu0 %v10056_v14  ;;  %v3363_v35 = vld [vmem:[%s14459_s1 + $0x180] sm:$0xff] }
 0x719   :  { %3265 = vmatprep.subr.bf16.mxu1 %v10059_v17  ;;  %v3367_v14 = vld [vmem:[%s14459_s1 + $0x1a0] sm:$0xff]  ;;  %v3364_v17 = vld [vmem:[%s14459_s1 + $0x188] sm:$0xff] }
 0x71b   :  { %3225 = vmatpush2.bf16.msra.mxu0 %v10054_v62  ;;  %v9129_v62 = vcombine.high %v3363_v35, %v3367_v14 }
 0x71c   :  { %3266 = vmatpush2.bf16.msra.mxu1 %v10057_v58  ;;  %3226 = vmatprep.subr.bf16.mxu0 %v10062_v21  ;;  %v3368_v58 = vld [vmem:[%s14459_s1 + $0x1a8] sm:$0xff]  ;;  %v9128_v21 = vcombine.low %v3363_v35, %v3367_v14  ;;  %v12302_v14 = vld [vmem:[%s14459_s1 + $0x1d0] sm:$0xff] }
 0x71d   :  { %3267 = vmatprep.subr.bf16.mxu1 %v10065_v63  ;;  %v9130_v63 = vcombine.low %v3364_v17, %v3368_v58 }
 0x71f   :  { %3227 = vmatpush2.bf16.msra.mxu0 %v10060_v22  ;;  %v9131_v22 = vcombine.high %v3364_v17, %v3368_v58  ;;  %v12307_v17 = vld [vmem:[%s14459_s1 + $0x1f0] sm:$0xff] }
 0x720   :  { %3268 = vmatpush2.bf16.msra.mxu1 %v10063_v23  ;;  %3228 = vmatprep.subr.bf16.mxu0 %v10068_v26  ;;  %v3355_v23 = vld [vmem:[%s14459_s1 + $0x140] sm:$0xff] }
 0x721   :  { %3269 = vmatprep.subr.bf16.mxu1 %v10071_v24  ;;  %v3359_v26 = vld [vmem:[%s14459_s1 + $0x160] sm:$0xff]  ;;  %v3356_v24 = vld [vmem:[%s14459_s1 + $0x148] sm:$0xff] }
 0x723   :  { %3229 = vmatpush2.bf16.msra.mxu0 %v10066_v25  ;;  %v9121_v25 = vcombine.high %v3355_v23, %v3359_v26 }
 0x724   :  { %3270 = vmatpush2.bf16.msra.mxu1 %v10069_v27  ;;  %3230 = vmatprep.subr.bf16.mxu0 %v10074_v29  ;;  %v3360_v27 = vld [vmem:[%s14459_s1 + $0x168] sm:$0xff]  ;;  %v9120_v29 = vcombine.low %v3355_v23, %v3359_v26  ;;  %v3315_v26 = vld [vmem:[%s14459_s1] sm:$0xff] }
 0x725   :  { %3271 = vmatprep.subr.bf16.mxu1 %v10077_v51  ;;  %v9122_v51 = vcombine.low %v3356_v24, %v3360_v27 }
 0x727   :  { %3231 = vmatpush2.bf16.msra.mxu0 %v10072_v30  ;;  %v9123_v30 = vcombine.high %v3356_v24, %v3360_v27  ;;  %v3319_v24 = vld [vmem:[%s14459_s1 + $0x20] sm:$0xff]  ;;  %v3316_v27 = vld [vmem:[%s14459_s1 + $0x8] sm:$0xff] }
 0x728   :  { %3272 = vmatpush2.bf16.msra.mxu1 %v10075_v31  ;;  %3232 = vmatprep.subr.bf16.mxu0 %v10080_v32  ;;  %v3347_v31 = vld [vmem:[%s14459_s1 + $0x100] sm:$0xff] }
 0x729   :  { %3273 = vmatprep.subr.bf16.mxu1 %v10083_v33  ;;  %v3351_v32 = vld [vmem:[%s14459_s1 + $0x120] sm:$0xff]  ;;  %v3348_v33 = vld [vmem:[%s14459_s1 + $0x108] sm:$0xff] }
 0x72a   :  { %v9112_v13 = vcombine.low %v3347_v31, %v3351_v32 }
 0x72b   :  { %3233 = vmatpush2.bf16.msra.mxu0 %v10078_v0  ;;  %v9113_v0 = vcombine.high %v3347_v31, %v3351_v32  ;;  %v9081_v31 = vcombine.high %v3315_v26, %v3319_v24 }
 0x72c   :  { %3274 = vmatpush2.bf16.msra.mxu1 %v10081_v36  ;;  %3234 = vmatprep.subr.bf16.mxu0 %v10086_v15  ;;  %v3352_v36 = vld [vmem:[%s14459_s1 + $0x128] sm:$0xff]  ;;  %v3343_v15 = vld [vmem:[%s14459_s1 + $0xe0] sm:$0xff] }
 0x72d   :  { %3275 = vmatprep.subr.bf16.mxu1 %v10089_v7  ;;  %v3340_v7 = vld [vmem:[%s14459_s1 + $0xc8] sm:$0xff] }
 0x72f   :  { %3235 = vmatpush2.bf16.msra.mxu0 %v10084_v38 }
 0x730   :  { %3276 = vmatpush2.bf16.msra.mxu1 %v10087_v9  ;;  %3699 = vmatprep.subr.bf16.mxu0 %v9137_v53  ;;  %v9099_v53 = vcombine.high %v3332_v46, %v3336_v47 }
 0x731   :  { %3740 = vmatprep.subr.bf16.mxu1 %v9139_v8  ;;  %v3328_v8 = vld [vmem:[%s14459_s1 + $0x68] sm:$0xff] }
 0x78f   :  { %v2798_v37 = vpop.xlane.xlu0 %2797 }
 0x790   :  { %vm2799_vm12 = vcmp.eq.f32.partialorder %v12010_v12, %v2798_v37  ;;  %v2804_v12 = vcvt.f32.s32 %v2798_v37  ;;  %v9114_v37 = vcombine.low %v3348_v33, %v3352_v36 }
 0x791   :  { %v2800_v60 = vsel %vm2799_vm12, %v2795_v50, inf  ;;  %v9115_v50 = vcombine.high %v3348_v33, %v3352_v36  ;;  %v9080_v33 = vcombine.low %v3315_v26, %v3319_v24  ;;  %v9141_v36 = vcombine.high %v12302_v14, %v12307_v17 }
 0x792   :  { %2801 = vmin.xlane.f32.xlu1 %v2800_v60  ;;  %v2805_v42 = vshll.u32 %v2804_v12, 16  ;;  %v3339_v60 = vld [vmem:[%s14459_s1 + $0xc0] sm:$0xff]  ;;  %v3344_v12 = vld [vmem:[%s14459_s1 + $0xe8] sm:$0xff] }
 0x793   :  { %v9104_v38 = vcombine.low %v3339_v60, %v3343_v15  ;;  %v9105_v9 = vcombine.high %v3339_v60, %v3343_v15  ;;  %v9002_v15 = vld [vmem:[%s14460_s0 + $0x48] sm:$0xff] }
 0x81b   :  { %v2802_v39 = vpop.xlane.xlu1 %2801 }
 0x81c   :  { %v2803_v40 = vcvt.f32.s32 %v2802_v39  ;;  %v3331_v39 = vld [vmem:[%s14459_s1 + $0x80] sm:$0xff] }
 0x81e   :  { %v2806_v43 = vadd.s32 %v2805_v42, %v2803_v40  ;;  %v3335_v42 = vld [vmem:[%s14459_s1 + $0xa0] sm:$0xff]  ;;  %v9106_v40 = vcombine.low %v3340_v7, %v3344_v12 }
 0x81f   :  { %v9097_v55 = vcombine.high %v3331_v39, %v3335_v42  ;;  %v9096_v35 = vcombine.low %v3331_v39, %v3335_v42 }
 0x820   :  { %vm2807_vm13 = vcmp.eq.s32.totalorder %v11325_v44, %v2806_v43  ;;  %vm2808_vm14 = vcmp.eq.s32.totalorder %v11328_v45, %v2806_v43  ;;  %v9107_v43 = vcombine.high %v3340_v7, %v3344_v12 }
 0x821   :  { %vm9071_vm15 = vmpackc.low %vm2807_vm13, %vm2807_vm13 }
 0x822   :  { %vm9069_vm1 = vmpackc.low %vm2808_vm14, %vm2808_vm14 }
 0x823   :  { %9070 = vmatprep.mubr.msk.bf16.mxu0 %vm9069_vm1, %v10812_v34  ;;  %9074 = vmatprep.mubr.msk.bf16.mxu1 %vm9069_vm1, %v10812_v34 }
 0x824   :  { %9072 = vmatmul.mubr.msk.bf16.vlgmr.msra.gmra.mxu0 %vm9071_vm15, %v10812_v34  ;;  %9076 = vmatmul.mubr.msk.bf16.vlgmr.msra.gmra.mxu1 %vm9071_vm15, %v10812_v34 }
 0x825   :  { %3731 = vmatprep.mubr.bf16.mxu0 %v10810_v3  ;;  %3772 = vmatprep.mubr.bf16.mxu1 %v10810_v3 }
 0x826   :  { %3700 = vmatpush1.bf16.msra.mxu0 %v9136_v5  ;;  %3741 = vmatpush1.bf16.msra.mxu1 %v9138_v6  ;;  %v3327_v5 = vld [vmem:[%s14459_s1 + $0x60] sm:$0xff]  ;;  %v3324_v6 = vld [vmem:[%s14459_s1 + $0x48] sm:$0xff] }
 0x827   :  { %3701 = vmatprep.subr.bf16.mxu0 %v9129_v62  ;;  %3742 = vmatprep.subr.bf16.mxu1 %v9131_v22  ;;  %v9098_v62 = vcombine.low %v3332_v46, %v3336_v47  ;;  %v9089_v58 = vcombine.high %v3323_v4, %v3327_v5  ;;  %v12319_v22 = vld [vmem:[%s14459_s1 + $0x1f8] sm:$0xff]  ;;  %v9091_v23 = vcombine.high %v3324_v6, %v3328_v8 }
 0x82a   :  { %3702 = vmatpush1.bf16.msra.mxu0 %v9128_v21  ;;  %3743 = vmatpush1.bf16.msra.mxu1 %v9130_v63  ;;  %v9140_v21 = vcombine.low %v12302_v14, %v12307_v17  ;;  %v12314_v63 = vld [vmem:[%s14459_s1 + $0x1d8] sm:$0xff] }
 0x82b   :  { %3703 = vmatprep.subr.bf16.mxu0 %v9121_v25  ;;  %3744 = vmatprep.subr.bf16.mxu1 %v9123_v30  ;;  %v9142_v25 = vcombine.low %v12314_v63, %v12319_v22  ;;  %v9090_v30 = vcombine.low %v3324_v6, %v3328_v8  ;;  %v3350_v14 = vld [vmem:[%s14459_s1 + $0x118] sm:$0xff] }
 0x82c   :  { %v3354_v17 = vld [vmem:[%s14459_s1 + $0x138] sm:$0xff] }
 0x82e   :  { %3704 = vmatpush1.bf16.msra.mxu0 %v9120_v29  ;;  %3745 = vmatpush1.bf16.msra.mxu1 %v9122_v51  ;;  %v3320_v29 = vld [vmem:[%s14459_s1 + $0x28] sm:$0xff]  ;;  %v9088_v51 = vcombine.low %v3323_v4, %v3327_v5  ;;  %v9004_v4 = vld [vmem:[%s14460_s0 + $0x58] sm:$0xff] }
 0x82f   :  { %3705 = vmatprep.subr.bf16.mxu0 %v9113_v0  ;;  %3746 = vmatprep.subr.bf16.mxu1 %v9115_v50  ;;  %v9083_v32 = vcombine.high %v3316_v27, %v3320_v29  ;;  %v9082_v0 = vcombine.low %v3316_v27, %v3320_v29 }
 0x832   :  { %3706 = vmatpush1.bf16.msra.mxu0 %v9112_v13  ;;  %3747 = vmatpush1.bf16.msra.mxu1 %v9114_v37  ;;  %v9143_v13 = vcombine.high %v12314_v63, %v12319_v22  ;;  %v9001_v37 = vld [vmem:[%s14460_s0 + $0x40] sm:$0xff] }
 0x833   :  { %3707 = vmatprep.subr.bf16.mxu0 %v9105_v9  ;;  %3748 = vmatprep.subr.bf16.mxu1 %v9107_v43 }
 0x836   :  { %3708 = vmatpush1.bf16.msra.mxu0 %v9104_v38  ;;  %3749 = vmatpush1.bf16.msra.mxu1 %v9106_v40 }
 0x837   :  { %3709 = vmatprep.subr.bf16.mxu0 %v9097_v55  ;;  %3750 = vmatprep.subr.bf16.mxu1 %v9099_v53 }
 0x83a   :  { %3710 = vmatpush1.bf16.msra.mxu0 %v9096_v35  ;;  %3751 = vmatpush1.bf16.msra.mxu1 %v9098_v62 }
 0x83b   :  { %3711 = vmatprep.subr.bf16.mxu0 %v9089_v58  ;;  %3752 = vmatprep.subr.bf16.mxu1 %v9091_v23 }
 0x83e   :  { %3712 = vmatpush1.bf16.msra.mxu0 %v9088_v51  ;;  %3753 = vmatpush1.bf16.msra.mxu1 %v9090_v30 }
 0x83f   :  { %3713 = vmatprep.subr.bf16.mxu0 %v9081_v31  ;;  %3754 = vmatprep.subr.bf16.mxu1 %v9083_v32 }
 0x842   :  { %3714 = vmatpush1.bf16.msra.mxu0 %v9080_v33  ;;  %3755 = vmatpush1.bf16.msra.mxu1 %v9082_v0  ;;  %v3365_v33 = vld [vmem:[%s14459_s1 + $0x190] sm:$0xff] }
 0x843   :  { %3781 = vmatprep.subr.bf16.mxu0 %v9141_v36  ;;  %3822 = vmatprep.subr.bf16.mxu1 %v9143_v13  ;;  %v3369_v36 = vld [vmem:[%s14459_s1 + $0x1b0] sm:$0xff]  ;;  %v3366_v13 = vld [vmem:[%s14459_s1 + $0x198] sm:$0xff] }
 0x8e4   :  { %v3238_v50 = vpop.f32.mrf.mxu0  ;;  %v3279_v60 = vpop.f32.mrf.mxu1 }
 0x8e5   :  { %v3239_v7 = vadd.f32 %v9001_v37, %v3238_v50 }
 0x8e6   :  { %v3240_v38 = vpop.f32.mrf.mxu0  ;;  %v3281_v9 = vpop.f32.mrf.mxu1 }
 0x8e7   :  { %v3286_v12 = vadd.f32 %v3239_v7, %v11891_v54  ;;  %v3241_v39 = vadd.f32 %v9002_v15, %v3240_v38  ;;  %v3282_v5 = vadd.f32 %v9004_v4, %v3281_v9  ;;  %v9003_v54 = vld [vmem:[%s14460_s0 + $0x50] sm:$0xff]  ;;  %v3358_v9 = vld [vmem:[%s14459_s1 + $0x158] sm:$0xff] }
 0x8e8   :  { %v3242_v42 = vpop.f32.mrf.mxu0  ;;  %v3283_v40 = vpop.f32.mrf.mxu1  ;;  %v3280_v8 = vadd.f32 %v9003_v54, %v3279_v60  ;;  %v9133_v60 = vcombine.high %v3365_v33, %v3369_v36  ;;  %v3357_v7 = vld [vmem:[%s14459_s1 + $0x150] sm:$0xff]  ;;  %v3342_v4 = vld [vmem:[%s14459_s1 + $0xd8] sm:$0xff] }
 0x8e9   :  { %v9077_v43 = vmul.f32 -1.442695, %v3286_v12  ;;  %v3287_v55 = vadd.f32 %v3241_v39, %v11895_v59  ;;  %v3289_v6 = vadd.f32 %v3282_v5, %v11897_v41  ;;  %v3361_v38 = vld [vmem:[%s14459_s1 + $0x170] sm:$0xff]  ;;  %v3362_v12 = vld [vmem:[%s14459_s1 + $0x178] sm:$0xff]  ;;  %v9132_v39 = vcombine.low %v3365_v33, %v3369_v36 }
 0x8ea   :  { %v3243_v46 = vpop.f32.mrf.mxu0  ;;  %v3284_v47 = vpop.f32.mrf.mxu1  ;;  %v3288_v59 = vadd.f32 %v3280_v8, %v11893_v57  ;;  %v9125_v40 = vcombine.high %v3357_v7, %v3361_v38  ;;  %v9126_v63 = vcombine.low %v3358_v9, %v3362_v12  ;;  %v3346_v5 = vld [vmem:[%s14459_s1 + $0xf8] sm:$0xff] }
 0x8eb   :  { %10682 = vpow2.f32 %v9077_v43  ;;  %v9078_v53 = vmul.f32 -1.442695, %v3287_v55  ;;  %v9079_v35 = vmul.f32 -1.442695, %v3289_v6  ;;  %v9127_v43 = vcombine.high %v3358_v9, %v3362_v12  ;;  %v3349_v55 = vld [vmem:[%s14459_s1 + $0x110] sm:$0xff] }
 0x8ec   :  { %v3353_v46 = vld [vmem:[%s14459_s1 + $0x130] sm:$0xff]  ;;  %v9118_v6 = vcombine.low %v3350_v14, %v3354_v17 }
 0x8ed   :  { %10684 = vpow2.f32 %v9078_v53  ;;  %v9117_v22 = vcombine.high %v3349_v55, %v3353_v46  ;;  %v3341_v47 = vld [vmem:[%s14459_s1 + $0xd0] sm:$0xff]  ;;  %v9116_v54 = vcombine.low %v3349_v55, %v3353_v46  ;;  %v10098_v55 = vld [vmem:[%s14461_s2 + $0x124] ss:$24 sps:$4 sm:$0xff]   ;;  %v10096_v46 = vld [vmem:[%s14461_s2 + $0x120] ss:$24 sps:$4 sm:$0xff]  }
 0x8ee   :  { %10686 = vpow2.f32 %v9079_v35  ;;  %v3345_v53 = vld [vmem:[%s14459_s1 + $0xf0] sm:$0xff]  ;;  %v9111_v35 = vcombine.high %v3342_v4, %v3346_v5 }
 0x8ef   :  { %v9109_v8 = vcombine.high %v3341_v47, %v3345_v53 }
 0x8f8   :  { %v10683_v62 = vpop.eup %10682 }
 0x8f9   :  { %v3293_v58 = vadd.f32 1.0, %v10683_v62  ;;  %v3333_v62 = vld [vmem:[%s14459_s1 + $0x90] sm:$0xff] }
 0x8fa   :  { %v10685_v23 = vpop.eup %10684 }
 0x8fb   :  { %10688 = vrcp.f32 %v3293_v58  ;;  %v3299_v26 = vadd.f32 1.0, %v10685_v23  ;;  %v10687_v24 = vpop.eup %10686  ;;  %v3334_v58 = vld [vmem:[%s14459_s1 + $0x98] sm:$0xff] }
 0x8fc   :  { %10690 = vtanh.f32 %v3288_v59  ;;  %v3306_v30 = vadd.f32 1.0, %v10687_v24  ;;  %v3337_v59 = vld [vmem:[%s14459_s1 + $0xb0] sm:$0xff]  ;;  %v3338_v23 = vld [vmem:[%s14459_s1 + $0xb8] sm:$0xff]  ;;  %v9110_v24 = vcombine.low %v3342_v4, %v3346_v5  ;;  %v10113_v4 = vld [vmem:[%s14461_s2 + $0xcc] ss:$24 sps:$4 sm:$0xff]  }
 0x8fd   :  { %10692 = vrcp.f32 %v3299_v26  ;;  %v9108_v26 = vcombine.low %v3341_v47, %v3345_v53  ;;  %v9102_v33 = vcombine.low %v3334_v58, %v3338_v23  ;;  %v10110_v47 = vld [vmem:[%s14461_s2 + $0xc4] ss:$24 sps:$4 sm:$0xff]   ;;  %v10108_v53 = vld [vmem:[%s14461_s2 + $0xc0] ss:$24 sps:$4 sm:$0xff]  }
 0x8fe   :  { %10694 = vrcp.f32 %v3306_v30  ;;  %v3329_v30 = vld [vmem:[%s14459_s1 + $0x70] sm:$0xff]  ;;  %v10111_v5 = vld [vmem:[%s14461_s2 + $0xc8] ss:$24 sps:$4 sm:$0xff]  }
 0x908   :  { %v10689_v27 = vpop.eup %10688 }
 0x909   :  { %v10691_v29 = vpop.eup %10690 }
 0x90a   :  { %v10693_v51 = vpop.eup %10692  ;;  %v3310_v31 = vmul.f32 %v10691_v29, %v10689_v27  ;;  %v9101_v27 = vcombine.high %v3333_v62, %v3337_v59  ;;  %v9103_v29 = vcombine.high %v3334_v58, %v3338_v23  ;;  %v10120_v58 = vld [vmem:[%s14461_s2 + $0x60] ss:$24 sps:$4 sm:$0xff]  }
 0x90b   :  { %v3309_v41 = vmul.f32 %v10693_v51, %v11681_v20  ;;  %v10695_v57 = vpop.eup %10694  ;;  %v3370_v20 = vld [vmem:[%s14459_s1 + $0x1b8] sm:$0xff]  ;;  %v3325_v51 = vld [vmem:[%s14459_s1 + $0x50] sm:$0xff]  ;;  %v10123_v23 = vld [vmem:[%s14461_s2 + $0x68] ss:$24 sps:$4 sm:$0xff]  }
 0x90c   :  { %v9135_v15 = vcombine.high %v3366_v13, %v3370_v20  ;;  %v9134_v42 = vcombine.low %v3366_v13, %v3370_v20  ;;  %v3317_v13 = vld [vmem:[%s14459_s1 + $0x10] sm:$0xff] }
 0x90d   :  { %v12356_v32 = vadd.f32 %v3310_v31, %v3309_v41  ;;  %v3326_v31 = vld [vmem:[%s14459_s1 + $0x58] sm:$0xff]  ;;  %v3321_v20 = vld [vmem:[%s14459_s1 + $0x30] sm:$0xff] }
 0x90e   :  { %v3330_v41 = vld [vmem:[%s14459_s1 + $0x78] sm:$0xff]  ;;  %v9084_v12 = vcombine.low %v3317_v13, %v3321_v20 }
 0x90f   :  { %10696 = vtanh.f32 %v12356_v32  ;;  %v9095_v36 = vcombine.high %v3326_v31, %v3330_v41 }
 0x91c   :  { %v10697_v0 = vpop.eup %10696 }
 0x91d   :  { %v3313_v37 = vmul.f32 %v10697_v0, %v10695_v57  ;;  %v9100_v57 = vcombine.low %v3333_v62, %v3337_v59  ;;  %v9093_v0 = vcombine.high %v3325_v51, %v3329_v30  ;;  %v10122_v62 = vld [vmem:[%s14461_s2 + $0x64] ss:$24 sps:$4 sm:$0xff]  }
 0x91e   :  { %v10125_v59 = vld [vmem:[%s14461_s2 + $0x6c] ss:$24 sps:$4 sm:$0xff]  }
 0x91f   :  { %v12371_v50 = vpack.c.bf16 %v3313_v37, %v3313_v37  ;;  %v3318_v37 = vld [vmem:[%s14459_s1 + $0x18] sm:$0xff] }
 0x921   :  { %3732 = vmatmul.mubr.bf16.vlgmr.msra.gmra.mxu0 %v12371_v50  ;;  %3773 = vmatmul.mubr.bf16.vlgmr.msra.gmra.mxu1 %v12371_v50 }
 0x922   :  { %3782 = vmatpush1.bf16.msra.mxu0 %v9140_v21  ;;  %3823 = vmatpush1.bf16.msra.mxu1 %v9142_v25  ;;  %v9124_v21 = vcombine.low %v3357_v7, %v3361_v38  ;;  %v9119_v25 = vcombine.high %v3350_v14, %v3354_v17  ;;  %v9094_v7 = vcombine.low %v3326_v31, %v3330_v41  ;;  %v10101_v14 = vld [vmem:[%s14461_s2 + $0x12c] ss:$24 sps:$4 sm:$0xff]   ;;  %v10099_v17 = vld [vmem:[%s14461_s2 + $0x128] ss:$24 sps:$4 sm:$0xff]  }
 0x923   :  { %3783 = vmatprep.subr.bf16.mxu0 %v9133_v60  ;;  %3824 = vmatprep.subr.bf16.mxu1 %v9135_v15  ;;  %v3322_v60 = vld [vmem:[%s14459_s1 + $0x38] sm:$0xff]  ;;  %v9092_v15 = vcombine.low %v3325_v51, %v3329_v30  ;;  %v9085_v38 = vcombine.high %v3317_v13, %v3321_v20  ;;  %v10137_v30 = vld [vmem:[%s14461_s2 + $0xc] ss:$24 sps:$4 sm:$0xff]   ;;  %v10135_v41 = vld [vmem:[%s14461_s2 + $0x8] ss:$24 sps:$4 sm:$0xff]  }
 0x924   :  { %3813 = vmatprep.mubr.bf16.mxu0 %v10810_v3  ;;  %3854 = vmatprep.mubr.bf16.mxu1 %v10810_v3  ;;  %v9087_v9 = vcombine.high %v3318_v37, %v3322_v60  ;;  %v10134_v51 = vld [vmem:[%s14461_s2 + $0x4] ss:$24 sps:$4 sm:$0xff]   ;;  %v10132_v31 = vld [vmem:[%s14461_s2] ss:$24 sps:$4 sm:$0xff]  }
 0x926   :  { %3784 = vmatpush1.bf16.msra.mxu0 %v9132_v39  ;;  %3825 = vmatpush1.bf16.msra.mxu1 %v9134_v42  ;;  %v9086_v39 = vcombine.low %v3318_v37, %v3322_v60  ;;  %v10092_v42 = vld [vmem:[%s14461_s2 + $0x154] ss:$24 sps:$4 sm:$0xff]  }
 0x927   :  { %3785 = vmatprep.subr.bf16.mxu0 %v9125_v40  ;;  %3826 = vmatprep.subr.bf16.mxu1 %v9127_v43  ;;  %v10090_v40 = vld [vmem:[%s14461_s2 + $0x150] ss:$24 sps:$4 sm:$0xff]   ;;  %v10095_v43 = vld [vmem:[%s14461_s2 + $0x15c] ss:$24 sps:$4 sm:$0xff]  }
 0x92a   :  { %3786 = vmatpush1.bf16.msra.mxu0 %v9124_v21  ;;  %3827 = vmatpush1.bf16.msra.mxu1 %v9126_v63  ;;  %v10104_v21 = vld [vmem:[%s14461_s2 + $0xf4] ss:$24 sps:$4 sm:$0xff]   ;;  %v10102_v63 = vld [vmem:[%s14461_s2 + $0xf0] ss:$24 sps:$4 sm:$0xff]  }
 0x92b   :  { %3787 = vmatprep.subr.bf16.mxu0 %v9117_v22  ;;  %3828 = vmatprep.subr.bf16.mxu1 %v9119_v25  ;;  %v10107_v22 = vld [vmem:[%s14461_s2 + $0xfc] ss:$24 sps:$4 sm:$0xff]   ;;  %v10105_v25 = vld [vmem:[%s14461_s2 + $0xf8] ss:$24 sps:$4 sm:$0xff]  }
 0x92e   :  { %3788 = vmatpush1.bf16.msra.mxu0 %v9116_v54  ;;  %3829 = vmatpush1.bf16.msra.mxu1 %v9118_v6  ;;  %v10116_v54 = vld [vmem:[%s14461_s2 + $0x94] ss:$24 sps:$4 sm:$0xff]   ;;  %v10114_v6 = vld [vmem:[%s14461_s2 + $0x90] ss:$24 sps:$4 sm:$0xff]  }
 0x92f   :  { %3789 = vmatprep.subr.bf16.mxu0 %v9109_v8  ;;  %3830 = vmatprep.subr.bf16.mxu1 %v9111_v35  ;;  %v10119_v8 = vld [vmem:[%s14461_s2 + $0x9c] ss:$24 sps:$4 sm:$0xff]   ;;  %v10117_v35 = vld [vmem:[%s14461_s2 + $0x98] ss:$24 sps:$4 sm:$0xff]  }
 0x932   :  { %3790 = vmatpush1.bf16.msra.mxu0 %v9108_v26  ;;  %3831 = vmatpush1.bf16.msra.mxu1 %v9110_v24  ;;  %v10128_v26 = vld [vmem:[%s14461_s2 + $0x34] ss:$24 sps:$4 sm:$0xff]  }
 0x933   :  { %3791 = vmatprep.subr.bf16.mxu0 %v9101_v27  ;;  %3832 = vmatprep.subr.bf16.mxu1 %v9103_v29  ;;  %v10131_v24 = vld [vmem:[%s14461_s2 + $0x3c] ss:$24 sps:$4 sm:$0xff]   ;;  %v10126_v27 = vld [vmem:[%s14461_s2 + $0x30] ss:$24 sps:$4 sm:$0xff]  }
 0x934   :  { %v10129_v29 = vld [vmem:[%s14461_s2 + $0x38] ss:$24 sps:$4 sm:$0xff]  }
 0x936   :  { %3792 = vmatpush1.bf16.msra.mxu0 %v9100_v57  ;;  %3833 = vmatpush1.bf16.msra.mxu1 %v9102_v33  ;;  %v10140_v57 = vld [vmem:[%s14461_s2 + $0x164] ss:$24 sps:$4 sm:$0xff]  }
 0x937   :  { %3793 = vmatprep.subr.bf16.mxu0 %v9093_v0  ;;  %3834 = vmatprep.subr.bf16.mxu1 %v9095_v36 }
 0x93a   :  { %3794 = vmatpush1.bf16.msra.mxu0 %v9092_v15  ;;  %3835 = vmatpush1.bf16.msra.mxu1 %v9094_v7 }
 0x93b   :  { %3795 = vmatprep.subr.bf16.mxu0 %v9085_v38  ;;  %3836 = vmatprep.subr.bf16.mxu1 %v9087_v9 }
 0x93e   :  { %3796 = vmatpush1.bf16.msra.mxu0 %v9084_v12  ;;  %3837 = vmatpush1.bf16.msra.mxu1 %v9086_v39 }
 0x93f   :  { %4184 = vmatprep.subr.bf16.mxu0 %v10092_v42  ;;  %4225 = vmatprep.subr.bf16.mxu1 %v10095_v43 }
 0x941   :  { %3814 = vmatmul.mubr.bf16.vlgmr.msra.gmra.mxu0 %v12371_v50  ;;  %3855 = vmatmul.mubr.bf16.vlgmr.msra.gmra.mxu1 %v12371_v50  ;;  %v10093_v50 = vld [vmem:[%s14461_s2 + $0x158] ss:$24 sps:$4 sm:$0xff]  }
 0x942   :  { %4216 = vmatprep.mubr.bf16.mxu0 %v10810_v3  ;;  %4257 = vmatprep.mubr.bf16.mxu1 %v10810_v3 }
 0x943   :  { %4185 = vmatpush1.bf16.msra.mxu0 %v10090_v40  ;;  %4226 = vmatpush1.bf16.msra.mxu1 %v10093_v50 }
 0x944   :  { %4186 = vmatprep.subr.bf16.mxu0 %v10098_v55  ;;  %4227 = vmatprep.subr.bf16.mxu1 %v10101_v14 }
 0x947   :  { %4187 = vmatpush1.bf16.msra.mxu0 %v10096_v46  ;;  %4228 = vmatpush1.bf16.msra.mxu1 %v10099_v17 }
 0x948   :  { %4188 = vmatprep.subr.bf16.mxu0 %v10104_v21  ;;  %4229 = vmatprep.subr.bf16.mxu1 %v10107_v22 }
 0x94b   :  { %4189 = vmatpush1.bf16.msra.mxu0 %v10102_v63  ;;  %4230 = vmatpush1.bf16.msra.mxu1 %v10105_v25 }
 0x94c   :  { %4190 = vmatprep.subr.bf16.mxu0 %v10110_v47  ;;  %4231 = vmatprep.subr.bf16.mxu1 %v10113_v4 }
 0x94f   :  { %4191 = vmatpush1.bf16.msra.mxu0 %v10108_v53  ;;  %4232 = vmatpush1.bf16.msra.mxu1 %v10111_v5 }
 0x950   :  { %4192 = vmatprep.subr.bf16.mxu0 %v10116_v54  ;;  %4233 = vmatprep.subr.bf16.mxu1 %v10119_v8 }
 0x953   :  { %4193 = vmatpush1.bf16.msra.mxu0 %v10114_v6  ;;  %4234 = vmatpush1.bf16.msra.mxu1 %v10117_v35 }
 0x954   :  { %4194 = vmatprep.subr.bf16.mxu0 %v10122_v62  ;;  %4235 = vmatprep.subr.bf16.mxu1 %v10125_v59 }
 0x957   :  { %4195 = vmatpush1.bf16.msra.mxu0 %v10120_v58  ;;  %4236 = vmatpush1.bf16.msra.mxu1 %v10123_v23 }
 0x958   :  { %4196 = vmatprep.subr.bf16.mxu0 %v10128_v26  ;;  %4237 = vmatprep.subr.bf16.mxu1 %v10131_v24  ;;  %v10138_v24 = vld [vmem:[%s14461_s2 + $0x160] ss:$24 sps:$4 sm:$0xff]  }
 0x95b   :  { %4197 = vmatpush1.bf16.msra.mxu0 %v10126_v27  ;;  %4238 = vmatpush1.bf16.msra.mxu1 %v10129_v29  ;;  %v10143_v29 = vld [vmem:[%s14461_s2 + $0x134] ss:$24 sps:$4 sm:$0xff]  }
 0x95c   :  { %4198 = vmatprep.subr.bf16.mxu0 %v10134_v51  ;;  %4239 = vmatprep.subr.bf16.mxu1 %v10137_v30  ;;  %v10146_v51 = vld [vmem:[%s14461_s2 + $0x104] ss:$24 sps:$4 sm:$0xff]   ;;  %v10144_v30 = vld [vmem:[%s14461_s2 + $0x100] ss:$24 sps:$4 sm:$0xff]  }
 0x95f   :  { %4199 = vmatpush1.bf16.msra.mxu0 %v10132_v31  ;;  %4240 = vmatpush1.bf16.msra.mxu1 %v10135_v41  ;;  %v10149_v31 = vld [vmem:[%s14461_s2 + $0xd4] ss:$24 sps:$4 sm:$0xff]   ;;  %v10147_v41 = vld [vmem:[%s14461_s2 + $0xd0] ss:$24 sps:$4 sm:$0xff]  }
 0x960   :  { %4266 = vmatprep.subr.bf16.mxu0 %v10140_v57  ;;  %v10152_v57 = vld [vmem:[%s14461_s2 + $0xa4] ss:$24 sps:$4 sm:$0xff]  }
 0x9e1   :  { %v3733_v33 = vpop.f32.mrf.mxu0  ;;  %v3774_v0 = vpop.f32.mrf.mxu1 }
 0x9e2   :  { %v3863_v36 = vadd.f32 %v3733_v33, %v11176_v1  ;;  %v3865_v50 = vadd.f32 %v3774_v0, %v11188_v19  ;;  %v10150_v33 = vld [vmem:[%s14461_s2 + $0xa0] ss:$24 sps:$4 sm:$0xff]   ;;  %v10155_v0 = vld [vmem:[%s14461_s2 + $0x74] ss:$24 sps:$4 sm:$0xff]  }
 0x9e3   :  { %v3735_v13 = vpop.f32.mrf.mxu0  ;;  %v3776_v20 = vpop.f32.mrf.mxu1 }
 0x9e4   :  { %v3867_v37 = vadd.f32 %v3863_v36, %v11949_v28  ;;  %v3864_v60 = vadd.f32 %v3735_v13, %v11180_v2  ;;  %v3866_v40 = vadd.f32 %v3776_v20, %v11186_v18  ;;  %v3869_v46 = vadd.f32 %v3865_v50, %v12001_v48  ;;  %v10153_v36 = vld [vmem:[%s14461_s2 + $0x70] ss:$24 sps:$4 sm:$0xff]   ;;  %v10158_v13 = vld [vmem:[%s14461_s2 + $0x44] ss:$24 sps:$4 sm:$0xff]   ;;  %v10156_v20 = vld [vmem:[%s14461_s2 + $0x40] ss:$24 sps:$4 sm:$0xff]  }
 0x9e5   :  { %v3737_v15 = vpop.f32.mrf.mxu0  ;;  %v3778_v7 = vpop.f32.mrf.mxu1 }
 0x9e6   :  { %v9144_v38 = vmul.f32 -1.442695, %v3867_v37  ;;  %v3868_v9 = vadd.f32 %v3864_v60, %v11951_v49  ;;  %v3870_v43 = vadd.f32 %v3866_v40, %v12003_v52  ;;  %v10161_v37 = vld [vmem:[%s14461_s2 + $0x14] ss:$24 sps:$4 sm:$0xff]   ;;  %v10159_v60 = vld [vmem:[%s14461_s2 + $0x10] ss:$24 sps:$4 sm:$0xff]  }
 0x9e7   :  { %v3738_v12 = vpop.f32.mrf.mxu0  ;;  %v3779_v39 = vpop.f32.mrf.mxu1 }
 0x9e8   :  { %10698 = vpow2.f32 %v9144_v38  ;;  %v9145_v42 = vmul.f32 -1.442695, %v3868_v9  ;;  %v9146_v55 = vmul.f32 -1.442695, %v3870_v43 }
 0x9ea   :  { %10700 = vpow2.f32 %v9145_v42 }
 0x9eb   :  { %10702 = vpow2.f32 %v9146_v55 }
 0x9f5   :  { %v10699_v28 = vpop.eup %10698 }
 0x9f6   :  { %v3874_v14 = vadd.f32 1.0, %v10699_v28 }
 0x9f7   :  { %v10701_v17 = vpop.eup %10700 }
 0x9f8   :  { %10704 = vrcp.f32 %v3874_v14  ;;  %v3880_v49 = vadd.f32 1.0, %v10701_v17  ;;  %v10703_v25 = vpop.eup %10702 }
 0x9f9   :  { %10706 = vtanh.f32 %v3869_v46  ;;  %v3887_v54 = vadd.f32 1.0, %v10703_v25 }
 0x9fa   :  { %10708 = vrcp.f32 %v3880_v49 }
 0x9fb   :  { %10710 = vrcp.f32 %v3887_v54 }
 0xa01   :  { %v12566_v21 = vpop.f32.mrf.mxu0  ;;  %v12568_v63 = vpop.f32.mrf.mxu1 }
 0xa03   :  { %v12570_v22 = vpop.f32.mrf.mxu0  ;;  %v12572_v52 = vpop.f32.mrf.mxu1 }
 0xa05   :  { %v10705_v47 = vpop.eup %10704  ;;  %v3819_v53 = vpop.f32.mrf.mxu0 }
 0xa06   :  { %v3860_v4 = vpop.f32.mrf.mxu1  ;;  %v10707_v48 = vpop.eup %10706 }
 0xa07   :  { %v10709_v5 = vpop.eup %10708  ;;  %v3820_v6 = vpop.f32.mrf.mxu0  ;;  %v3891_v35 = vmul.f32 %v10707_v48, %v10705_v47 }
 0xa08   :  { %v3861_v8 = vpop.f32.mrf.mxu1  ;;  %v3890_v62 = vmul.f32 %v10709_v5, %v11900_v56  ;;  %v10711_v58 = vpop.eup %10710  ;;  %v10141_v56 = vld [vmem:[%s14461_s2 + $0x130] ss:$24 sps:$4 sm:$0xff]  }
 0xa0a   :  { %v12575_v59 = vadd.f32 %v3891_v35, %v3890_v62 }
 0xa0c   :  { %10712 = vtanh.f32 %v12575_v59 }
 0xa19   :  { %v10713_v23 = vpop.eup %10712 }
 0xa1a   :  { %v3894_v26 = vmul.f32 %v10713_v23, %v10711_v58 }
 0xa1c   :  { %v3895_v27 = vpack.c.bf16 %v3894_v26, %v3894_v26 }
 0xa1e   :  { %4217 = vmatmul.mubr.bf16.vlgmr.msra.gmra.mxu0 %v3895_v27  ;;  %4258 = vmatmul.mubr.bf16.vlgmr.msra.gmra.mxu1 %v3895_v27 }
 0xa1f   :  { %4267 = vmatpush1.bf16.msra.mxu0 %v10138_v24  ;;  %4298 = vmatprep.mubr.bf16.mxu0 %v10810_v3 }
 0xa20   :  { %4268 = vmatprep.subr.bf16.mxu0 %v10143_v29 }
 0xa23   :  { %4269 = vmatpush1.bf16.msra.mxu0 %v10141_v56 }
 0xa24   :  { %4270 = vmatprep.subr.bf16.mxu0 %v10146_v51 }
 0xa27   :  { %4271 = vmatpush1.bf16.msra.mxu0 %v10144_v30  ;;  %v10162_v30 = vld [vmem:[%s14465_s5 + $0xe0] ss:$16 sps:$4 sm:$0xff]  }
 0xa28   :  { %4272 = vmatprep.subr.bf16.mxu0 %v10149_v31  ;;  %v10164_v31 = vld [vmem:[%s14465_s5 + $0xe4] ss:$16 sps:$4 sm:$0xff]  }
 0xa29   :  { %4813 = vmatprep.subr.bf16.mxu1 %v10164_v31  ;;  %v10227_v31 = vld [vmem:[%s14465_s5 + $0x1ac] ss:$16 sps:$4 sm:$0xff]  }
 0xa2a   :  { %4814 = vmatpush1.bf16.msra.mxu1 %v10162_v30  ;;  %v10224_v30 = vld [vmem:[%s14465_s5 + $0x1a4] ss:$16 sps:$4 sm:$0xff]  }
 0xa2b   :  { %4273 = vmatpush1.bf16.msra.mxu0 %v10147_v41  ;;  %v10165_v41 = vld [vmem:[%s14465_s5 + $0xe8] ss:$16 sps:$4 sm:$0xff]  }
 0xa2c   :  { %4274 = vmatprep.subr.bf16.mxu0 %v10152_v57  ;;  %v10167_v57 = vld [vmem:[%s14465_s5 + $0xec] ss:$16 sps:$4 sm:$0xff]  }
 0xa2f   :  { %4275 = vmatpush1.bf16.msra.mxu0 %v10150_v33  ;;  %v10170_v33 = vld [vmem:[%s14465_s5 + $0xc4] ss:$16 sps:$4 sm:$0xff]  }
 0xa30   :  { %4276 = vmatprep.subr.bf16.mxu0 %v10155_v0  ;;  %v10173_v0 = vld [vmem:[%s14465_s5 + $0xcc] ss:$16 sps:$4 sm:$0xff]   ;;  %4815 = vmatprep.subr.bf16.mxu1 %v10170_v33  ;;  %v10230_v33 = vld [vmem:[%s14465_s5 + $0x184] ss:$16 sps:$4 sm:$0xff]  }
 0xa33   :  { %4277 = vmatpush1.bf16.msra.mxu0 %v10153_v36  ;;  %v10168_v36 = vld [vmem:[%s14465_s5 + $0xc0] ss:$16 sps:$4 sm:$0xff]  }
 0xa34   :  { %4278 = vmatprep.subr.bf16.mxu0 %v10158_v13  ;;  %v10171_v13 = vld [vmem:[%s14465_s5 + $0xc8] ss:$16 sps:$4 sm:$0xff]   ;;  %4816 = vmatpush1.bf16.msra.mxu1 %v10168_v36  ;;  %v10228_v36 = vld [vmem:[%s14465_s5 + $0x180] ss:$16 sps:$4 sm:$0xff]  }
 0xa37   :  { %4279 = vmatpush1.bf16.msra.mxu0 %v10156_v20  ;;  %v10176_v20 = vld [vmem:[%s14465_s5 + $0xa4] ss:$16 sps:$4 sm:$0xff]  }
 0xa38   :  { %4280 = vmatprep.subr.bf16.mxu0 %v10161_v37  ;;  %v10179_v37 = vld [vmem:[%s14465_s5 + $0xac] ss:$16 sps:$4 sm:$0xff]   ;;  %4817 = vmatprep.subr.bf16.mxu1 %v10176_v20  ;;  %v10236_v20 = vld [vmem:[%s14465_s5 + $0x164] ss:$16 sps:$4 sm:$0xff]  }
 0xa3b   :  { %4281 = vmatpush1.bf16.msra.mxu0 %v10159_v60  ;;  %v10174_v60 = vld [vmem:[%s14465_s5 + $0xa0] ss:$16 sps:$4 sm:$0xff]  }
 0xa3c   :  { %4854 = vmatprep.subr.bf16.mxu0 %v10167_v57  ;;  %4818 = vmatpush1.bf16.msra.mxu1 %v10174_v60  ;;  %v10225_v57 = vld [vmem:[%s14465_s5 + $0x1a8] ss:$16 sps:$4 sm:$0xff]   ;;  %v10234_v60 = vld [vmem:[%s14465_s5 + $0x160] ss:$16 sps:$4 sm:$0xff]  }
 0xa3e   :  { %4299 = vmatmul.mubr.bf16.vlgmr.msra.gmra.mxu0 %v3895_v27 }
 0xa3f   :  { %4855 = vmatpush1.bf16.msra.mxu0 %v10165_v41  ;;  %v10222_v41 = vld [vmem:[%s14465_s5 + $0x1a0] ss:$16 sps:$4 sm:$0xff]  }
 0xa40   :  { %4856 = vmatprep.subr.bf16.mxu0 %v10173_v0  ;;  %v10233_v0 = vld [vmem:[%s14465_s5 + $0x18c] ss:$16 sps:$4 sm:$0xff]  }
 0xa43   :  { %4857 = vmatpush1.bf16.msra.mxu0 %v10171_v13  ;;  %v10231_v13 = vld [vmem:[%s14465_s5 + $0x188] ss:$16 sps:$4 sm:$0xff]  }
 0xa44   :  { %4858 = vmatprep.subr.bf16.mxu0 %v10179_v37  ;;  %v10239_v37 = vld [vmem:[%s14465_s5 + $0x16c] ss:$16 sps:$4 sm:$0xff]  }
 0xade   :  { %v4218_v15 = vpop.f32.mrf.mxu0  ;;  %v12624_v7 = vpop.f32.mrf.mxu1 }
 0xadf   :  { %v4307_v12 = vadd.f32 %v4218_v15, %v11254_v10  ;;  %v10177_v15 = vld [vmem:[%s14465_s5 + $0xa8] ss:$16 sps:$4 sm:$0xff]  }
 0xae0   :  { %v4220_v38 = vpop.f32.mrf.mxu0  ;;  %v12626_v9 = vpop.f32.mrf.mxu1  ;;  %4859 = vmatpush1.bf16.msra.mxu0 %v10177_v15  ;;  %v10237_v15 = vld [vmem:[%s14465_s5 + $0x168] ss:$16 sps:$4 sm:$0xff]  }
 0xae1   :  { %v4308_v39 = vadd.f32 %v4220_v38, %v11258_v11  ;;  %v10182_v38 = vld [vmem:[%s14465_s5 + $0x84] ss:$16 sps:$4 sm:$0xff]  }
 0xae2   :  { %v4222_v42 = vpop.f32.mrf.mxu0  ;;  %v4263_v40 = vpop.f32.mrf.mxu1  ;;  %4819 = vmatprep.subr.bf16.mxu1 %v10182_v38  ;;  %v10242_v38 = vld [vmem:[%s14465_s5 + $0x144] ss:$16 sps:$4 sm:$0xff]  }
 0xae3   :  { %v4311_v43 = vcombine.low %v4307_v12, %v4308_v39  ;;  %v4312_v50 = vcombine.high %v4307_v12, %v4308_v39  ;;  %v4393_v55 = vmax.f32 %v4307_v12, %v4308_v39  ;;  %v10183_v42 = vld [vmem:[%s14465_s5 + $0x88] ss:$16 sps:$4 sm:$0xff]   ;;  %v10188_v40 = vld [vmem:[%s14465_s5 + $0x64] ss:$16 sps:$4 sm:$0xff]  }
 0xae4   :  { %v4223_v28 = vpop.f32.mrf.mxu0  ;;  %v4264_v46 = vpop.f32.mrf.mxu1 }
 0xae5   :  { %v4319_v14 = vrot.slane %v4311_v43, %v11265_v16  ;;  %v4326_v17 = vrot.slane %v4312_v50, %v11265_v16  ;;  %4394 = vmax.xlane.f32.xlu0 %v4393_v55  ;;  %v10191_v43 = vld [vmem:[%s14465_s5 + $0x6c] ss:$16 sps:$4 sm:$0xff]   ;;  %v10186_v50 = vld [vmem:[%s14465_s5 + $0x60] ss:$16 sps:$4 sm:$0xff]   ;;  %v10189_v55 = vld [vmem:[%s14465_s5 + $0x68] ss:$16 sps:$4 sm:$0xff]  }
 0xae6   :  { %v10194_v28 = vld [vmem:[%s14465_s5 + $0x44] ss:$16 sps:$4 sm:$0xff]   ;;  %v10197_v46 = vld [vmem:[%s14465_s5 + $0x4c] ss:$16 sps:$4 sm:$0xff]  }
 0xae7   :  { %v4327_v49 = vcombine.high %v4319_v14, %v4319_v14  ;;  %v4328_v25 = vcombine.high %v4326_v17, %v4326_v17  ;;  %v4335_v47 = vrot.slane %v4319_v14, %v11265_v16  ;;  %v4342_v53 = vrot.slane %v4326_v17, %v11265_v16  ;;  %v10192_v14 = vld [vmem:[%s14465_s5 + $0x40] ss:$16 sps:$4 sm:$0xff]   ;;  %v10195_v17 = vld [vmem:[%s14465_s5 + $0x48] ss:$16 sps:$4 sm:$0xff]  }
 0xae9   :  { %v4349_v4 = vrot.slane %v4327_v49, %v11265_v16  ;;  %v4356_v48 = vrot.slane %v4328_v25, %v11265_v16  ;;  %v4357_v5 = vcombine.high %v4335_v47, %v4335_v47  ;;  %v4358_v54 = vcombine.high %v4342_v53, %v4342_v53  ;;  %9195 = vst.msk [vmem:[%s14464_s6 + $0x2] ss:$8 sm:$0x3] %vm11272_vm0, %v4335_v47  ;;  %v10200_v49 = vld [vmem:[%s14465_s5 + $0x24] ss:$16 sps:$4 sm:$0xff]  }
 0xaea   :  { %9199 = vst.msk [vmem:[%s14464_s6 + $0x42] ss:$8 sm:$0x3] %vm11272_vm0, %v4342_v53  ;;  %v10203_v25 = vld [vmem:[%s14465_s5 + $0x2c] ss:$16 sps:$4 sm:$0xff]  }
 0xaeb   :  { %v4359_v6 = vcombine.high %v4349_v4, %v4349_v4  ;;  %v4360_v8 = vcombine.high %v4356_v48, %v4356_v48  ;;  %9196 = vst.msk [vmem:[%s14464_s6 + $0x12] ss:$8 sm:$0x3] %vm11272_vm0, %v4349_v4  ;;  %9197 = vst.msk [vmem:[%s14464_s6 + $0x22] ss:$8 sm:$0x3] %vm11272_vm0, %v4357_v5 }
 0xaec   :  { %9200 = vst.msk [vmem:[%s14464_s6 + $0x52] ss:$8 sm:$0x3] %vm11272_vm0, %v4356_v48  ;;  %9201 = vst.msk [vmem:[%s14464_s6 + $0x62] ss:$8 sm:$0x3] %vm11272_vm0, %v4358_v54 }
 0xaed   :  { %9198 = vst.msk [vmem:[%s14464_s6 + $0x32] ss:$8 sm:$0x3] %vm11272_vm0, %v4359_v6  ;;  %9202 = vst.msk [vmem:[%s14464_s6 + $0x72] ss:$8 sm:$0x3] %vm11272_vm0, %v4360_v8 }
 0xaee   :  { %v10198_v47 = vld [vmem:[%s14465_s5 + $0x20] ss:$16 sps:$4 sm:$0xff]   ;;  %v10201_v53 = vld [vmem:[%s14465_s5 + $0x28] ss:$16 sps:$4 sm:$0xff]   ;;  %v10206_v4 = vld [vmem:[%s14465_s5 + $0x4] ss:$16 sps:$4 sm:$0xff]  }
 0xaef   :  { %v10209_v48 = vld [vmem:[%s14465_s5 + $0xc] ss:$16 sps:$4 sm:$0xff]   ;;  %v10204_v5 = vld [vmem:[%s14465_s5] ss:$16 sps:$4 sm:$0xff]   ;;  %v10207_v54 = vld [vmem:[%s14465_s5 + $0x8] ss:$16 sps:$4 sm:$0xff]  }
 0xaf0   :  { %v10212_v6 = vld [vmem:[%s14465_s5 + $0x1e4] ss:$16 sps:$4 sm:$0xff]   ;;  %v10215_v8 = vld [vmem:[%s14465_s5 + $0x1ec] ss:$16 sps:$4 sm:$0xff]  }
 0xafe   :  { %v12676_v35 = vpop.f32.mrf.mxu0 }
 0xb00   :  { %v12678_v62 = vpop.f32.mrf.mxu0 }
 0xb02   :  { %v4304_v58 = vpop.f32.mrf.mxu0 }
 0xb03   :  { %v10210_v58 = vld [vmem:[%s14465_s5 + $0x1e0] ss:$16 sps:$4 sm:$0xff]  }
 0xb04   :  { %v4305_v23 = vpop.f32.mrf.mxu0 }
 0xb05   :  { %v10213_v23 = vld [vmem:[%s14465_s5 + $0x1e8] ss:$16 sps:$4 sm:$0xff]  }
 0xb6e   :  { %v4395_v26 = vpop.xlane.xlu0 %4394 }
 0xb6f   :  { %vm4396_vm2 = vcmp.eq.f32.partialorder %v4307_v12, %v4395_v26  ;;  %vm4397_vm3 = vcmp.eq.f32.partialorder %v4308_v39, %v4395_v26  ;;  %v10185_v12 = vld [vmem:[%s14465_s5 + $0x8c] ss:$16 sps:$4 sm:$0xff]   ;;  %v10180_v39 = vld [vmem:[%s14465_s5 + $0x80] ss:$16 sps:$4 sm:$0xff]   ;;  %v10218_v26 = vld [vmem:[%s14465_s5 + $0x1c4] ss:$16 sps:$4 sm:$0xff]  }
 0xb70   :  { %v4398_v24 = vsel %vm4396_vm2, %v11325_v44, 256  ;;  %v4399_v27 = vsel %vm4397_vm3, %v11328_v45, 256  ;;  %4860 = vmatprep.subr.bf16.mxu0 %v10185_v12  ;;  %4820 = vmatpush1.bf16.msra.mxu1 %v10180_v39  ;;  %v10245_v12 = vld [vmem:[%s14465_s5 + $0x14c] ss:$16 sps:$4 sm:$0xff]   ;;  %v10240_v39 = vld [vmem:[%s14465_s5 + $0x140] ss:$16 sps:$4 sm:$0xff]  }
 0xb71   :  { %vm4400_vm4 = vcmp.lt.s32.totalorder %v4398_v24, %v4399_v27  ;;  %4861 = vmatpush1.bf16.msra.mxu0 %v10183_v42  ;;  %4821 = vmatprep.subr.bf16.mxu1 %v10188_v40  ;;  %v10243_v42 = vld [vmem:[%s14465_s5 + $0x148] ss:$16 sps:$4 sm:$0xff]   ;;  %v10248_v40 = vld [vmem:[%s14465_s5 + $0x124] ss:$16 sps:$4 sm:$0xff]  }
 0xb72   :  { %v12682_v29 = vsel %vm4400_vm4, %v4398_v24, %v4399_v27  ;;  %4862 = vmatprep.subr.bf16.mxu0 %v10191_v43  ;;  %v10221_v24 = vld [vmem:[%s14465_s5 + $0x1cc] ss:$16 sps:$4 sm:$0xff]   ;;  %v10216_v27 = vld [vmem:[%s14465_s5 + $0x1c0] ss:$16 sps:$4 sm:$0xff]  }
 0xb73   :  { %v4403_v56 = vshra.s32 %v12682_v29, 16  ;;  %v10251_v43 = vld [vmem:[%s14465_s5 + $0x12c] ss:$16 sps:$4 sm:$0xff]  }
 0xb74   :  { %4822 = vmatpush1.bf16.msra.mxu1 %v10186_v50  ;;  %v10246_v50 = vld [vmem:[%s14465_s5 + $0x120] ss:$16 sps:$4 sm:$0xff]  }
 0xb75   :  { %v12685_v51 = vcvt.s32.f32 %v4403_v56  ;;  %4863 = vmatpush1.bf16.msra.mxu0 %v10189_v55  ;;  %4823 = vmatprep.subr.bf16.mxu1 %v10194_v28  ;;  %v10219_v56 = vld [vmem:[%s14465_s5 + $0x1c8] ss:$16 sps:$4 sm:$0xff]   ;;  %v4402_v28 = vand.u32 65535, %v12682_v29 }
 0xb76   :  { %4864 = vmatprep.subr.bf16.mxu0 %v10197_v46  ;;  %v10249_v55 = vld [vmem:[%s14465_s5 + $0x128] ss:$16 sps:$4 sm:$0xff]  }
 0xb77   :  { %4406 = vmin.xlane.f32.xlu1 %v12685_v51  ;;  %v10255_v29 = vld [vmem:[%s14465_s5 + $0x108] ss:$16 sps:$4 sm:$0xff]  }
 0xb78   :  { %4824 = vmatpush1.bf16.msra.mxu1 %v10192_v14  ;;  %v4404_v14 = vcvt.s32.f32 %v4402_v28 }
 0xb79   :  { %4865 = vmatpush1.bf16.msra.mxu0 %v10195_v17  ;;  %4825 = vmatprep.subr.bf16.mxu1 %v10200_v49  ;;  %v10254_v49 = vld [vmem:[%s14465_s5 + $0x104] ss:$16 sps:$4 sm:$0xff]  }
 0xb7a   :  { %4866 = vmatprep.subr.bf16.mxu0 %v10203_v25  ;;  %v10257_v25 = vld [vmem:[%s14465_s5 + $0x10c] ss:$16 sps:$4 sm:$0xff]  }
 0xb7c   :  { %4826 = vmatpush1.bf16.msra.mxu1 %v10198_v47  ;;  %v10252_v47 = vld [vmem:[%s14465_s5 + $0x100] ss:$16 sps:$4 sm:$0xff]  }
 0xb7d   :  { %4867 = vmatpush1.bf16.msra.mxu0 %v10201_v53  ;;  %4827 = vmatprep.subr.bf16.mxu1 %v10206_v4 }
 0xb7e   :  { %4868 = vmatprep.subr.bf16.mxu0 %v10209_v48 }
 0xb80   :  { %4828 = vmatpush1.bf16.msra.mxu1 %v10204_v5 }
 0xb81   :  { %4869 = vmatpush1.bf16.msra.mxu0 %v10207_v54  ;;  %4829 = vmatprep.subr.bf16.mxu1 %v10212_v6  ;;  %v4980_v54 = vld [vmem:[%s14459_s1 + $0x1c0] sm:$0xff] }
 0xb82   :  { %4870 = vmatprep.subr.bf16.mxu0 %v10215_v8  ;;  %v4984_v6 = vld [vmem:[%s14459_s1 + $0x1e0] sm:$0xff]  ;;  %v4981_v8 = vld [vmem:[%s14459_s1 + $0x1c8] sm:$0xff] }
 0xb84   :  { %4830 = vmatpush2.bf16.msra.mxu1 %v10210_v58  ;;  %v9341_v58 = vcombine.high %v4980_v54, %v4984_v6 }
 0xb85   :  { %4871 = vmatpush2.bf16.msra.mxu0 %v10213_v23  ;;  %4831 = vmatprep.subr.bf16.mxu1 %v10218_v26  ;;  %v4985_v23 = vld [vmem:[%s14459_s1 + $0x1e8] sm:$0xff]  ;;  %v9340_v26 = vcombine.low %v4980_v54, %v4984_v6 }
 0xb86   :  { %4872 = vmatprep.subr.bf16.mxu0 %v10221_v24  ;;  %v9342_v24 = vcombine.low %v4981_v8, %v4985_v23  ;;  %v4941_v6 = vld [vmem:[%s14459_s1 + $0x88] sm:$0xff] }
 0xb88   :  { %4832 = vmatpush2.bf16.msra.mxu1 %v10216_v27  ;;  %v9343_v27 = vcombine.high %v4981_v8, %v4985_v23  ;;  %v4945_v8 = vld [vmem:[%s14459_s1 + $0xa8] sm:$0xff]  ;;  %v4932_v23 = vld [vmem:[%s14459_s1 + $0x40] sm:$0xff] }
 0xb89   :  { %4873 = vmatpush2.bf16.msra.mxu0 %v10219_v56  ;;  %4833 = vmatprep.subr.bf16.mxu1 %v10224_v30  ;;  %v4972_v56 = vld [vmem:[%s14459_s1 + $0x180] sm:$0xff] }
 0xb8a   :  { %4874 = vmatprep.subr.bf16.mxu0 %v10227_v31  ;;  %v4976_v30 = vld [vmem:[%s14459_s1 + $0x1a0] sm:$0xff]  ;;  %v4973_v31 = vld [vmem:[%s14459_s1 + $0x188] sm:$0xff] }
 0xb8c   :  { %4834 = vmatpush2.bf16.msra.mxu1 %v10222_v41  ;;  %v9333_v41 = vcombine.high %v4972_v56, %v4976_v30 }
 0xb8d   :  { %4875 = vmatpush2.bf16.msra.mxu0 %v10225_v57  ;;  %4835 = vmatprep.subr.bf16.mxu1 %v10230_v33  ;;  %v4977_v57 = vld [vmem:[%s14459_s1 + $0x1a8] sm:$0xff]  ;;  %v9332_v33 = vcombine.low %v4972_v56, %v4976_v30  ;;  %v12977_v30 = vld [vmem:[%s14459_s1 + $0x1d0] sm:$0xff] }
 0xb8e   :  { %4876 = vmatprep.subr.bf16.mxu0 %v10233_v0  ;;  %v9334_v0 = vcombine.low %v4973_v31, %v4977_v57 }
 0xb90   :  { %4836 = vmatpush2.bf16.msra.mxu1 %v10228_v36  ;;  %v9335_v36 = vcombine.high %v4973_v31, %v4977_v57  ;;  %v12982_v31 = vld [vmem:[%s14459_s1 + $0x1f0] sm:$0xff] }
 0xb91   :  { %4877 = vmatpush2.bf16.msra.mxu0 %v10231_v13  ;;  %4837 = vmatprep.subr.bf16.mxu1 %v10236_v20  ;;  %v4964_v13 = vld [vmem:[%s14459_s1 + $0x140] sm:$0xff] }
 0xb92   :  { %4878 = vmatprep.subr.bf16.mxu0 %v10239_v37  ;;  %v4968_v20 = vld [vmem:[%s14459_s1 + $0x160] sm:$0xff]  ;;  %v4965_v37 = vld [vmem:[%s14459_s1 + $0x148] sm:$0xff] }
 0xb94   :  { %4838 = vmatpush2.bf16.msra.mxu1 %v10234_v60  ;;  %v9325_v60 = vcombine.high %v4964_v13, %v4968_v20 }
 0xb95   :  { %4879 = vmatpush2.bf16.msra.mxu0 %v10237_v15  ;;  %4839 = vmatprep.subr.bf16.mxu1 %v10242_v38  ;;  %v4969_v15 = vld [vmem:[%s14459_s1 + $0x168] sm:$0xff]  ;;  %v9324_v38 = vcombine.low %v4964_v13, %v4968_v20  ;;  %v4924_v20 = vld [vmem:[%s14459_s1] sm:$0xff] }
 0xb96   :  { %4880 = vmatprep.subr.bf16.mxu0 %v10245_v12  ;;  %v9326_v12 = vcombine.low %v4965_v37, %v4969_v15 }
 0xb98   :  { %4840 = vmatpush2.bf16.msra.mxu1 %v10240_v39  ;;  %v9327_v39 = vcombine.high %v4965_v37, %v4969_v15  ;;  %v4928_v37 = vld [vmem:[%s14459_s1 + $0x20] sm:$0xff]  ;;  %v4925_v15 = vld [vmem:[%s14459_s1 + $0x8] sm:$0xff] }
 0xb99   :  { %4881 = vmatpush2.bf16.msra.mxu0 %v10243_v42  ;;  %4841 = vmatprep.subr.bf16.mxu1 %v10248_v40  ;;  %v4956_v42 = vld [vmem:[%s14459_s1 + $0x100] sm:$0xff] }
 0xb9a   :  { %4882 = vmatprep.subr.bf16.mxu0 %v10251_v43  ;;  %v4960_v40 = vld [vmem:[%s14459_s1 + $0x120] sm:$0xff]  ;;  %v4957_v43 = vld [vmem:[%s14459_s1 + $0x108] sm:$0xff] }
 0xb9b   :  { %v9316_v28 = vcombine.low %v4956_v42, %v4960_v40 }
 0xb9c   :  { %4842 = vmatpush2.bf16.msra.mxu1 %v10246_v50  ;;  %v9317_v50 = vcombine.high %v4956_v42, %v4960_v40  ;;  %v9285_v42 = vcombine.high %v4924_v20, %v4928_v37 }
 0xb9d   :  { %4883 = vmatpush2.bf16.msra.mxu0 %v10249_v55  ;;  %4843 = vmatprep.subr.bf16.mxu1 %v10254_v49  ;;  %v4961_v55 = vld [vmem:[%s14459_s1 + $0x128] sm:$0xff]  ;;  %v4952_v49 = vld [vmem:[%s14459_s1 + $0xe0] sm:$0xff] }
 0xb9e   :  { %4884 = vmatprep.subr.bf16.mxu0 %v10257_v25  ;;  %v4949_v25 = vld [vmem:[%s14459_s1 + $0xc8] sm:$0xff] }
 0xba0   :  { %4844 = vmatpush2.bf16.msra.mxu1 %v10252_v47 }
 0xba1   :  { %4885 = vmatpush2.bf16.msra.mxu0 %v10255_v29  ;;  %5308 = vmatprep.subr.bf16.mxu1 %v9341_v58  ;;  %v9303_v58 = vcombine.high %v4941_v6, %v4945_v8 }
 0xba2   :  { %5349 = vmatprep.subr.bf16.mxu0 %v9343_v27  ;;  %v4937_v27 = vld [vmem:[%s14459_s1 + $0x68] sm:$0xff] }
 0xc00   :  { %v4407_v46 = vpop.xlane.xlu1 %4406 }
 0xc01   :  { %vm4408_vm5 = vcmp.eq.f32.partialorder %v12685_v51, %v4407_v46  ;;  %v4413_v51 = vcvt.f32.s32 %v4407_v46  ;;  %v9318_v46 = vcombine.low %v4957_v43, %v4961_v55 }
 0xc02   :  { %v4409_v17 = vsel %vm4408_vm5, %v4404_v14, inf  ;;  %v9319_v14 = vcombine.high %v4957_v43, %v4961_v55  ;;  %v9284_v43 = vcombine.low %v4924_v20, %v4928_v37  ;;  %v9345_v55 = vcombine.high %v12977_v30, %v12982_v31 }
 0xc03   :  { %4410 = vmin.xlane.f32.xlu0 %v4409_v17  ;;  %v4414_v4 = vshll.u32 %v4413_v51, 16  ;;  %v4948_v17 = vld [vmem:[%s14459_s1 + $0xc0] sm:$0xff]  ;;  %v4953_v51 = vld [vmem:[%s14459_s1 + $0xe8] sm:$0xff] }
 0xc04   :  { %v9308_v47 = vcombine.low %v4948_v17, %v4952_v49  ;;  %v9309_v29 = vcombine.high %v4948_v17, %v4952_v49  ;;  %v9206_v49 = vld [vmem:[%s14460_s0 + $0x68] sm:$0xff] }
 0xc8c   :  { %v4411_v53 = vpop.xlane.xlu0 %4410 }
 0xc8d   :  { %v4412_v48 = vcvt.f32.s32 %v4411_v53  ;;  %v4940_v53 = vld [vmem:[%s14459_s1 + $0x80] sm:$0xff] }
 0xc8f   :  { %v4415_v5 = vadd.s32 %v4414_v4, %v4412_v48  ;;  %v4944_v4 = vld [vmem:[%s14459_s1 + $0xa0] sm:$0xff]  ;;  %v9310_v48 = vcombine.low %v4949_v25, %v4953_v51 }
 0xc90   :  { %v9301_v54 = vcombine.high %v4940_v53, %v4944_v4  ;;  %v9300_v56 = vcombine.low %v4940_v53, %v4944_v4 }
 0xc91   :  { %vm4416_vm6 = vcmp.eq.s32.totalorder %v11325_v44, %v4415_v5  ;;  %vm4417_vm7 = vcmp.eq.s32.totalorder %v11328_v45, %v4415_v5  ;;  %v9311_v5 = vcombine.high %v4949_v25, %v4953_v51 }
 0xc92   :  { %vm9275_vm8 = vmpackc.low %vm4416_vm6, %vm4416_vm6 }
 0xc93   :  { %vm9273_vm9 = vmpackc.low %vm4417_vm7, %vm4417_vm7 }
 0xc94   :  { %9274 = vmatprep.mubr.msk.bf16.mxu1 %vm9273_vm9, %v10812_v34  ;;  %9278 = vmatprep.mubr.msk.bf16.mxu0 %vm9273_vm9, %v10812_v34 }
 0xc95   :  { %9276 = vmatmul.mubr.msk.bf16.vlgmr.msra.gmra.mxu1 %vm9275_vm8, %v10812_v34  ;;  %9280 = vmatmul.mubr.msk.bf16.vlgmr.msra.gmra.mxu0 %vm9275_vm8, %v10812_v34 }
 0xc96   :  { %5340 = vmatprep.mubr.bf16.mxu1 %v10810_v3  ;;  %5381 = vmatprep.mubr.bf16.mxu0 %v10810_v3 }
 0xc97   :  { %5309 = vmatpush1.bf16.msra.mxu1 %v9340_v26  ;;  %5350 = vmatpush1.bf16.msra.mxu0 %v9342_v24  ;;  %v4936_v26 = vld [vmem:[%s14459_s1 + $0x60] sm:$0xff]  ;;  %v4933_v24 = vld [vmem:[%s14459_s1 + $0x48] sm:$0xff] }
 0xc98   :  { %5310 = vmatprep.subr.bf16.mxu1 %v9333_v41  ;;  %5351 = vmatprep.subr.bf16.mxu0 %v9335_v36  ;;  %v9302_v41 = vcombine.low %v4941_v6, %v4945_v8  ;;  %v9293_v57 = vcombine.high %v4932_v23, %v4936_v26  ;;  %v12994_v36 = vld [vmem:[%s14459_s1 + $0x1f8] sm:$0xff]  ;;  %v9295_v13 = vcombine.high %v4933_v24, %v4937_v27 }
 0xc9b   :  { %5311 = vmatpush1.bf16.msra.mxu1 %v9332_v33  ;;  %5352 = vmatpush1.bf16.msra.mxu0 %v9334_v0  ;;  %v9344_v33 = vcombine.low %v12977_v30, %v12982_v31  ;;  %v12989_v0 = vld [vmem:[%s14459_s1 + $0x1d8] sm:$0xff] }
 0xc9c   :  { %5312 = vmatprep.subr.bf16.mxu1 %v9325_v60  ;;  %5353 = vmatprep.subr.bf16.mxu0 %v9327_v39  ;;  %v9346_v60 = vcombine.low %v12989_v0, %v12994_v36  ;;  %v9294_v39 = vcombine.low %v4933_v24, %v4937_v27  ;;  %v4959_v30 = vld [vmem:[%s14459_s1 + $0x118] sm:$0xff] }
 0xc9d   :  { %v4963_v31 = vld [vmem:[%s14459_s1 + $0x138] sm:$0xff] }
 0xc9f   :  { %5313 = vmatpush1.bf16.msra.mxu1 %v9324_v38  ;;  %5354 = vmatpush1.bf16.msra.mxu0 %v9326_v12  ;;  %v4929_v38 = vld [vmem:[%s14459_s1 + $0x28] sm:$0xff]  ;;  %v9292_v12 = vcombine.low %v4932_v23, %v4936_v26  ;;  %v9208_v23 = vld [vmem:[%s14460_s0 + $0x78] sm:$0xff] }
 0xca0   :  { %5314 = vmatprep.subr.bf16.mxu1 %v9317_v50  ;;  %5355 = vmatprep.subr.bf16.mxu0 %v9319_v14  ;;  %v9287_v40 = vcombine.high %v4925_v15, %v4929_v38  ;;  %v9286_v50 = vcombine.low %v4925_v15, %v4929_v38 }
 0xca3   :  { %5315 = vmatpush1.bf16.msra.mxu1 %v9316_v28  ;;  %5356 = vmatpush1.bf16.msra.mxu0 %v9318_v46  ;;  %v9347_v28 = vcombine.high %v12989_v0, %v12994_v36  ;;  %v9205_v46 = vld [vmem:[%s14460_s0 + $0x60] sm:$0xff] }
 0xca4   :  { %5316 = vmatprep.subr.bf16.mxu1 %v9309_v29  ;;  %5357 = vmatprep.subr.bf16.mxu0 %v9311_v5 }
 0xca7   :  { %5317 = vmatpush1.bf16.msra.mxu1 %v9308_v47  ;;  %5358 = vmatpush1.bf16.msra.mxu0 %v9310_v48 }
 0xca8   :  { %5318 = vmatprep.subr.bf16.mxu1 %v9301_v54  ;;  %5359 = vmatprep.subr.bf16.mxu0 %v9303_v58 }
 0xcab   :  { %5319 = vmatpush1.bf16.msra.mxu1 %v9300_v56  ;;  %5360 = vmatpush1.bf16.msra.mxu0 %v9302_v41 }
 0xcac   :  { %5320 = vmatprep.subr.bf16.mxu1 %v9293_v57  ;;  %5361 = vmatprep.subr.bf16.mxu0 %v9295_v13 }
 0xcaf   :  { %5321 = vmatpush1.bf16.msra.mxu1 %v9292_v12  ;;  %5362 = vmatpush1.bf16.msra.mxu0 %v9294_v39 }
 0xcb0   :  { %5322 = vmatprep.subr.bf16.mxu1 %v9285_v42  ;;  %5363 = vmatprep.subr.bf16.mxu0 %v9287_v40 }
 0xcb3   :  { %5323 = vmatpush1.bf16.msra.mxu1 %v9284_v43  ;;  %5364 = vmatpush1.bf16.msra.mxu0 %v9286_v50  ;;  %v4974_v43 = vld [vmem:[%s14459_s1 + $0x190] sm:$0xff] }
 0xcb4   :  { %5390 = vmatprep.subr.bf16.mxu1 %v9345_v55  ;;  %5431 = vmatprep.subr.bf16.mxu0 %v9347_v28  ;;  %v4978_v55 = vld [vmem:[%s14459_s1 + $0x1b0] sm:$0xff]  ;;  %v4975_v28 = vld [vmem:[%s14459_s1 + $0x198] sm:$0xff] }
 0xd55   :  { %v4847_v14 = vpop.f32.mrf.mxu1  ;;  %v4888_v17 = vpop.f32.mrf.mxu0 }
 0xd56   :  { %v4848_v25 = vadd.f32 %v9205_v46, %v4847_v14 }
 0xd57   :  { %v4849_v47 = vpop.f32.mrf.mxu1  ;;  %v4890_v29 = vpop.f32.mrf.mxu0 }
 0xd58   :  { %v4895_v51 = vadd.f32 %v4848_v25, %v12566_v21  ;;  %v4850_v53 = vadd.f32 %v9206_v49, %v4849_v47  ;;  %v4891_v26 = vadd.f32 %v9208_v23, %v4890_v29  ;;  %v9207_v21 = vld [vmem:[%s14460_s0 + $0x70] sm:$0xff]  ;;  %v4967_v29 = vld [vmem:[%s14459_s1 + $0x158] sm:$0xff] }
 0xd59   :  { %v4851_v4 = vpop.f32.mrf.mxu1  ;;  %v4892_v48 = vpop.f32.mrf.mxu0  ;;  %v4889_v27 = vadd.f32 %v9207_v21, %v4888_v17  ;;  %v9337_v17 = vcombine.high %v4974_v43, %v4978_v55  ;;  %v4966_v25 = vld [vmem:[%s14459_s1 + $0x150] sm:$0xff]  ;;  %v4951_v23 = vld [vmem:[%s14459_s1 + $0xd8] sm:$0xff] }
 0xd5a   :  { %v9281_v5 = vmul.f32 -1.442695, %v4895_v51  ;;  %v4896_v54 = vadd.f32 %v4850_v53, %v12570_v22  ;;  %v4898_v24 = vadd.f32 %v4891_v26, %v12572_v52  ;;  %v4970_v47 = vld [vmem:[%s14459_s1 + $0x170] sm:$0xff]  ;;  %v4971_v51 = vld [vmem:[%s14459_s1 + $0x178] sm:$0xff]  ;;  %v9336_v53 = vcombine.low %v4974_v43, %v4978_v55 }
 0xd5b   :  { %v4852_v6 = vpop.f32.mrf.mxu1  ;;  %v4893_v8 = vpop.f32.mrf.mxu0  ;;  %v4897_v22 = vadd.f32 %v4889_v27, %v12568_v63  ;;  %v9329_v48 = vcombine.high %v4966_v25, %v4970_v47  ;;  %v9330_v0 = vcombine.low %v4967_v29, %v4971_v51  ;;  %v4955_v26 = vld [vmem:[%s14459_s1 + $0xf8] sm:$0xff] }
 0xd5c   :  { %10714 = vpow2.f32 %v9281_v5  ;;  %v9282_v58 = vmul.f32 -1.442695, %v4896_v54  ;;  %v9283_v56 = vmul.f32 -1.442695, %v4898_v24  ;;  %v9331_v5 = vcombine.high %v4967_v29, %v4971_v51  ;;  %v4958_v54 = vld [vmem:[%s14459_s1 + $0x110] sm:$0xff] }
 0xd5d   :  { %v4962_v6 = vld [vmem:[%s14459_s1 + $0x130] sm:$0xff]  ;;  %v9322_v24 = vcombine.low %v4959_v30, %v4963_v31 }
 0xd5e   :  { %10716 = vpow2.f32 %v9282_v58  ;;  %v9321_v36 = vcombine.high %v4958_v54, %v4962_v6  ;;  %v4950_v8 = vld [vmem:[%s14459_s1 + $0xd0] sm:$0xff]  ;;  %v9320_v21 = vcombine.low %v4958_v54, %v4962_v6  ;;  %v10266_v54 = vld [vmem:[%s14461_s2 + $0x124] ss:$24 sps:$4 sm:$0xff]   ;;  %v10264_v6 = vld [vmem:[%s14461_s2 + $0x120] ss:$24 sps:$4 sm:$0xff]  }
 0xd5f   :  { %10718 = vpow2.f32 %v9283_v56  ;;  %v4954_v58 = vld [vmem:[%s14459_s1 + $0xf0] sm:$0xff]  ;;  %v9315_v56 = vcombine.high %v4951_v23, %v4955_v26 }
 0xd60   :  { %v9313_v27 = vcombine.high %v4950_v8, %v4954_v58 }
 0xd69   :  { %v10715_v41 = vpop.eup %10714 }
 0xd6a   :  { %v4902_v57 = vadd.f32 1.0, %v10715_v41  ;;  %v4942_v41 = vld [vmem:[%s14459_s1 + $0x90] sm:$0xff] }
 0xd6b   :  { %v10717_v13 = vpop.eup %10716 }
 0xd6c   :  { %10720 = vrcp.f32 %v4902_v57  ;;  %v4908_v20 = vadd.f32 1.0, %v10717_v13  ;;  %v10719_v37 = vpop.eup %10718  ;;  %v4943_v57 = vld [vmem:[%s14459_s1 + $0x98] sm:$0xff] }
 0xd6d   :  { %10722 = vtanh.f32 %v4897_v22  ;;  %v4915_v39 = vadd.f32 1.0, %v10719_v37  ;;  %v4946_v22 = vld [vmem:[%s14459_s1 + $0xb0] sm:$0xff]  ;;  %v4947_v13 = vld [vmem:[%s14459_s1 + $0xb8] sm:$0xff]  ;;  %v9314_v37 = vcombine.low %v4951_v23, %v4955_v26  ;;  %v10281_v23 = vld [vmem:[%s14461_s2 + $0xcc] ss:$24 sps:$4 sm:$0xff]  }
 0xd6e   :  { %10724 = vrcp.f32 %v4908_v20  ;;  %v9312_v20 = vcombine.low %v4950_v8, %v4954_v58  ;;  %v9306_v43 = vcombine.low %v4943_v57, %v4947_v13  ;;  %v10278_v8 = vld [vmem:[%s14461_s2 + $0xc4] ss:$24 sps:$4 sm:$0xff]   ;;  %v10276_v58 = vld [vmem:[%s14461_s2 + $0xc0] ss:$24 sps:$4 sm:$0xff]  }
 0xd6f   :  { %10726 = vrcp.f32 %v4915_v39  ;;  %v4938_v39 = vld [vmem:[%s14459_s1 + $0x70] sm:$0xff]  ;;  %v10279_v26 = vld [vmem:[%s14461_s2 + $0xc8] ss:$24 sps:$4 sm:$0xff]  }
 0xd79   :  { %v10721_v15 = vpop.eup %10720 }
 0xd7a   :  { %v10723_v38 = vpop.eup %10722 }
 0xd7b   :  { %v10725_v12 = vpop.eup %10724  ;;  %v4919_v42 = vmul.f32 %v10723_v38, %v10721_v15  ;;  %v9305_v15 = vcombine.high %v4942_v41, %v4946_v22  ;;  %v9307_v38 = vcombine.high %v4943_v57, %v4947_v13  ;;  %v10288_v57 = vld [vmem:[%s14461_s2 + $0x60] ss:$24 sps:$4 sm:$0xff]  }
 0xd7c   :  { %v4918_v52 = vmul.f32 %v10725_v12, %v12356_v32  ;;  %v10727_v63 = vpop.eup %10726  ;;  %v4979_v32 = vld [vmem:[%s14459_s1 + $0x1b8] sm:$0xff]  ;;  %v4934_v12 = vld [vmem:[%s14459_s1 + $0x50] sm:$0xff]  ;;  %v10291_v13 = vld [vmem:[%s14461_s2 + $0x68] ss:$24 sps:$4 sm:$0xff]  }
 0xd7d   :  { %v9339_v49 = vcombine.high %v4975_v28, %v4979_v32  ;;  %v9338_v4 = vcombine.low %v4975_v28, %v4979_v32  ;;  %v4926_v28 = vld [vmem:[%s14459_s1 + $0x10] sm:$0xff] }
 0xd7e   :  { %v13031_v40 = vadd.f32 %v4919_v42, %v4918_v52  ;;  %v4935_v42 = vld [vmem:[%s14459_s1 + $0x58] sm:$0xff]  ;;  %v4930_v32 = vld [vmem:[%s14459_s1 + $0x30] sm:$0xff] }
 0xd7f   :  { %v4939_v52 = vld [vmem:[%s14459_s1 + $0x78] sm:$0xff]  ;;  %v9288_v51 = vcombine.low %v4926_v28, %v4930_v32 }
 0xd80   :  { %10728 = vtanh.f32 %v13031_v40  ;;  %v9299_v55 = vcombine.high %v4935_v42, %v4939_v52 }
 0xd8d   :  { %v10729_v50 = vpop.eup %10728 }
 0xd8e   :  { %v4922_v46 = vmul.f32 %v10729_v50, %v10727_v63  ;;  %v9304_v63 = vcombine.low %v4942_v41, %v4946_v22  ;;  %v9297_v50 = vcombine.high %v4934_v12, %v4938_v39  ;;  %v10290_v41 = vld [vmem:[%s14461_s2 + $0x64] ss:$24 sps:$4 sm:$0xff]  }
 0xd8f   :  { %v10293_v22 = vld [vmem:[%s14461_s2 + $0x6c] ss:$24 sps:$4 sm:$0xff]  }
 0xd90   :  { %v13046_v14 = vpack.c.bf16 %v4922_v46, %v4922_v46  ;;  %v4927_v46 = vld [vmem:[%s14459_s1 + $0x18] sm:$0xff] }
 0xd92   :  { %5341 = vmatmul.mubr.bf16.vlgmr.msra.gmra.mxu1 %v13046_v14  ;;  %5382 = vmatmul.mubr.bf16.vlgmr.msra.gmra.mxu0 %v13046_v14 }
 0xd93   :  { %5391 = vmatpush1.bf16.msra.mxu1 %v9344_v33  ;;  %5432 = vmatpush1.bf16.msra.mxu0 %v9346_v60  ;;  %v9328_v33 = vcombine.low %v4966_v25, %v4970_v47  ;;  %v9323_v60 = vcombine.high %v4959_v30, %v4963_v31  ;;  %v9298_v25 = vcombine.low %v4935_v42, %v4939_v52  ;;  %v10269_v30 = vld [vmem:[%s14461_s2 + $0x12c] ss:$24 sps:$4 sm:$0xff]   ;;  %v10267_v31 = vld [vmem:[%s14461_s2 + $0x128] ss:$24 sps:$4 sm:$0xff]  }
 0xd94   :  { %5392 = vmatprep.subr.bf16.mxu1 %v9337_v17  ;;  %5433 = vmatprep.subr.bf16.mxu0 %v9339_v49  ;;  %v4931_v17 = vld [vmem:[%s14459_s1 + $0x38] sm:$0xff]  ;;  %v9296_v49 = vcombine.low %v4934_v12, %v4938_v39  ;;  %v9289_v47 = vcombine.high %v4926_v28, %v4930_v32  ;;  %v10305_v39 = vld [vmem:[%s14461_s2 + $0xc] ss:$24 sps:$4 sm:$0xff]   ;;  %v10303_v52 = vld [vmem:[%s14461_s2 + $0x8] ss:$24 sps:$4 sm:$0xff]  }
 0xd95   :  { %5422 = vmatprep.mubr.bf16.mxu1 %v10810_v3  ;;  %5463 = vmatprep.mubr.bf16.mxu0 %v10810_v3  ;;  %v9291_v29 = vcombine.high %v4927_v46, %v4931_v17  ;;  %v10302_v12 = vld [vmem:[%s14461_s2 + $0x4] ss:$24 sps:$4 sm:$0xff]   ;;  %v10300_v42 = vld [vmem:[%s14461_s2] ss:$24 sps:$4 sm:$0xff]  }
 0xd97   :  { %5393 = vmatpush1.bf16.msra.mxu1 %v9336_v53  ;;  %5434 = vmatpush1.bf16.msra.mxu0 %v9338_v4  ;;  %v9290_v53 = vcombine.low %v4927_v46, %v4931_v17  ;;  %v10260_v4 = vld [vmem:[%s14461_s2 + $0x154] ss:$24 sps:$4 sm:$0xff]  }
 0xd98   :  { %5394 = vmatprep.subr.bf16.mxu1 %v9329_v48  ;;  %5435 = vmatprep.subr.bf16.mxu0 %v9331_v5  ;;  %v10258_v48 = vld [vmem:[%s14461_s2 + $0x150] ss:$24 sps:$4 sm:$0xff]   ;;  %v10263_v5 = vld [vmem:[%s14461_s2 + $0x15c] ss:$24 sps:$4 sm:$0xff]  }
 0xd9b   :  { %5395 = vmatpush1.bf16.msra.mxu1 %v9328_v33  ;;  %5436 = vmatpush1.bf16.msra.mxu0 %v9330_v0  ;;  %v10272_v33 = vld [vmem:[%s14461_s2 + $0xf4] ss:$24 sps:$4 sm:$0xff]   ;;  %v10270_v0 = vld [vmem:[%s14461_s2 + $0xf0] ss:$24 sps:$4 sm:$0xff]  }
 0xd9c   :  { %5396 = vmatprep.subr.bf16.mxu1 %v9321_v36  ;;  %5437 = vmatprep.subr.bf16.mxu0 %v9323_v60  ;;  %v10275_v36 = vld [vmem:[%s14461_s2 + $0xfc] ss:$24 sps:$4 sm:$0xff]   ;;  %v10273_v60 = vld [vmem:[%s14461_s2 + $0xf8] ss:$24 sps:$4 sm:$0xff]  }
 0xd9f   :  { %5397 = vmatpush1.bf16.msra.mxu1 %v9320_v21  ;;  %5438 = vmatpush1.bf16.msra.mxu0 %v9322_v24  ;;  %v10284_v21 = vld [vmem:[%s14461_s2 + $0x94] ss:$24 sps:$4 sm:$0xff]   ;;  %v10282_v24 = vld [vmem:[%s14461_s2 + $0x90] ss:$24 sps:$4 sm:$0xff]  }
 0xda0   :  { %5398 = vmatprep.subr.bf16.mxu1 %v9313_v27  ;;  %5439 = vmatprep.subr.bf16.mxu0 %v9315_v56  ;;  %v10287_v27 = vld [vmem:[%s14461_s2 + $0x9c] ss:$24 sps:$4 sm:$0xff]   ;;  %v10285_v56 = vld [vmem:[%s14461_s2 + $0x98] ss:$24 sps:$4 sm:$0xff]  }
 0xda3   :  { %5399 = vmatpush1.bf16.msra.mxu1 %v9312_v20  ;;  %5440 = vmatpush1.bf16.msra.mxu0 %v9314_v37  ;;  %v10296_v20 = vld [vmem:[%s14461_s2 + $0x34] ss:$24 sps:$4 sm:$0xff]  }
 0xda4   :  { %5400 = vmatprep.subr.bf16.mxu1 %v9305_v15  ;;  %5441 = vmatprep.subr.bf16.mxu0 %v9307_v38  ;;  %v10299_v37 = vld [vmem:[%s14461_s2 + $0x3c] ss:$24 sps:$4 sm:$0xff]   ;;  %v10294_v15 = vld [vmem:[%s14461_s2 + $0x30] ss:$24 sps:$4 sm:$0xff]  }
 0xda5   :  { %v10297_v38 = vld [vmem:[%s14461_s2 + $0x38] ss:$24 sps:$4 sm:$0xff]  }
 0xda7   :  { %5401 = vmatpush1.bf16.msra.mxu1 %v9304_v63  ;;  %5442 = vmatpush1.bf16.msra.mxu0 %v9306_v43  ;;  %v10308_v63 = vld [vmem:[%s14461_s2 + $0x164] ss:$24 sps:$4 sm:$0xff]  }
 0xda8   :  { %5402 = vmatprep.subr.bf16.mxu1 %v9297_v50  ;;  %5443 = vmatprep.subr.bf16.mxu0 %v9299_v55 }
 0xdab   :  { %5403 = vmatpush1.bf16.msra.mxu1 %v9296_v49  ;;  %5444 = vmatpush1.bf16.msra.mxu0 %v9298_v25 }
 0xdac   :  { %5404 = vmatprep.subr.bf16.mxu1 %v9289_v47  ;;  %5445 = vmatprep.subr.bf16.mxu0 %v9291_v29 }
 0xdaf   :  { %5405 = vmatpush1.bf16.msra.mxu1 %v9288_v51  ;;  %5446 = vmatpush1.bf16.msra.mxu0 %v9290_v53 }
 0xdb0   :  { %5793 = vmatprep.subr.bf16.mxu1 %v10260_v4  ;;  %5834 = vmatprep.subr.bf16.mxu0 %v10263_v5 }
 0xdb2   :  { %5423 = vmatmul.mubr.bf16.vlgmr.msra.gmra.mxu1 %v13046_v14  ;;  %5464 = vmatmul.mubr.bf16.vlgmr.msra.gmra.mxu0 %v13046_v14  ;;  %v10261_v14 = vld [vmem:[%s14461_s2 + $0x158] ss:$24 sps:$4 sm:$0xff]  }
 0xdb3   :  { %5825 = vmatprep.mubr.bf16.mxu1 %v10810_v3  ;;  %5866 = vmatprep.mubr.bf16.mxu0 %v10810_v3 }
 0xdb4   :  { %5794 = vmatpush1.bf16.msra.mxu1 %v10258_v48  ;;  %5835 = vmatpush1.bf16.msra.mxu0 %v10261_v14 }
 0xdb5   :  { %5795 = vmatprep.subr.bf16.mxu1 %v10266_v54  ;;  %5836 = vmatprep.subr.bf16.mxu0 %v10269_v30 }
 0xdb8   :  { %5796 = vmatpush1.bf16.msra.mxu1 %v10264_v6  ;;  %5837 = vmatpush1.bf16.msra.mxu0 %v10267_v31 }
 0xdb9   :  { %5797 = vmatprep.subr.bf16.mxu1 %v10272_v33  ;;  %5838 = vmatprep.subr.bf16.mxu0 %v10275_v36 }
 0xdbc   :  { %5798 = vmatpush1.bf16.msra.mxu1 %v10270_v0  ;;  %5839 = vmatpush1.bf16.msra.mxu0 %v10273_v60 }
 0xdbd   :  { %5799 = vmatprep.subr.bf16.mxu1 %v10278_v8  ;;  %5840 = vmatprep.subr.bf16.mxu0 %v10281_v23 }
 0xdc0   :  { %5800 = vmatpush1.bf16.msra.mxu1 %v10276_v58  ;;  %5841 = vmatpush1.bf16.msra.mxu0 %v10279_v26 }
 0xdc1   :  { %5801 = vmatprep.subr.bf16.mxu1 %v10284_v21  ;;  %5842 = vmatprep.subr.bf16.mxu0 %v10287_v27 }
 0xdc4   :  { %5802 = vmatpush1.bf16.msra.mxu1 %v10282_v24  ;;  %5843 = vmatpush1.bf16.msra.mxu0 %v10285_v56 }
 0xdc5   :  { %5803 = vmatprep.subr.bf16.mxu1 %v10290_v41  ;;  %5844 = vmatprep.subr.bf16.mxu0 %v10293_v22 }
 0xdc8   :  { %5804 = vmatpush1.bf16.msra.mxu1 %v10288_v57  ;;  %5845 = vmatpush1.bf16.msra.mxu0 %v10291_v13 }
 0xdc9   :  { %5805 = vmatprep.subr.bf16.mxu1 %v10296_v20  ;;  %5846 = vmatprep.subr.bf16.mxu0 %v10299_v37  ;;  %v10306_v37 = vld [vmem:[%s14461_s2 + $0x160] ss:$24 sps:$4 sm:$0xff]  }
 0xdcc   :  { %5806 = vmatpush1.bf16.msra.mxu1 %v10294_v15  ;;  %5847 = vmatpush1.bf16.msra.mxu0 %v10297_v38  ;;  %v10311_v38 = vld [vmem:[%s14461_s2 + $0x134] ss:$24 sps:$4 sm:$0xff]  }
 0xdcd   :  { %5807 = vmatprep.subr.bf16.mxu1 %v10302_v12  ;;  %5848 = vmatprep.subr.bf16.mxu0 %v10305_v39  ;;  %v10314_v12 = vld [vmem:[%s14461_s2 + $0x104] ss:$24 sps:$4 sm:$0xff]   ;;  %v10312_v39 = vld [vmem:[%s14461_s2 + $0x100] ss:$24 sps:$4 sm:$0xff]  }
 0xdd0   :  { %5808 = vmatpush1.bf16.msra.mxu1 %v10300_v42  ;;  %5849 = vmatpush1.bf16.msra.mxu0 %v10303_v52  ;;  %v10317_v42 = vld [vmem:[%s14461_s2 + $0xd4] ss:$24 sps:$4 sm:$0xff]   ;;  %v10315_v52 = vld [vmem:[%s14461_s2 + $0xd0] ss:$24 sps:$4 sm:$0xff]  }
 0xdd1   :  { %5875 = vmatprep.subr.bf16.mxu1 %v10308_v63  ;;  %v10320_v63 = vld [vmem:[%s14461_s2 + $0xa4] ss:$24 sps:$4 sm:$0xff]  }
 0xe52   :  { %v5342_v43 = vpop.f32.mrf.mxu1  ;;  %v5383_v50 = vpop.f32.mrf.mxu0 }
 0xe53   :  { %v5472_v55 = vadd.f32 %v5342_v43, %v11176_v1  ;;  %v5474_v14 = vadd.f32 %v5383_v50, %v11188_v19  ;;  %v10318_v43 = vld [vmem:[%s14461_s2 + $0xa0] ss:$24 sps:$4 sm:$0xff]   ;;  %v10323_v50 = vld [vmem:[%s14461_s2 + $0x74] ss:$24 sps:$4 sm:$0xff]  }
 0xe54   :  { %v5344_v28 = vpop.f32.mrf.mxu1  ;;  %v5385_v32 = vpop.f32.mrf.mxu0 }
 0xe55   :  { %v5476_v46 = vadd.f32 %v5472_v55, %v12624_v7  ;;  %v5473_v17 = vadd.f32 %v5344_v28, %v11180_v2  ;;  %v5475_v48 = vadd.f32 %v5385_v32, %v11186_v18  ;;  %v5478_v6 = vadd.f32 %v5474_v14, %v12676_v35  ;;  %v10321_v55 = vld [vmem:[%s14461_s2 + $0x70] ss:$24 sps:$4 sm:$0xff]   ;;  %v10326_v28 = vld [vmem:[%s14461_s2 + $0x44] ss:$24 sps:$4 sm:$0xff]   ;;  %v10324_v32 = vld [vmem:[%s14461_s2 + $0x40] ss:$24 sps:$4 sm:$0xff]  }
 0xe56   :  { %v5346_v49 = vpop.f32.mrf.mxu1  ;;  %v5387_v25 = vpop.f32.mrf.mxu0 }
 0xe57   :  { %v9348_v47 = vmul.f32 -1.442695, %v5476_v46  ;;  %v5477_v29 = vadd.f32 %v5473_v17, %v12626_v9  ;;  %v5479_v5 = vadd.f32 %v5475_v48, %v12678_v62  ;;  %v10329_v46 = vld [vmem:[%s14461_s2 + $0x14] ss:$24 sps:$4 sm:$0xff]   ;;  %v10327_v17 = vld [vmem:[%s14461_s2 + $0x10] ss:$24 sps:$4 sm:$0xff]  }
 0xe58   :  { %v5347_v51 = vpop.f32.mrf.mxu1  ;;  %v5388_v53 = vpop.f32.mrf.mxu0 }
 0xe59   :  { %10730 = vpow2.f32 %v9348_v47  ;;  %v9349_v4 = vmul.f32 -1.442695, %v5477_v29  ;;  %v9350_v54 = vmul.f32 -1.442695, %v5479_v5 }
 0xe5b   :  { %10732 = vpow2.f32 %v9349_v4 }
 0xe5c   :  { %10734 = vpow2.f32 %v9350_v54 }
 0xe66   :  { %v10731_v7 = vpop.eup %10730 }
 0xe67   :  { %v5483_v30 = vadd.f32 1.0, %v10731_v7 }
 0xe68   :  { %v10733_v31 = vpop.eup %10732 }
 0xe69   :  { %10736 = vrcp.f32 %v5483_v30  ;;  %v5489_v9 = vadd.f32 1.0, %v10733_v31  ;;  %v10735_v60 = vpop.eup %10734 }
 0xe6a   :  { %10738 = vtanh.f32 %v5478_v6  ;;  %v5496_v21 = vadd.f32 1.0, %v10735_v60 }
 0xe6b   :  { %10740 = vrcp.f32 %v5489_v9 }
 0xe6c   :  { %10742 = vrcp.f32 %v5496_v21 }
 0xe72   :  { %v13241_v33 = vpop.f32.mrf.mxu1  ;;  %v13243_v0 = vpop.f32.mrf.mxu0 }
 0xe74   :  { %v13245_v36 = vpop.f32.mrf.mxu1  ;;  %v13247_v62 = vpop.f32.mrf.mxu0 }
 0xe76   :  { %v10737_v8 = vpop.eup %10736  ;;  %v5428_v58 = vpop.f32.mrf.mxu1 }
 0xe77   :  { %v5469_v23 = vpop.f32.mrf.mxu0  ;;  %v10739_v35 = vpop.eup %10738 }
 0xe78   :  { %v10741_v26 = vpop.eup %10740  ;;  %v5429_v24 = vpop.f32.mrf.mxu1  ;;  %v5500_v56 = vmul.f32 %v10739_v35, %v10737_v8 }
 0xe79   :  { %v5470_v27 = vpop.f32.mrf.mxu0  ;;  %v5499_v41 = vmul.f32 %v10741_v26, %v12575_v59  ;;  %v10743_v57 = vpop.eup %10742  ;;  %v10309_v59 = vld [vmem:[%s14461_s2 + $0x130] ss:$24 sps:$4 sm:$0xff]  }
 0xe7b   :  { %v13250_v22 = vadd.f32 %v5500_v56, %v5499_v41 }
 0xe7d   :  { %10744 = vtanh.f32 %v13250_v22 }
 0xe8a   :  { %v10745_v13 = vpop.eup %10744 }
 0xe8b   :  { %v5503_v20 = vmul.f32 %v10745_v13, %v10743_v57 }
 0xe8d   :  { %v5504_v15 = vpack.c.bf16 %v5503_v20, %v5503_v20 }
 0xe8f   :  { %5826 = vmatmul.mubr.bf16.vlgmr.msra.gmra.mxu1 %v5504_v15  ;;  %5867 = vmatmul.mubr.bf16.vlgmr.msra.gmra.mxu0 %v5504_v15 }
 0xe90   :  { %5876 = vmatpush1.bf16.msra.mxu1 %v10306_v37  ;;  %5907 = vmatprep.mubr.bf16.mxu1 %v10810_v3 }
 0xe91   :  { %5877 = vmatprep.subr.bf16.mxu1 %v10311_v38 }
 0xe94   :  { %5878 = vmatpush1.bf16.msra.mxu1 %v10309_v59 }
 0xe95   :  { %5879 = vmatprep.subr.bf16.mxu1 %v10314_v12 }
 0xe98   :  { %5880 = vmatpush1.bf16.msra.mxu1 %v10312_v39  ;;  %v10330_v39 = vld [vmem:[%s14465_s5 + $0xe0] ss:$16 sps:$4 sm:$0xff]  }
 0xe99   :  { %5881 = vmatprep.subr.bf16.mxu1 %v10317_v42  ;;  %v10332_v42 = vld [vmem:[%s14465_s5 + $0xe4] ss:$16 sps:$4 sm:$0xff]  }
 0xe9a   :  { %6422 = vmatprep.subr.bf16.mxu0 %v10332_v42  ;;  %v10395_v42 = vld [vmem:[%s14465_s5 + $0x1ac] ss:$16 sps:$4 sm:$0xff]  }
 0xe9b   :  { %6423 = vmatpush1.bf16.msra.mxu0 %v10330_v39  ;;  %v10392_v39 = vld [vmem:[%s14465_s5 + $0x1a4] ss:$16 sps:$4 sm:$0xff]  }
 0xe9c   :  { %5882 = vmatpush1.bf16.msra.mxu1 %v10315_v52  ;;  %v10333_v52 = vld [vmem:[%s14465_s5 + $0xe8] ss:$16 sps:$4 sm:$0xff]  }
 0xe9d   :  { %5883 = vmatprep.subr.bf16.mxu1 %v10320_v63  ;;  %v10335_v63 = vld [vmem:[%s14465_s5 + $0xec] ss:$16 sps:$4 sm:$0xff]  }
 0xea0   :  { %5884 = vmatpush1.bf16.msra.mxu1 %v10318_v43  ;;  %v10338_v43 = vld [vmem:[%s14465_s5 + $0xc4] ss:$16 sps:$4 sm:$0xff]  }
 0xea1   :  { %5885 = vmatprep.subr.bf16.mxu1 %v10323_v50  ;;  %v10341_v50 = vld [vmem:[%s14465_s5 + $0xcc] ss:$16 sps:$4 sm:$0xff]   ;;  %6424 = vmatprep.subr.bf16.mxu0 %v10338_v43  ;;  %v10398_v43 = vld [vmem:[%s14465_s5 + $0x184] ss:$16 sps:$4 sm:$0xff]  }
 0xea4   :  { %5886 = vmatpush1.bf16.msra.mxu1 %v10321_v55  ;;  %v10336_v55 = vld [vmem:[%s14465_s5 + $0xc0] ss:$16 sps:$4 sm:$0xff]  }
 0xea5   :  { %5887 = vmatprep.subr.bf16.mxu1 %v10326_v28  ;;  %v10339_v28 = vld [vmem:[%s14465_s5 + $0xc8] ss:$16 sps:$4 sm:$0xff]   ;;  %6425 = vmatpush1.bf16.msra.mxu0 %v10336_v55  ;;  %v10396_v55 = vld [vmem:[%s14465_s5 + $0x180] ss:$16 sps:$4 sm:$0xff]  }
 0xea8   :  { %5888 = vmatpush1.bf16.msra.mxu1 %v10324_v32  ;;  %v10344_v32 = vld [vmem:[%s14465_s5 + $0xa4] ss:$16 sps:$4 sm:$0xff]  }
 0xea9   :  { %5889 = vmatprep.subr.bf16.mxu1 %v10329_v46  ;;  %v10347_v46 = vld [vmem:[%s14465_s5 + $0xac] ss:$16 sps:$4 sm:$0xff]   ;;  %6426 = vmatprep.subr.bf16.mxu0 %v10344_v32  ;;  %v10404_v32 = vld [vmem:[%s14465_s5 + $0x164] ss:$16 sps:$4 sm:$0xff]  }
 0xeac   :  { %5890 = vmatpush1.bf16.msra.mxu1 %v10327_v17  ;;  %v10342_v17 = vld [vmem:[%s14465_s5 + $0xa0] ss:$16 sps:$4 sm:$0xff]  }
 0xead   :  { %6463 = vmatprep.subr.bf16.mxu1 %v10335_v63  ;;  %6427 = vmatpush1.bf16.msra.mxu0 %v10342_v17  ;;  %v10393_v63 = vld [vmem:[%s14465_s5 + $0x1a8] ss:$16 sps:$4 sm:$0xff]   ;;  %v10402_v17 = vld [vmem:[%s14465_s5 + $0x160] ss:$16 sps:$4 sm:$0xff]  }
 0xeaf   :  { %5908 = vmatmul.mubr.bf16.vlgmr.msra.gmra.mxu1 %v5504_v15 }
 0xeb0   :  { %6464 = vmatpush1.bf16.msra.mxu1 %v10333_v52  ;;  %v10390_v52 = vld [vmem:[%s14465_s5 + $0x1a0] ss:$16 sps:$4 sm:$0xff]  }
 0xeb1   :  { %6465 = vmatprep.subr.bf16.mxu1 %v10341_v50  ;;  %v10401_v50 = vld [vmem:[%s14465_s5 + $0x18c] ss:$16 sps:$4 sm:$0xff]  }
 0xeb4   :  { %6466 = vmatpush1.bf16.msra.mxu1 %v10339_v28  ;;  %v10399_v28 = vld [vmem:[%s14465_s5 + $0x188] ss:$16 sps:$4 sm:$0xff]  }
 0xeb5   :  { %6467 = vmatprep.subr.bf16.mxu1 %v10347_v46  ;;  %v10407_v46 = vld [vmem:[%s14465_s5 + $0x16c] ss:$16 sps:$4 sm:$0xff]  }
 0xf4f   :  { %v5827_v49 = vpop.f32.mrf.mxu1  ;;  %v13299_v25 = vpop.f32.mrf.mxu0 }
 0xf50   :  { %v5916_v51 = vadd.f32 %v5827_v49, %v11254_v10  ;;  %v10345_v49 = vld [vmem:[%s14465_s5 + $0xa8] ss:$16 sps:$4 sm:$0xff]  }
 0xf51   :  { %v5829_v47 = vpop.f32.mrf.mxu1  ;;  %v13301_v29 = vpop.f32.mrf.mxu0  ;;  %6468 = vmatpush1.bf16.msra.mxu1 %v10345_v49  ;;  %v10405_v49 = vld [vmem:[%s14465_s5 + $0x168] ss:$16 sps:$4 sm:$0xff]  }
 0xf52   :  { %v5917_v53 = vadd.f32 %v5829_v47, %v11258_v11  ;;  %v10350_v47 = vld [vmem:[%s14465_s5 + $0x84] ss:$16 sps:$4 sm:$0xff]  }
 0xf53   :  { %v5831_v4 = vpop.f32.mrf.mxu1  ;;  %v5872_v48 = vpop.f32.mrf.mxu0  ;;  %6428 = vmatprep.subr.bf16.mxu0 %v10350_v47  ;;  %v10410_v47 = vld [vmem:[%s14465_s5 + $0x144] ss:$16 sps:$4 sm:$0xff]  }
 0xf54   :  { %v5920_v5 = vcombine.low %v5916_v51, %v5917_v53  ;;  %v5921_v14 = vcombine.high %v5916_v51, %v5917_v53  ;;  %v6002_v54 = vmax.f32 %v5916_v51, %v5917_v53  ;;  %v10351_v4 = vld [vmem:[%s14465_s5 + $0x88] ss:$16 sps:$4 sm:$0xff]   ;;  %v10356_v48 = vld [vmem:[%s14465_s5 + $0x64] ss:$16 sps:$4 sm:$0xff]  }
 0xf55   :  { %v5832_v7 = vpop.f32.mrf.mxu1  ;;  %v5873_v6 = vpop.f32.mrf.mxu0 }
 0xf56   :  { %v5928_v30 = vrot.slane %v5920_v5, %v11265_v16  ;;  %v5935_v31 = vrot.slane %v5921_v14, %v11265_v16  ;;  %6003 = vmax.xlane.f32.xlu1 %v6002_v54  ;;  %v10359_v5 = vld [vmem:[%s14465_s5 + $0x6c] ss:$16 sps:$4 sm:$0xff]   ;;  %v10354_v14 = vld [vmem:[%s14465_s5 + $0x60] ss:$16 sps:$4 sm:$0xff]   ;;  %v10357_v54 = vld [vmem:[%s14465_s5 + $0x68] ss:$16 sps:$4 sm:$0xff]  }
 0xf57   :  { %v10362_v7 = vld [vmem:[%s14465_s5 + $0x44] ss:$16 sps:$4 sm:$0xff]   ;;  %v10365_v6 = vld [vmem:[%s14465_s5 + $0x4c] ss:$16 sps:$4 sm:$0xff]  }
 0xf58   :  { %v5936_v9 = vcombine.high %v5928_v30, %v5928_v30  ;;  %v5937_v60 = vcombine.high %v5935_v31, %v5935_v31  ;;  %v5944_v8 = vrot.slane %v5928_v30, %v11265_v16  ;;  %v5951_v58 = vrot.slane %v5935_v31, %v11265_v16  ;;  %v10360_v30 = vld [vmem:[%s14465_s5 + $0x40] ss:$16 sps:$4 sm:$0xff]   ;;  %v10363_v31 = vld [vmem:[%s14465_s5 + $0x48] ss:$16 sps:$4 sm:$0xff]  }
 0xf5a   :  { %v5958_v23 = vrot.slane %v5936_v9, %v11265_v16  ;;  %v5965_v35 = vrot.slane %v5937_v60, %v11265_v16  ;;  %v5966_v26 = vcombine.high %v5944_v8, %v5944_v8  ;;  %v5967_v21 = vcombine.high %v5951_v58, %v5951_v58  ;;  %9399 = vst.msk [vmem:[%s14464_s6 + $0x3] ss:$8 sm:$0x3] %vm11272_vm0, %v5944_v8  ;;  %v10368_v9 = vld [vmem:[%s14465_s5 + $0x24] ss:$16 sps:$4 sm:$0xff]  }
 0xf5b   :  { %9403 = vst.msk [vmem:[%s14464_s6 + $0x43] ss:$8 sm:$0x3] %vm11272_vm0, %v5951_v58  ;;  %v10371_v60 = vld [vmem:[%s14465_s5 + $0x2c] ss:$16 sps:$4 sm:$0xff]  }
 0xf5c   :  { %v5968_v24 = vcombine.high %v5958_v23, %v5958_v23  ;;  %v5969_v27 = vcombine.high %v5965_v35, %v5965_v35  ;;  %9400 = vst.msk [vmem:[%s14464_s6 + $0x13] ss:$8 sm:$0x3] %vm11272_vm0, %v5958_v23  ;;  %9401 = vst.msk [vmem:[%s14464_s6 + $0x23] ss:$8 sm:$0x3] %vm11272_vm0, %v5966_v26 }
 0xf5d   :  { %9404 = vst.msk [vmem:[%s14464_s6 + $0x53] ss:$8 sm:$0x3] %vm11272_vm0, %v5965_v35  ;;  %9405 = vst.msk [vmem:[%s14464_s6 + $0x63] ss:$8 sm:$0x3] %vm11272_vm0, %v5967_v21 }
 0xf5e   :  { %9402 = vst.msk [vmem:[%s14464_s6 + $0x33] ss:$8 sm:$0x3] %vm11272_vm0, %v5968_v24  ;;  %9406 = vst.msk [vmem:[%s14464_s6 + $0x73] ss:$8 sm:$0x3] %vm11272_vm0, %v5969_v27 }
 0xf5f   :  { %v10366_v8 = vld [vmem:[%s14465_s5 + $0x20] ss:$16 sps:$4 sm:$0xff]   ;;  %v10369_v58 = vld [vmem:[%s14465_s5 + $0x28] ss:$16 sps:$4 sm:$0xff]   ;;  %v10374_v23 = vld [vmem:[%s14465_s5 + $0x4] ss:$16 sps:$4 sm:$0xff]  }
 0xf60   :  { %v10377_v35 = vld [vmem:[%s14465_s5 + $0xc] ss:$16 sps:$4 sm:$0xff]   ;;  %v10372_v26 = vld [vmem:[%s14465_s5] ss:$16 sps:$4 sm:$0xff]   ;;  %v10375_v21 = vld [vmem:[%s14465_s5 + $0x8] ss:$16 sps:$4 sm:$0xff]  }
 0xf61   :  { %v10380_v24 = vld [vmem:[%s14465_s5 + $0x1e4] ss:$16 sps:$4 sm:$0xff]   ;;  %v10383_v27 = vld [vmem:[%s14465_s5 + $0x1ec] ss:$16 sps:$4 sm:$0xff]  }
 0xf6f   :  { %v13351_v56 = vpop.f32.mrf.mxu1 }
 0xf71   :  { %v13353_v41 = vpop.f32.mrf.mxu1 }
 0xf73   :  { %v5913_v57 = vpop.f32.mrf.mxu1 }
 0xf74   :  { %v10378_v57 = vld [vmem:[%s14465_s5 + $0x1e0] ss:$16 sps:$4 sm:$0xff]  }
 0xf75   :  { %v5914_v13 = vpop.f32.mrf.mxu1 }
 0xf76   :  { %v10381_v13 = vld [vmem:[%s14465_s5 + $0x1e8] ss:$16 sps:$4 sm:$0xff]  }
 0xfdf   :  { %v6004_v20 = vpop.xlane.xlu1 %6003 }
 0xfe0   :  { %vm6005_vm10 = vcmp.eq.f32.partialorder %v5916_v51, %v6004_v20  ;;  %vm6006_vm11 = vcmp.eq.f32.partialorder %v5917_v53, %v6004_v20  ;;  %v10353_v51 = vld [vmem:[%s14465_s5 + $0x8c] ss:$16 sps:$4 sm:$0xff]   ;;  %v10348_v53 = vld [vmem:[%s14465_s5 + $0x80] ss:$16 sps:$4 sm:$0xff]   ;;  %v10386_v20 = vld [vmem:[%s14465_s5 + $0x1c4] ss:$16 sps:$4 sm:$0xff]  }
 0xfe1   :  { %v6007_v37 = vsel %vm6005_vm10, %v11325_v44, 256  ;;  %v6008_v15 = vsel %vm6006_vm11, %v11328_v45, 256  ;;  %6469 = vmatprep.subr.bf16.mxu1 %v10353_v51  ;;  %6429 = vmatpush1.bf16.msra.mxu0 %v10348_v53  ;;  %v10413_v51 = vld [vmem:[%s14465_s5 + $0x14c] ss:$16 sps:$4 sm:$0xff]   ;;  %v10408_v53 = vld [vmem:[%s14465_s5 + $0x140] ss:$16 sps:$4 sm:$0xff]  }
 0xfe2   :  { %vm6009_vm12 = vcmp.lt.s32.totalorder %v6007_v37, %v6008_v15  ;;  %6470 = vmatpush1.bf16.msra.mxu1 %v10351_v4  ;;  %6430 = vmatprep.subr.bf16.mxu0 %v10356_v48  ;;  %v10411_v4 = vld [vmem:[%s14465_s5 + $0x148] ss:$16 sps:$4 sm:$0xff]   ;;  %v10416_v48 = vld [vmem:[%s14465_s5 + $0x124] ss:$16 sps:$4 sm:$0xff]  }
 0xfe3   :  { %v13357_v38 = vsel %vm6009_vm12, %v6007_v37, %v6008_v15  ;;  %6471 = vmatprep.subr.bf16.mxu1 %v10359_v5  ;;  %v10389_v37 = vld [vmem:[%s14465_s5 + $0x1cc] ss:$16 sps:$4 sm:$0xff]   ;;  %v10384_v15 = vld [vmem:[%s14465_s5 + $0x1c0] ss:$16 sps:$4 sm:$0xff]  }
 0xfe4   :  { %v6012_v59 = vshra.s32 %v13357_v38, 16  ;;  %v10419_v5 = vld [vmem:[%s14465_s5 + $0x12c] ss:$16 sps:$4 sm:$0xff]  }
 0xfe5   :  { %6431 = vmatpush1.bf16.msra.mxu0 %v10354_v14  ;;  %v10414_v14 = vld [vmem:[%s14465_s5 + $0x120] ss:$16 sps:$4 sm:$0xff]  }
 0xfe6   :  { %v13360_v12 = vcvt.s32.f32 %v6012_v59  ;;  %6472 = vmatpush1.bf16.msra.mxu1 %v10357_v54  ;;  %6432 = vmatprep.subr.bf16.mxu0 %v10362_v7  ;;  %v10387_v59 = vld [vmem:[%s14465_s5 + $0x1c8] ss:$16 sps:$4 sm:$0xff]   ;;  %v6011_v7 = vand.u32 65535, %v13357_v38 }
 0xfe7   :  { %6473 = vmatprep.subr.bf16.mxu1 %v10365_v6  ;;  %v10417_v54 = vld [vmem:[%s14465_s5 + $0x128] ss:$16 sps:$4 sm:$0xff]  }
 0xfe8   :  { %6015 = vmin.xlane.f32.xlu0 %v13360_v12  ;;  %v10423_v38 = vld [vmem:[%s14465_s5 + $0x108] ss:$16 sps:$4 sm:$0xff]  }
 0xfe9   :  { %6433 = vmatpush1.bf16.msra.mxu0 %v10360_v30  ;;  %v6013_v30 = vcvt.s32.f32 %v6011_v7 }
 0xfea   :  { %6474 = vmatpush1.bf16.msra.mxu1 %v10363_v31  ;;  %6434 = vmatprep.subr.bf16.mxu0 %v10368_v9  ;;  %v10422_v9 = vld [vmem:[%s14465_s5 + $0x104] ss:$16 sps:$4 sm:$0xff]  }
 0xfeb   :  { %6475 = vmatprep.subr.bf16.mxu1 %v10371_v60  ;;  %v10425_v60 = vld [vmem:[%s14465_s5 + $0x10c] ss:$16 sps:$4 sm:$0xff]  }
 0xfed   :  { %6435 = vmatpush1.bf16.msra.mxu0 %v10366_v8  ;;  %v10420_v8 = vld [vmem:[%s14465_s5 + $0x100] ss:$16 sps:$4 sm:$0xff]  }
 0xfee   :  { %6476 = vmatpush1.bf16.msra.mxu1 %v10369_v58  ;;  %6436 = vmatprep.subr.bf16.mxu0 %v10374_v23 }
 0xfef   :  { %6477 = vmatprep.subr.bf16.mxu1 %v10377_v35 }
 0xff1   :  { %6437 = vmatpush1.bf16.msra.mxu0 %v10372_v26 }
 0xff2   :  { %6478 = vmatpush1.bf16.msra.mxu1 %v10375_v21  ;;  %6438 = vmatprep.subr.bf16.mxu0 %v10380_v24  ;;  %v6589_v21 = vld [vmem:[%s14459_s1 + $0x1c0] sm:$0xff] }
 0xff3   :  { %6479 = vmatprep.subr.bf16.mxu1 %v10383_v27  ;;  %v6593_v24 = vld [vmem:[%s14459_s1 + $0x1e0] sm:$0xff]  ;;  %v6590_v27 = vld [vmem:[%s14459_s1 + $0x1c8] sm:$0xff] }
 0xff5   :  { %6439 = vmatpush2.bf16.msra.mxu0 %v10378_v57  ;;  %v9545_v57 = vcombine.high %v6589_v21, %v6593_v24 }
 0xff6   :  { %6480 = vmatpush2.bf16.msra.mxu1 %v10381_v13  ;;  %6440 = vmatprep.subr.bf16.mxu0 %v10386_v20  ;;  %v6594_v13 = vld [vmem:[%s14459_s1 + $0x1e8] sm:$0xff]  ;;  %v9544_v20 = vcombine.low %v6589_v21, %v6593_v24 }
 0xff7   :  { %6481 = vmatprep.subr.bf16.mxu1 %v10389_v37  ;;  %v9546_v37 = vcombine.low %v6590_v27, %v6594_v13  ;;  %v6550_v24 = vld [vmem:[%s14459_s1 + $0x88] sm:$0xff] }
 0xff9   :  { %6441 = vmatpush2.bf16.msra.mxu0 %v10384_v15  ;;  %v9547_v15 = vcombine.high %v6590_v27, %v6594_v13  ;;  %v6554_v27 = vld [vmem:[%s14459_s1 + $0xa8] sm:$0xff]  ;;  %v6541_v13 = vld [vmem:[%s14459_s1 + $0x40] sm:$0xff] }
 0xffa   :  { %6482 = vmatpush2.bf16.msra.mxu1 %v10387_v59  ;;  %6442 = vmatprep.subr.bf16.mxu0 %v10392_v39  ;;  %v6581_v59 = vld [vmem:[%s14459_s1 + $0x180] sm:$0xff] }
 0xffb   :  { %6483 = vmatprep.subr.bf16.mxu1 %v10395_v42  ;;  %v6585_v39 = vld [vmem:[%s14459_s1 + $0x1a0] sm:$0xff]  ;;  %v6582_v42 = vld [vmem:[%s14459_s1 + $0x188] sm:$0xff] }
 0xffd   :  { %6443 = vmatpush2.bf16.msra.mxu0 %v10390_v52  ;;  %v9537_v52 = vcombine.high %v6581_v59, %v6585_v39 }
 0xffe   :  { %6484 = vmatpush2.bf16.msra.mxu1 %v10393_v63  ;;  %6444 = vmatprep.subr.bf16.mxu0 %v10398_v43  ;;  %v6586_v63 = vld [vmem:[%s14459_s1 + $0x1a8] sm:$0xff]  ;;  %v9536_v43 = vcombine.low %v6581_v59, %v6585_v39  ;;  %v13652_v39 = vld [vmem:[%s14459_s1 + $0x1d0] sm:$0xff] }
 0xfff   :  { %6485 = vmatprep.subr.bf16.mxu1 %v10401_v50  ;;  %v9538_v50 = vcombine.low %v6582_v42, %v6586_v63 }
0x1001   :  { %6445 = vmatpush2.bf16.msra.mxu0 %v10396_v55  ;;  %v9539_v55 = vcombine.high %v6582_v42, %v6586_v63  ;;  %v13657_v42 = vld [vmem:[%s14459_s1 + $0x1f0] sm:$0xff] }
0x1002   :  { %6486 = vmatpush2.bf16.msra.mxu1 %v10399_v28  ;;  %6446 = vmatprep.subr.bf16.mxu0 %v10404_v32  ;;  %v6573_v28 = vld [vmem:[%s14459_s1 + $0x140] sm:$0xff] }
0x1003   :  { %6487 = vmatprep.subr.bf16.mxu1 %v10407_v46  ;;  %v6577_v32 = vld [vmem:[%s14459_s1 + $0x160] sm:$0xff]  ;;  %v6574_v46 = vld [vmem:[%s14459_s1 + $0x148] sm:$0xff] }
0x1005   :  { %6447 = vmatpush2.bf16.msra.mxu0 %v10402_v17  ;;  %v9529_v17 = vcombine.high %v6573_v28, %v6577_v32 }
0x1006   :  { %6488 = vmatpush2.bf16.msra.mxu1 %v10405_v49  ;;  %6448 = vmatprep.subr.bf16.mxu0 %v10410_v47  ;;  %v6578_v49 = vld [vmem:[%s14459_s1 + $0x168] sm:$0xff]  ;;  %v9528_v47 = vcombine.low %v6573_v28, %v6577_v32  ;;  %v6533_v32 = vld [vmem:[%s14459_s1] sm:$0xff] }
0x1007   :  { %6489 = vmatprep.subr.bf16.mxu1 %v10413_v51  ;;  %v9530_v51 = vcombine.low %v6574_v46, %v6578_v49 }
0x1009   :  { %6449 = vmatpush2.bf16.msra.mxu0 %v10408_v53  ;;  %v9531_v53 = vcombine.high %v6574_v46, %v6578_v49  ;;  %v6537_v46 = vld [vmem:[%s14459_s1 + $0x20] sm:$0xff]  ;;  %v6534_v49 = vld [vmem:[%s14459_s1 + $0x8] sm:$0xff] }
0x100a   :  { %6490 = vmatpush2.bf16.msra.mxu1 %v10411_v4  ;;  %6450 = vmatprep.subr.bf16.mxu0 %v10416_v48  ;;  %v6565_v4 = vld [vmem:[%s14459_s1 + $0x100] sm:$0xff] }
0x100b   :  { %6491 = vmatprep.subr.bf16.mxu1 %v10419_v5  ;;  %v6569_v48 = vld [vmem:[%s14459_s1 + $0x120] sm:$0xff]  ;;  %v6566_v5 = vld [vmem:[%s14459_s1 + $0x108] sm:$0xff] }
0x100c   :  { %v9520_v7 = vcombine.low %v6565_v4, %v6569_v48 }
0x100d   :  { %6451 = vmatpush2.bf16.msra.mxu0 %v10414_v14  ;;  %v9521_v14 = vcombine.high %v6565_v4, %v6569_v48  ;;  %v9489_v4 = vcombine.high %v6533_v32, %v6537_v46 }
0x100e   :  { %6492 = vmatpush2.bf16.msra.mxu1 %v10417_v54  ;;  %6452 = vmatprep.subr.bf16.mxu0 %v10422_v9  ;;  %v6570_v54 = vld [vmem:[%s14459_s1 + $0x128] sm:$0xff]  ;;  %v6561_v9 = vld [vmem:[%s14459_s1 + $0xe0] sm:$0xff] }
0x100f   :  { %6493 = vmatprep.subr.bf16.mxu1 %v10425_v60  ;;  %v6558_v60 = vld [vmem:[%s14459_s1 + $0xc8] sm:$0xff] }
0x1011   :  { %6453 = vmatpush2.bf16.msra.mxu0 %v10420_v8 }
0x1012   :  { %6494 = vmatpush2.bf16.msra.mxu1 %v10423_v38  ;;  %6917 = vmatprep.subr.bf16.mxu0 %v9545_v57  ;;  %v9507_v57 = vcombine.high %v6550_v24, %v6554_v27 }
0x1013   :  { %6958 = vmatprep.subr.bf16.mxu1 %v9547_v15  ;;  %v6546_v15 = vld [vmem:[%s14459_s1 + $0x68] sm:$0xff] }
0x1071   :  { %v6016_v6 = vpop.xlane.xlu0 %6015 }
0x1072   :  { %vm6017_vm13 = vcmp.eq.f32.partialorder %v13360_v12, %v6016_v6  ;;  %v6022_v12 = vcvt.f32.s32 %v6016_v6  ;;  %v9522_v6 = vcombine.low %v6566_v5, %v6570_v54 }
0x1073   :  { %v6018_v31 = vsel %vm6017_vm13, %v6013_v30, inf  ;;  %v9523_v30 = vcombine.high %v6566_v5, %v6570_v54  ;;  %v9488_v5 = vcombine.low %v6533_v32, %v6537_v46  ;;  %v9549_v54 = vcombine.high %v13652_v39, %v13657_v42 }
0x1074   :  { %6019 = vmin.xlane.f32.xlu1 %v6018_v31  ;;  %v6023_v23 = vshll.u32 %v6022_v12, 16  ;;  %v6557_v31 = vld [vmem:[%s14459_s1 + $0xc0] sm:$0xff]  ;;  %v6562_v12 = vld [vmem:[%s14459_s1 + $0xe8] sm:$0xff] }
0x1075   :  { %v9512_v8 = vcombine.low %v6557_v31, %v6561_v9  ;;  %v9513_v38 = vcombine.high %v6557_v31, %v6561_v9  ;;  %v9410_v9 = vld [vmem:[%s14460_s0 + $0x88] sm:$0xff] }
0x10fd   :  { %v6020_v58 = vpop.xlane.xlu1 %6019 }
0x10fe   :  { %v6021_v35 = vcvt.f32.s32 %v6020_v58  ;;  %v6549_v58 = vld [vmem:[%s14459_s1 + $0x80] sm:$0xff] }
0x1100   :  { %v6024_v26 = vadd.s32 %v6023_v23, %v6021_v35  ;;  %v6553_v23 = vld [vmem:[%s14459_s1 + $0xa0] sm:$0xff]  ;;  %v9514_v35 = vcombine.low %v6558_v60, %v6562_v12 }
0x1101   :  { %v9505_v21 = vcombine.high %v6549_v58, %v6553_v23  ;;  %v9504_v59 = vcombine.low %v6549_v58, %v6553_v23 }
0x1102   :  { %vm6025_vm14 = vcmp.eq.s32.totalorder %v11325_v44, %v6024_v26  ;;  %vm6026_vm15 = vcmp.eq.s32.totalorder %v11328_v45, %v6024_v26  ;;  %v9515_v26 = vcombine.high %v6558_v60, %v6562_v12 }
0x1103   :  { %vm9479_vm1 = vmpackc.low %vm6025_vm14, %vm6025_vm14 }
0x1104   :  { %vm9477_vm2 = vmpackc.low %vm6026_vm15, %vm6026_vm15 }
0x1105   :  { %9478 = vmatprep.mubr.msk.bf16.mxu0 %vm9477_vm2, %v10812_v34  ;;  %9482 = vmatprep.mubr.msk.bf16.mxu1 %vm9477_vm2, %v10812_v34 }
0x1106   :  { %9480 = vmatmul.mubr.msk.bf16.vlgmr.msra.gmra.mxu0 %vm9479_vm1, %v10812_v34  ;;  %9484 = vmatmul.mubr.msk.bf16.vlgmr.msra.gmra.mxu1 %vm9479_vm1, %v10812_v34 }
0x1107   :  { %6949 = vmatprep.mubr.bf16.mxu0 %v10810_v3  ;;  %6990 = vmatprep.mubr.bf16.mxu1 %v10810_v3 }
0x1108   :  { %6918 = vmatpush1.bf16.msra.mxu0 %v9544_v20  ;;  %6959 = vmatpush1.bf16.msra.mxu1 %v9546_v37  ;;  %v6545_v20 = vld [vmem:[%s14459_s1 + $0x60] sm:$0xff]  ;;  %v6542_v37 = vld [vmem:[%s14459_s1 + $0x48] sm:$0xff] }
0x1109   :  { %6919 = vmatprep.subr.bf16.mxu0 %v9537_v52  ;;  %6960 = vmatprep.subr.bf16.mxu1 %v9539_v55  ;;  %v9506_v52 = vcombine.low %v6550_v24, %v6554_v27  ;;  %v9497_v63 = vcombine.high %v6541_v13, %v6545_v20  ;;  %v13669_v55 = vld [vmem:[%s14459_s1 + $0x1f8] sm:$0xff]  ;;  %v9499_v28 = vcombine.high %v6542_v37, %v6546_v15 }
0x110c   :  { %6920 = vmatpush1.bf16.msra.mxu0 %v9536_v43  ;;  %6961 = vmatpush1.bf16.msra.mxu1 %v9538_v50  ;;  %v9548_v43 = vcombine.low %v13652_v39, %v13657_v42  ;;  %v13664_v50 = vld [vmem:[%s14459_s1 + $0x1d8] sm:$0xff] }
0x110d   :  { %6921 = vmatprep.subr.bf16.mxu0 %v9529_v17  ;;  %6962 = vmatprep.subr.bf16.mxu1 %v9531_v53  ;;  %v9550_v17 = vcombine.low %v13664_v50, %v13669_v55  ;;  %v9498_v53 = vcombine.low %v6542_v37, %v6546_v15  ;;  %v6568_v39 = vld [vmem:[%s14459_s1 + $0x118] sm:$0xff] }
0x110e   :  { %v6572_v42 = vld [vmem:[%s14459_s1 + $0x138] sm:$0xff] }
0x1110   :  { %6922 = vmatpush1.bf16.msra.mxu0 %v9528_v47  ;;  %6963 = vmatpush1.bf16.msra.mxu1 %v9530_v51  ;;  %v6538_v47 = vld [vmem:[%s14459_s1 + $0x28] sm:$0xff]  ;;  %v9496_v51 = vcombine.low %v6541_v13, %v6545_v20  ;;  %v9412_v13 = vld [vmem:[%s14460_s0 + $0x98] sm:$0xff] }
0x1111   :  { %6923 = vmatprep.subr.bf16.mxu0 %v9521_v14  ;;  %6964 = vmatprep.subr.bf16.mxu1 %v9523_v30  ;;  %v9491_v48 = vcombine.high %v6534_v49, %v6538_v47  ;;  %v9490_v14 = vcombine.low %v6534_v49, %v6538_v47 }
0x1114   :  { %6924 = vmatpush1.bf16.msra.mxu0 %v9520_v7  ;;  %6965 = vmatpush1.bf16.msra.mxu1 %v9522_v6  ;;  %v9551_v7 = vcombine.high %v13664_v50, %v13669_v55  ;;  %v9409_v6 = vld [vmem:[%s14460_s0 + $0x80] sm:$0xff] }
0x1115   :  { %6925 = vmatprep.subr.bf16.mxu0 %v9513_v38  ;;  %6966 = vmatprep.subr.bf16.mxu1 %v9515_v26 }
0x1118   :  { %6926 = vmatpush1.bf16.msra.mxu0 %v9512_v8  ;;  %6967 = vmatpush1.bf16.msra.mxu1 %v9514_v35 }
0x1119   :  { %6927 = vmatprep.subr.bf16.mxu0 %v9505_v21  ;;  %6968 = vmatprep.subr.bf16.mxu1 %v9507_v57 }
0x111c   :  { %6928 = vmatpush1.bf16.msra.mxu0 %v9504_v59  ;;  %6969 = vmatpush1.bf16.msra.mxu1 %v9506_v52 }
0x111d   :  { %6929 = vmatprep.subr.bf16.mxu0 %v9497_v63  ;;  %6970 = vmatprep.subr.bf16.mxu1 %v9499_v28 }
0x1120   :  { %6930 = vmatpush1.bf16.msra.mxu0 %v9496_v51  ;;  %6971 = vmatpush1.bf16.msra.mxu1 %v9498_v53 }
0x1121   :  { %6931 = vmatprep.subr.bf16.mxu0 %v9489_v4  ;;  %6972 = vmatprep.subr.bf16.mxu1 %v9491_v48 }
0x1124   :  { %6932 = vmatpush1.bf16.msra.mxu0 %v9488_v5  ;;  %6973 = vmatpush1.bf16.msra.mxu1 %v9490_v14  ;;  %v6583_v5 = vld [vmem:[%s14459_s1 + $0x190] sm:$0xff] }
0x1125   :  { %6999 = vmatprep.subr.bf16.mxu0 %v9549_v54  ;;  %7040 = vmatprep.subr.bf16.mxu1 %v9551_v7  ;;  %v6587_v54 = vld [vmem:[%s14459_s1 + $0x1b0] sm:$0xff]  ;;  %v6584_v7 = vld [vmem:[%s14459_s1 + $0x198] sm:$0xff] }
0x11c6   :  { %v6456_v30 = vpop.f32.mrf.mxu0  ;;  %v6497_v31 = vpop.f32.mrf.mxu1 }
0x11c7   :  { %v6457_v60 = vadd.f32 %v9409_v6, %v6456_v30 }
0x11c8   :  { %v6458_v8 = vpop.f32.mrf.mxu0  ;;  %v6499_v38 = vpop.f32.mrf.mxu1 }
0x11c9   :  { %v6504_v12 = vadd.f32 %v6457_v60, %v13241_v33  ;;  %v6459_v58 = vadd.f32 %v9410_v9, %v6458_v8  ;;  %v6500_v20 = vadd.f32 %v9412_v13, %v6499_v38  ;;  %v9411_v33 = vld [vmem:[%s14460_s0 + $0x90] sm:$0xff]  ;;  %v6576_v38 = vld [vmem:[%s14459_s1 + $0x158] sm:$0xff] }
0x11ca   :  { %v6460_v23 = vpop.f32.mrf.mxu0  ;;  %v6501_v35 = vpop.f32.mrf.mxu1  ;;  %v6498_v15 = vadd.f32 %v9411_v33, %v6497_v31  ;;  %v9541_v31 = vcombine.high %v6583_v5, %v6587_v54  ;;  %v6575_v60 = vld [vmem:[%s14459_s1 + $0x150] sm:$0xff]  ;;  %v6560_v13 = vld [vmem:[%s14459_s1 + $0xd8] sm:$0xff] }
0x11cb   :  { %v9485_v26 = vmul.f32 -1.442695, %v6504_v12  ;;  %v6505_v21 = vadd.f32 %v6459_v58, %v13245_v36  ;;  %v6507_v37 = vadd.f32 %v6500_v20, %v13247_v62  ;;  %v6579_v8 = vld [vmem:[%s14459_s1 + $0x170] sm:$0xff]  ;;  %v6580_v12 = vld [vmem:[%s14459_s1 + $0x178] sm:$0xff]  ;;  %v9540_v58 = vcombine.low %v6583_v5, %v6587_v54 }
0x11cc   :  { %v6461_v24 = vpop.f32.mrf.mxu0  ;;  %v6502_v27 = vpop.f32.mrf.mxu1  ;;  %v6506_v36 = vadd.f32 %v6498_v15, %v13243_v0  ;;  %v9533_v35 = vcombine.high %v6575_v60, %v6579_v8  ;;  %v9534_v50 = vcombine.low %v6576_v38, %v6580_v12  ;;  %v6564_v20 = vld [vmem:[%s14459_s1 + $0xf8] sm:$0xff] }
0x11cd   :  { %10746 = vpow2.f32 %v9485_v26  ;;  %v9486_v57 = vmul.f32 -1.442695, %v6505_v21  ;;  %v9487_v59 = vmul.f32 -1.442695, %v6507_v37  ;;  %v9535_v26 = vcombine.high %v6576_v38, %v6580_v12  ;;  %v6567_v21 = vld [vmem:[%s14459_s1 + $0x110] sm:$0xff] }
0x11ce   :  { %v6571_v24 = vld [vmem:[%s14459_s1 + $0x130] sm:$0xff]  ;;  %v9526_v37 = vcombine.low %v6568_v39, %v6572_v42 }
0x11cf   :  { %10748 = vpow2.f32 %v9486_v57  ;;  %v9525_v55 = vcombine.high %v6567_v21, %v6571_v24  ;;  %v6559_v27 = vld [vmem:[%s14459_s1 + $0xd0] sm:$0xff]  ;;  %v9524_v33 = vcombine.low %v6567_v21, %v6571_v24  ;;  %v10434_v21 = vld [vmem:[%s14461_s2 + $0x124] ss:$24 sps:$4 sm:$0xff]   ;;  %v10432_v24 = vld [vmem:[%s14461_s2 + $0x120] ss:$24 sps:$4 sm:$0xff]  }
0x11d0   :  { %10750 = vpow2.f32 %v9487_v59  ;;  %v6563_v57 = vld [vmem:[%s14459_s1 + $0xf0] sm:$0xff]  ;;  %v9519_v59 = vcombine.high %v6560_v13, %v6564_v20 }
0x11d1   :  { %v9517_v15 = vcombine.high %v6559_v27, %v6563_v57 }
0x11da   :  { %v10747_v52 = vpop.eup %10746 }
0x11db   :  { %v6511_v63 = vadd.f32 1.0, %v10747_v52  ;;  %v6551_v52 = vld [vmem:[%s14459_s1 + $0x90] sm:$0xff] }
0x11dc   :  { %v10749_v28 = vpop.eup %10748 }
0x11dd   :  { %10752 = vrcp.f32 %v6511_v63  ;;  %v6517_v32 = vadd.f32 1.0, %v10749_v28  ;;  %v10751_v46 = vpop.eup %10750  ;;  %v6552_v63 = vld [vmem:[%s14459_s1 + $0x98] sm:$0xff] }
0x11de   :  { %10754 = vtanh.f32 %v6506_v36  ;;  %v6524_v53 = vadd.f32 1.0, %v10751_v46  ;;  %v6555_v36 = vld [vmem:[%s14459_s1 + $0xb0] sm:$0xff]  ;;  %v6556_v28 = vld [vmem:[%s14459_s1 + $0xb8] sm:$0xff]  ;;  %v9518_v46 = vcombine.low %v6560_v13, %v6564_v20  ;;  %v10449_v13 = vld [vmem:[%s14461_s2 + $0xcc] ss:$24 sps:$4 sm:$0xff]  }
0x11df   :  { %10756 = vrcp.f32 %v6517_v32  ;;  %v9516_v32 = vcombine.low %v6559_v27, %v6563_v57  ;;  %v9510_v5 = vcombine.low %v6552_v63, %v6556_v28  ;;  %v10446_v27 = vld [vmem:[%s14461_s2 + $0xc4] ss:$24 sps:$4 sm:$0xff]   ;;  %v10444_v57 = vld [vmem:[%s14461_s2 + $0xc0] ss:$24 sps:$4 sm:$0xff]  }
0x11e0   :  { %10758 = vrcp.f32 %v6524_v53  ;;  %v6547_v53 = vld [vmem:[%s14459_s1 + $0x70] sm:$0xff]  ;;  %v10447_v20 = vld [vmem:[%s14461_s2 + $0xc8] ss:$24 sps:$4 sm:$0xff]  }
0x11ea   :  { %v10753_v49 = vpop.eup %10752 }
0x11eb   :  { %v10755_v47 = vpop.eup %10754 }
0x11ec   :  { %v10757_v51 = vpop.eup %10756  ;;  %v6528_v4 = vmul.f32 %v10755_v47, %v10753_v49  ;;  %v9509_v49 = vcombine.high %v6551_v52, %v6555_v36  ;;  %v9511_v47 = vcombine.high %v6552_v63, %v6556_v28  ;;  %v10456_v63 = vld [vmem:[%s14461_s2 + $0x60] ss:$24 sps:$4 sm:$0xff]  }
0x11ed   :  { %v6527_v62 = vmul.f32 %v10757_v51, %v13031_v40  ;;  %v10759_v0 = vpop.eup %10758  ;;  %v6588_v40 = vld [vmem:[%s14459_s1 + $0x1b8] sm:$0xff]  ;;  %v6543_v51 = vld [vmem:[%s14459_s1 + $0x50] sm:$0xff]  ;;  %v10459_v28 = vld [vmem:[%s14461_s2 + $0x68] ss:$24 sps:$4 sm:$0xff]  }
0x11ee   :  { %v9543_v9 = vcombine.high %v6584_v7, %v6588_v40  ;;  %v9542_v23 = vcombine.low %v6584_v7, %v6588_v40  ;;  %v6535_v7 = vld [vmem:[%s14459_s1 + $0x10] sm:$0xff] }
0x11ef   :  { %v13706_v48 = vadd.f32 %v6528_v4, %v6527_v62  ;;  %v6544_v4 = vld [vmem:[%s14459_s1 + $0x58] sm:$0xff]  ;;  %v6539_v40 = vld [vmem:[%s14459_s1 + $0x30] sm:$0xff] }
0x11f0   :  { %v6548_v62 = vld [vmem:[%s14459_s1 + $0x78] sm:$0xff]  ;;  %v9492_v12 = vcombine.low %v6535_v7, %v6539_v40 }
0x11f1   :  { %10760 = vtanh.f32 %v13706_v48  ;;  %v9503_v54 = vcombine.high %v6544_v4, %v6548_v62 }
0x11fe   :  { %v10761_v14 = vpop.eup %10760 }
0x11ff   :  { %v6531_v6 = vmul.f32 %v10761_v14, %v10759_v0  ;;  %v9508_v0 = vcombine.low %v6551_v52, %v6555_v36  ;;  %v9501_v14 = vcombine.high %v6543_v51, %v6547_v53  ;;  %v10458_v52 = vld [vmem:[%s14461_s2 + $0x64] ss:$24 sps:$4 sm:$0xff]  }
0x1200   :  { %v10461_v36 = vld [vmem:[%s14461_s2 + $0x6c] ss:$24 sps:$4 sm:$0xff]  }
0x1201   :  { %v13721_v30 = vpack.c.bf16 %v6531_v6, %v6531_v6  ;;  %v6536_v6 = vld [vmem:[%s14459_s1 + $0x18] sm:$0xff] }
0x1203   :  { %6950 = vmatmul.mubr.bf16.vlgmr.msra.gmra.mxu0 %v13721_v30  ;;  %6991 = vmatmul.mubr.bf16.vlgmr.msra.gmra.mxu1 %v13721_v30 }
0x1204   :  { %7000 = vmatpush1.bf16.msra.mxu0 %v9548_v43  ;;  %7041 = vmatpush1.bf16.msra.mxu1 %v9550_v17  ;;  %v9532_v43 = vcombine.low %v6575_v60, %v6579_v8  ;;  %v9527_v17 = vcombine.high %v6568_v39, %v6572_v42  ;;  %v9502_v60 = vcombine.low %v6544_v4, %v6548_v62  ;;  %v10437_v39 = vld [vmem:[%s14461_s2 + $0x12c] ss:$24 sps:$4 sm:$0xff]   ;;  %v10435_v42 = vld [vmem:[%s14461_s2 + $0x128] ss:$24 sps:$4 sm:$0xff]  }
0x1205   :  { %7001 = vmatprep.subr.bf16.mxu0 %v9541_v31  ;;  %7042 = vmatprep.subr.bf16.mxu1 %v9543_v9  ;;  %v6540_v31 = vld [vmem:[%s14459_s1 + $0x38] sm:$0xff]  ;;  %v9500_v9 = vcombine.low %v6543_v51, %v6547_v53  ;;  %v9493_v8 = vcombine.high %v6535_v7, %v6539_v40  ;;  %v10473_v53 = vld [vmem:[%s14461_s2 + $0xc] ss:$24 sps:$4 sm:$0xff]   ;;  %v10471_v62 = vld [vmem:[%s14461_s2 + $0x8] ss:$24 sps:$4 sm:$0xff]  }
0x1206   :  { %7031 = vmatprep.mubr.bf16.mxu0 %v10810_v3  ;;  %7072 = vmatprep.mubr.bf16.mxu1 %v10810_v3  ;;  %v9495_v38 = vcombine.high %v6536_v6, %v6540_v31  ;;  %v10470_v51 = vld [vmem:[%s14461_s2 + $0x4] ss:$24 sps:$4 sm:$0xff]   ;;  %v10468_v4 = vld [vmem:[%s14461_s2] ss:$24 sps:$4 sm:$0xff]  }
0x1208   :  { %7002 = vmatpush1.bf16.msra.mxu0 %v9540_v58  ;;  %7043 = vmatpush1.bf16.msra.mxu1 %v9542_v23  ;;  %v9494_v58 = vcombine.low %v6536_v6, %v6540_v31  ;;  %v10428_v23 = vld [vmem:[%s14461_s2 + $0x154] ss:$24 sps:$4 sm:$0xff]  }
0x1209   :  { %7003 = vmatprep.subr.bf16.mxu0 %v9533_v35  ;;  %7044 = vmatprep.subr.bf16.mxu1 %v9535_v26  ;;  %v10426_v35 = vld [vmem:[%s14461_s2 + $0x150] ss:$24 sps:$4 sm:$0xff]   ;;  %v10431_v26 = vld [vmem:[%s14461_s2 + $0x15c] ss:$24 sps:$4 sm:$0xff]  }
0x120c   :  { %7004 = vmatpush1.bf16.msra.mxu0 %v9532_v43  ;;  %7045 = vmatpush1.bf16.msra.mxu1 %v9534_v50  ;;  %v10440_v43 = vld [vmem:[%s14461_s2 + $0xf4] ss:$24 sps:$4 sm:$0xff]   ;;  %v10438_v50 = vld [vmem:[%s14461_s2 + $0xf0] ss:$24 sps:$4 sm:$0xff]  }
0x120d   :  { %7005 = vmatprep.subr.bf16.mxu0 %v9525_v55  ;;  %7046 = vmatprep.subr.bf16.mxu1 %v9527_v17  ;;  %v10443_v55 = vld [vmem:[%s14461_s2 + $0xfc] ss:$24 sps:$4 sm:$0xff]   ;;  %v10441_v17 = vld [vmem:[%s14461_s2 + $0xf8] ss:$24 sps:$4 sm:$0xff]  }
0x1210   :  { %7006 = vmatpush1.bf16.msra.mxu0 %v9524_v33  ;;  %7047 = vmatpush1.bf16.msra.mxu1 %v9526_v37  ;;  %v10452_v33 = vld [vmem:[%s14461_s2 + $0x94] ss:$24 sps:$4 sm:$0xff]   ;;  %v10450_v37 = vld [vmem:[%s14461_s2 + $0x90] ss:$24 sps:$4 sm:$0xff]  }
0x1211   :  { %7007 = vmatprep.subr.bf16.mxu0 %v9517_v15  ;;  %7048 = vmatprep.subr.bf16.mxu1 %v9519_v59  ;;  %v10455_v15 = vld [vmem:[%s14461_s2 + $0x9c] ss:$24 sps:$4 sm:$0xff]   ;;  %v10453_v59 = vld [vmem:[%s14461_s2 + $0x98] ss:$24 sps:$4 sm:$0xff]  }
0x1214   :  { %7008 = vmatpush1.bf16.msra.mxu0 %v9516_v32  ;;  %7049 = vmatpush1.bf16.msra.mxu1 %v9518_v46  ;;  %v10464_v32 = vld [vmem:[%s14461_s2 + $0x34] ss:$24 sps:$4 sm:$0xff]  }
0x1215   :  { %7009 = vmatprep.subr.bf16.mxu0 %v9509_v49  ;;  %7050 = vmatprep.subr.bf16.mxu1 %v9511_v47  ;;  %v10467_v46 = vld [vmem:[%s14461_s2 + $0x3c] ss:$24 sps:$4 sm:$0xff]   ;;  %v10462_v49 = vld [vmem:[%s14461_s2 + $0x30] ss:$24 sps:$4 sm:$0xff]  }
0x1216   :  { %v10465_v47 = vld [vmem:[%s14461_s2 + $0x38] ss:$24 sps:$4 sm:$0xff]  }
0x1218   :  { %7010 = vmatpush1.bf16.msra.mxu0 %v9508_v0  ;;  %7051 = vmatpush1.bf16.msra.mxu1 %v9510_v5  ;;  %v10476_v0 = vld [vmem:[%s14461_s2 + $0x164] ss:$24 sps:$4 sm:$0xff]  }
0x1219   :  { %7011 = vmatprep.subr.bf16.mxu0 %v9501_v14  ;;  %7052 = vmatprep.subr.bf16.mxu1 %v9503_v54 }
0x121c   :  { %7012 = vmatpush1.bf16.msra.mxu0 %v9500_v9  ;;  %7053 = vmatpush1.bf16.msra.mxu1 %v9502_v60 }
0x121d   :  { %7013 = vmatprep.subr.bf16.mxu0 %v9493_v8  ;;  %7054 = vmatprep.subr.bf16.mxu1 %v9495_v38 }
0x1220   :  { %7014 = vmatpush1.bf16.msra.mxu0 %v9492_v12  ;;  %7055 = vmatpush1.bf16.msra.mxu1 %v9494_v58 }
0x1221   :  { %7402 = vmatprep.subr.bf16.mxu0 %v10428_v23  ;;  %7443 = vmatprep.subr.bf16.mxu1 %v10431_v26 }
0x1223   :  { %7032 = vmatmul.mubr.bf16.vlgmr.msra.gmra.mxu0 %v13721_v30  ;;  %7073 = vmatmul.mubr.bf16.vlgmr.msra.gmra.mxu1 %v13721_v30  ;;  %v10429_v30 = vld [vmem:[%s14461_s2 + $0x158] ss:$24 sps:$4 sm:$0xff]  }
0x1224   :  { %7434 = vmatprep.mubr.bf16.mxu0 %v10810_v3  ;;  %7475 = vmatprep.mubr.bf16.mxu1 %v10810_v3 }
0x1225   :  { %7403 = vmatpush1.bf16.msra.mxu0 %v10426_v35  ;;  %7444 = vmatpush1.bf16.msra.mxu1 %v10429_v30 }
0x1226   :  { %7404 = vmatprep.subr.bf16.mxu0 %v10434_v21  ;;  %7445 = vmatprep.subr.bf16.mxu1 %v10437_v39 }
0x1229   :  { %7405 = vmatpush1.bf16.msra.mxu0 %v10432_v24  ;;  %7446 = vmatpush1.bf16.msra.mxu1 %v10435_v42 }
0x122a   :  { %7406 = vmatprep.subr.bf16.mxu0 %v10440_v43  ;;  %7447 = vmatprep.subr.bf16.mxu1 %v10443_v55 }
0x122d   :  { %7407 = vmatpush1.bf16.msra.mxu0 %v10438_v50  ;;  %7448 = vmatpush1.bf16.msra.mxu1 %v10441_v17 }
0x122e   :  { %7408 = vmatprep.subr.bf16.mxu0 %v10446_v27  ;;  %7449 = vmatprep.subr.bf16.mxu1 %v10449_v13 }
0x1231   :  { %7409 = vmatpush1.bf16.msra.mxu0 %v10444_v57  ;;  %7450 = vmatpush1.bf16.msra.mxu1 %v10447_v20 }
0x1232   :  { %7410 = vmatprep.subr.bf16.mxu0 %v10452_v33  ;;  %7451 = vmatprep.subr.bf16.mxu1 %v10455_v15 }
0x1235   :  { %7411 = vmatpush1.bf16.msra.mxu0 %v10450_v37  ;;  %7452 = vmatpush1.bf16.msra.mxu1 %v10453_v59 }
0x1236   :  { %7412 = vmatprep.subr.bf16.mxu0 %v10458_v52  ;;  %7453 = vmatprep.subr.bf16.mxu1 %v10461_v36 }
0x1239   :  { %7413 = vmatpush1.bf16.msra.mxu0 %v10456_v63  ;;  %7454 = vmatpush1.bf16.msra.mxu1 %v10459_v28 }
0x123a   :  { %7414 = vmatprep.subr.bf16.mxu0 %v10464_v32  ;;  %7455 = vmatprep.subr.bf16.mxu1 %v10467_v46  ;;  %v10474_v46 = vld [vmem:[%s14461_s2 + $0x160] ss:$24 sps:$4 sm:$0xff]  }
0x123d   :  { %7415 = vmatpush1.bf16.msra.mxu0 %v10462_v49  ;;  %7456 = vmatpush1.bf16.msra.mxu1 %v10465_v47  ;;  %v10479_v47 = vld [vmem:[%s14461_s2 + $0x134] ss:$24 sps:$4 sm:$0xff]  }
0x123e   :  { %7416 = vmatprep.subr.bf16.mxu0 %v10470_v51  ;;  %7457 = vmatprep.subr.bf16.mxu1 %v10473_v53  ;;  %v10482_v51 = vld [vmem:[%s14461_s2 + $0x104] ss:$24 sps:$4 sm:$0xff]   ;;  %v10480_v53 = vld [vmem:[%s14461_s2 + $0x100] ss:$24 sps:$4 sm:$0xff]  }
0x1241   :  { %7417 = vmatpush1.bf16.msra.mxu0 %v10468_v4  ;;  %7458 = vmatpush1.bf16.msra.mxu1 %v10471_v62  ;;  %v10485_v4 = vld [vmem:[%s14461_s2 + $0xd4] ss:$24 sps:$4 sm:$0xff]   ;;  %v10483_v62 = vld [vmem:[%s14461_s2 + $0xd0] ss:$24 sps:$4 sm:$0xff]  }
0x1242   :  { %7484 = vmatprep.subr.bf16.mxu0 %v10476_v0  ;;  %v10488_v0 = vld [vmem:[%s14461_s2 + $0xa4] ss:$24 sps:$4 sm:$0xff]  }
0x12c3   :  { %v6951_v5 = vpop.f32.mrf.mxu0  ;;  %v6992_v14 = vpop.f32.mrf.mxu1 }
0x12c4   :  { %v7081_v54 = vadd.f32 %v6951_v5, %v11176_v1  ;;  %v7083_v30 = vadd.f32 %v6992_v14, %v11188_v19  ;;  %v10486_v5 = vld [vmem:[%s14461_s2 + $0xa0] ss:$24 sps:$4 sm:$0xff]   ;;  %v10491_v14 = vld [vmem:[%s14461_s2 + $0x74] ss:$24 sps:$4 sm:$0xff]  }
0x12c5   :  { %v6953_v7 = vpop.f32.mrf.mxu0  ;;  %v6994_v40 = vpop.f32.mrf.mxu1 }
0x12c6   :  { %v7085_v6 = vadd.f32 %v7081_v54, %v13299_v25  ;;  %v7082_v31 = vadd.f32 %v6953_v7, %v11180_v2  ;;  %v7084_v35 = vadd.f32 %v6994_v40, %v11186_v18  ;;  %v7087_v24 = vadd.f32 %v7083_v30, %v13351_v56  ;;  %v10489_v54 = vld [vmem:[%s14461_s2 + $0x70] ss:$24 sps:$4 sm:$0xff]   ;;  %v10494_v7 = vld [vmem:[%s14461_s2 + $0x44] ss:$24 sps:$4 sm:$0xff]   ;;  %v10492_v40 = vld [vmem:[%s14461_s2 + $0x40] ss:$24 sps:$4 sm:$0xff]  }
0x12c7   :  { %v6955_v9 = vpop.f32.mrf.mxu0  ;;  %v6996_v60 = vpop.f32.mrf.mxu1 }
0x12c8   :  { %v9552_v8 = vmul.f32 -1.442695, %v7085_v6  ;;  %v7086_v38 = vadd.f32 %v7082_v31, %v13301_v29  ;;  %v7088_v26 = vadd.f32 %v7084_v35, %v13353_v41  ;;  %v10497_v6 = vld [vmem:[%s14461_s2 + $0x14] ss:$24 sps:$4 sm:$0xff]   ;;  %v10495_v31 = vld [vmem:[%s14461_s2 + $0x10] ss:$24 sps:$4 sm:$0xff]  }
0x12c9   :  { %v6956_v12 = vpop.f32.mrf.mxu0  ;;  %v6997_v58 = vpop.f32.mrf.mxu1 }
0x12ca   :  { %10762 = vpow2.f32 %v9552_v8  ;;  %v9553_v23 = vmul.f32 -1.442695, %v7086_v38  ;;  %v9554_v21 = vmul.f32 -1.442695, %v7088_v26 }
0x12cc   :  { %10764 = vpow2.f32 %v9553_v23 }
0x12cd   :  { %10766 = vpow2.f32 %v9554_v21 }
0x12d7   :  { %v10763_v25 = vpop.eup %10762 }
0x12d8   :  { %v7092_v39 = vadd.f32 1.0, %v10763_v25 }
0x12d9   :  { %v10765_v42 = vpop.eup %10764 }
0x12da   :  { %10768 = vrcp.f32 %v7092_v39  ;;  %v7098_v29 = vadd.f32 1.0, %v10765_v42  ;;  %v10767_v17 = vpop.eup %10766 }
0x12db   :  { %10770 = vtanh.f32 %v7087_v24  ;;  %v7105_v33 = vadd.f32 1.0, %v10767_v17 }
0x12dc   :  { %10772 = vrcp.f32 %v7098_v29 }
0x12dd   :  { %10774 = vrcp.f32 %v7105_v33 }
0x12e3   :  { %v13916_v43 = vpop.f32.mrf.mxu0  ;;  %v13918_v50 = vpop.f32.mrf.mxu1 }
0x12e5   :  { %v13920_v55 = vpop.f32.mrf.mxu0  ;;  %v13922_v41 = vpop.f32.mrf.mxu1 }
0x12e7   :  { %v10769_v27 = vpop.eup %10768  ;;  %v7037_v57 = vpop.f32.mrf.mxu0 }
0x12e8   :  { %v7078_v13 = vpop.f32.mrf.mxu1  ;;  %v10771_v56 = vpop.eup %10770 }
0x12e9   :  { %v10773_v20 = vpop.eup %10772  ;;  %v7038_v37 = vpop.f32.mrf.mxu0  ;;  %v7109_v59 = vmul.f32 %v10771_v56, %v10769_v27 }
0x12ea   :  { %v7079_v15 = vpop.f32.mrf.mxu1  ;;  %v7108_v52 = vmul.f32 %v10773_v20, %v13250_v22  ;;  %v10775_v63 = vpop.eup %10774  ;;  %v10477_v22 = vld [vmem:[%s14461_s2 + $0x130] ss:$24 sps:$4 sm:$0xff]  }
0x12ec   :  { %v13925_v36 = vadd.f32 %v7109_v59, %v7108_v52 }
0x12ee   :  { %10776 = vtanh.f32 %v13925_v36 }
0x12fb   :  { %v10777_v28 = vpop.eup %10776 }
0x12fc   :  { %v7112_v32 = vmul.f32 %v10777_v28, %v10775_v63 }
0x12fe   :  { %v7113_v49 = vpack.c.bf16 %v7112_v32, %v7112_v32 }
0x1300   :  { %7435 = vmatmul.mubr.bf16.vlgmr.msra.gmra.mxu0 %v7113_v49  ;;  %7476 = vmatmul.mubr.bf16.vlgmr.msra.gmra.mxu1 %v7113_v49 }
0x1301   :  { %7485 = vmatpush1.bf16.msra.mxu0 %v10474_v46  ;;  %7516 = vmatprep.mubr.bf16.mxu0 %v10810_v3 }
0x1302   :  { %7486 = vmatprep.subr.bf16.mxu0 %v10479_v47 }
0x1305   :  { %7487 = vmatpush1.bf16.msra.mxu0 %v10477_v22 }
0x1306   :  { %7488 = vmatprep.subr.bf16.mxu0 %v10482_v51 }
0x1309   :  { %7489 = vmatpush1.bf16.msra.mxu0 %v10480_v53  ;;  %v10498_v53 = vld [vmem:[%s14465_s5 + $0xe0] ss:$16 sps:$4 sm:$0xff]  }
0x130a   :  { %7490 = vmatprep.subr.bf16.mxu0 %v10485_v4  ;;  %v10500_v4 = vld [vmem:[%s14465_s5 + $0xe4] ss:$16 sps:$4 sm:$0xff]  }
0x130b   :  { %8031 = vmatprep.subr.bf16.mxu1 %v10500_v4  ;;  %v10563_v4 = vld [vmem:[%s14465_s5 + $0x1ac] ss:$16 sps:$4 sm:$0xff]  }
0x130c   :  { %8032 = vmatpush1.bf16.msra.mxu1 %v10498_v53  ;;  %v10560_v53 = vld [vmem:[%s14465_s5 + $0x1a4] ss:$16 sps:$4 sm:$0xff]  }
0x130d   :  { %7491 = vmatpush1.bf16.msra.mxu0 %v10483_v62  ;;  %v10501_v62 = vld [vmem:[%s14465_s5 + $0xe8] ss:$16 sps:$4 sm:$0xff]  }
0x130e   :  { %7492 = vmatprep.subr.bf16.mxu0 %v10488_v0  ;;  %v10503_v0 = vld [vmem:[%s14465_s5 + $0xec] ss:$16 sps:$4 sm:$0xff]  }
0x1311   :  { %7493 = vmatpush1.bf16.msra.mxu0 %v10486_v5  ;;  %v10506_v5 = vld [vmem:[%s14465_s5 + $0xc4] ss:$16 sps:$4 sm:$0xff]  }
0x1312   :  { %7494 = vmatprep.subr.bf16.mxu0 %v10491_v14  ;;  %v10509_v14 = vld [vmem:[%s14465_s5 + $0xcc] ss:$16 sps:$4 sm:$0xff]   ;;  %8033 = vmatprep.subr.bf16.mxu1 %v10506_v5  ;;  %v10566_v5 = vld [vmem:[%s14465_s5 + $0x184] ss:$16 sps:$4 sm:$0xff]  }
0x1315   :  { %7495 = vmatpush1.bf16.msra.mxu0 %v10489_v54  ;;  %v10504_v54 = vld [vmem:[%s14465_s5 + $0xc0] ss:$16 sps:$4 sm:$0xff]  }
0x1316   :  { %7496 = vmatprep.subr.bf16.mxu0 %v10494_v7  ;;  %v10507_v7 = vld [vmem:[%s14465_s5 + $0xc8] ss:$16 sps:$4 sm:$0xff]   ;;  %8034 = vmatpush1.bf16.msra.mxu1 %v10504_v54  ;;  %v10564_v54 = vld [vmem:[%s14465_s5 + $0x180] ss:$16 sps:$4 sm:$0xff]  }
0x1319   :  { %7497 = vmatpush1.bf16.msra.mxu0 %v10492_v40  ;;  %v10512_v40 = vld [vmem:[%s14465_s5 + $0xa4] ss:$16 sps:$4 sm:$0xff]  }
0x131a   :  { %7498 = vmatprep.subr.bf16.mxu0 %v10497_v6  ;;  %v10515_v6 = vld [vmem:[%s14465_s5 + $0xac] ss:$16 sps:$4 sm:$0xff]   ;;  %8035 = vmatprep.subr.bf16.mxu1 %v10512_v40  ;;  %v10572_v40 = vld [vmem:[%s14465_s5 + $0x164] ss:$16 sps:$4 sm:$0xff]  }
0x131d   :  { %7499 = vmatpush1.bf16.msra.mxu0 %v10495_v31  ;;  %v10510_v31 = vld [vmem:[%s14465_s5 + $0xa0] ss:$16 sps:$4 sm:$0xff]  }
0x131e   :  { %8072 = vmatprep.subr.bf16.mxu0 %v10503_v0  ;;  %8036 = vmatpush1.bf16.msra.mxu1 %v10510_v31  ;;  %v10561_v0 = vld [vmem:[%s14465_s5 + $0x1a8] ss:$16 sps:$4 sm:$0xff]   ;;  %v10570_v31 = vld [vmem:[%s14465_s5 + $0x160] ss:$16 sps:$4 sm:$0xff]  }
0x1320   :  { %7517 = vmatmul.mubr.bf16.vlgmr.msra.gmra.mxu0 %v7113_v49 }
0x1321   :  { %8073 = vmatpush1.bf16.msra.mxu0 %v10501_v62  ;;  %v10558_v62 = vld [vmem:[%s14465_s5 + $0x1a0] ss:$16 sps:$4 sm:$0xff]  }
0x1322   :  { %8074 = vmatprep.subr.bf16.mxu0 %v10509_v14  ;;  %v10569_v14 = vld [vmem:[%s14465_s5 + $0x18c] ss:$16 sps:$4 sm:$0xff]  }
0x1325   :  { %8075 = vmatpush1.bf16.msra.mxu0 %v10507_v7  ;;  %v10567_v7 = vld [vmem:[%s14465_s5 + $0x188] ss:$16 sps:$4 sm:$0xff]  }
0x1326   :  { %8076 = vmatprep.subr.bf16.mxu0 %v10515_v6  ;;  %v10575_v6 = vld [vmem:[%s14465_s5 + $0x16c] ss:$16 sps:$4 sm:$0xff]  }
0x13c0   :  { %v7436_v9 = vpop.f32.mrf.mxu0  ;;  %v13974_v60 = vpop.f32.mrf.mxu1 }
0x13c1   :  { %v7525_v12 = vadd.f32 %v7436_v9, %v11254_v10  ;;  %v10513_v9 = vld [vmem:[%s14465_s5 + $0xa8] ss:$16 sps:$4 sm:$0xff]  }
0x13c2   :  { %v7438_v8 = vpop.f32.mrf.mxu0  ;;  %v13976_v38 = vpop.f32.mrf.mxu1  ;;  %8077 = vmatpush1.bf16.msra.mxu0 %v10513_v9  ;;  %v10573_v9 = vld [vmem:[%s14465_s5 + $0x168] ss:$16 sps:$4 sm:$0xff]  }
0x13c3   :  { %v7526_v58 = vadd.f32 %v7438_v8, %v11258_v11  ;;  %v10518_v8 = vld [vmem:[%s14465_s5 + $0x84] ss:$16 sps:$4 sm:$0xff]  }
0x13c4   :  { %v7440_v23 = vpop.f32.mrf.mxu0  ;;  %v7481_v35 = vpop.f32.mrf.mxu1  ;;  %8037 = vmatprep.subr.bf16.mxu1 %v10518_v8  ;;  %v10578_v8 = vld [vmem:[%s14465_s5 + $0x144] ss:$16 sps:$4 sm:$0xff]  }
0x13c5   :  { %v7529_v26 = vcombine.low %v7525_v12, %v7526_v58  ;;  %v7530_v30 = vcombine.high %v7525_v12, %v7526_v58  ;;  %v7611_v21 = vmax.f32 %v7525_v12, %v7526_v58  ;;  %v10519_v23 = vld [vmem:[%s14465_s5 + $0x88] ss:$16 sps:$4 sm:$0xff]   ;;  %v10524_v35 = vld [vmem:[%s14465_s5 + $0x64] ss:$16 sps:$4 sm:$0xff]  }
0x13c6   :  { %v7441_v25 = vpop.f32.mrf.mxu0  ;;  %v7482_v24 = vpop.f32.mrf.mxu1 }
0x13c7   :  { %v7537_v39 = vrot.slane %v7529_v26, %v11265_v16  ;;  %v7544_v42 = vrot.slane %v7530_v30, %v11265_v16  ;;  %7612 = vmax.xlane.f32.xlu0 %v7611_v21  ;;  %v10527_v26 = vld [vmem:[%s14465_s5 + $0x6c] ss:$16 sps:$4 sm:$0xff]   ;;  %v10522_v30 = vld [vmem:[%s14465_s5 + $0x60] ss:$16 sps:$4 sm:$0xff]   ;;  %v10525_v21 = vld [vmem:[%s14465_s5 + $0x68] ss:$16 sps:$4 sm:$0xff]  }
0x13c8   :  { %v10530_v25 = vld [vmem:[%s14465_s5 + $0x44] ss:$16 sps:$4 sm:$0xff]   ;;  %v10533_v24 = vld [vmem:[%s14465_s5 + $0x4c] ss:$16 sps:$4 sm:$0xff]  }
0x13c9   :  { %v7545_v29 = vcombine.high %v7537_v39, %v7537_v39  ;;  %v7546_v17 = vcombine.high %v7544_v42, %v7544_v42  ;;  %v7553_v27 = vrot.slane %v7537_v39, %v11265_v16  ;;  %v7560_v57 = vrot.slane %v7544_v42, %v11265_v16  ;;  %v10528_v39 = vld [vmem:[%s14465_s5 + $0x40] ss:$16 sps:$4 sm:$0xff]   ;;  %v10531_v42 = vld [vmem:[%s14465_s5 + $0x48] ss:$16 sps:$4 sm:$0xff]  }
0x13cb   :  { %v7567_v13 = vrot.slane %v7545_v29, %v11265_v16  ;;  %v7574_v56 = vrot.slane %v7546_v17, %v11265_v16  ;;  %v7575_v20 = vcombine.high %v7553_v27, %v7553_v27  ;;  %v7576_v33 = vcombine.high %v7560_v57, %v7560_v57  ;;  %9603 = vst.msk [vmem:[%s14464_s6 + $0x4] ss:$8 sm:$0x3] %vm11272_vm0, %v7553_v27  ;;  %v10536_v29 = vld [vmem:[%s14465_s5 + $0x24] ss:$16 sps:$4 sm:$0xff]  }
0x13cc   :  { %9607 = vst.msk [vmem:[%s14464_s6 + $0x44] ss:$8 sm:$0x3] %vm11272_vm0, %v7560_v57  ;;  %v10539_v17 = vld [vmem:[%s14465_s5 + $0x2c] ss:$16 sps:$4 sm:$0xff]  }
0x13cd   :  { %v7577_v37 = vcombine.high %v7567_v13, %v7567_v13  ;;  %v7578_v15 = vcombine.high %v7574_v56, %v7574_v56  ;;  %9604 = vst.msk [vmem:[%s14464_s6 + $0x14] ss:$8 sm:$0x3] %vm11272_vm0, %v7567_v13  ;;  %9605 = vst.msk [vmem:[%s14464_s6 + $0x24] ss:$8 sm:$0x3] %vm11272_vm0, %v7575_v20 }
0x13ce   :  { %9608 = vst.msk [vmem:[%s14464_s6 + $0x54] ss:$8 sm:$0x3] %vm11272_vm0, %v7574_v56  ;;  %9609 = vst.msk [vmem:[%s14464_s6 + $0x64] ss:$8 sm:$0x3] %vm11272_vm0, %v7576_v33 }
0x13cf   :  { %9606 = vst.msk [vmem:[%s14464_s6 + $0x34] ss:$8 sm:$0x3] %vm11272_vm0, %v7577_v37  ;;  %9610 = vst.msk [vmem:[%s14464_s6 + $0x74] ss:$8 sm:$0x3] %vm11272_vm0, %v7578_v15 }
0x13d0   :  { %v10534_v27 = vld [vmem:[%s14465_s5 + $0x20] ss:$16 sps:$4 sm:$0xff]   ;;  %v10537_v57 = vld [vmem:[%s14465_s5 + $0x28] ss:$16 sps:$4 sm:$0xff]   ;;  %v10542_v13 = vld [vmem:[%s14465_s5 + $0x4] ss:$16 sps:$4 sm:$0xff]  }
0x13d1   :  { %v10545_v56 = vld [vmem:[%s14465_s5 + $0xc] ss:$16 sps:$4 sm:$0xff]   ;;  %v10540_v20 = vld [vmem:[%s14465_s5] ss:$16 sps:$4 sm:$0xff]   ;;  %v10543_v33 = vld [vmem:[%s14465_s5 + $0x8] ss:$16 sps:$4 sm:$0xff]  }
0x13d2   :  { %v10548_v37 = vld [vmem:[%s14465_s5 + $0x1e4] ss:$16 sps:$4 sm:$0xff]   ;;  %v10551_v15 = vld [vmem:[%s14465_s5 + $0x1ec] ss:$16 sps:$4 sm:$0xff]  }
0x13e0   :  { %v14026_v59 = vpop.f32.mrf.mxu0 }
0x13e2   :  { %v14028_v52 = vpop.f32.mrf.mxu0 }
0x13e4   :  { %v7522_v63 = vpop.f32.mrf.mxu0 }
0x13e5   :  { %v10546_v63 = vld [vmem:[%s14465_s5 + $0x1e0] ss:$16 sps:$4 sm:$0xff]  }
0x13e6   :  { %v7523_v28 = vpop.f32.mrf.mxu0 }
0x13e7   :  { %v10549_v28 = vld [vmem:[%s14465_s5 + $0x1e8] ss:$16 sps:$4 sm:$0xff]  }
0x1450   :  { %v7613_v32 = vpop.xlane.xlu0 %7612 }
0x1451   :  { %vm7614_vm3 = vcmp.eq.f32.partialorder %v7525_v12, %v7613_v32  ;;  %vm7615_vm4 = vcmp.eq.f32.partialorder %v7526_v58, %v7613_v32  ;;  %v10521_v12 = vld [vmem:[%s14465_s5 + $0x8c] ss:$16 sps:$4 sm:$0xff]   ;;  %v10516_v58 = vld [vmem:[%s14465_s5 + $0x80] ss:$16 sps:$4 sm:$0xff]   ;;  %v10554_v32 = vld [vmem:[%s14465_s5 + $0x1c4] ss:$16 sps:$4 sm:$0xff]  }
0x1452   :  { %v7616_v46 = vsel %vm7614_vm3, %v11325_v44, 256  ;;  %v7617_v49 = vsel %vm7615_vm4, %v11328_v45, 256  ;;  %8078 = vmatprep.subr.bf16.mxu0 %v10521_v12  ;;  %8038 = vmatpush1.bf16.msra.mxu1 %v10516_v58  ;;  %v10581_v12 = vld [vmem:[%s14465_s5 + $0x14c] ss:$16 sps:$4 sm:$0xff]   ;;  %v10576_v58 = vld [vmem:[%s14465_s5 + $0x140] ss:$16 sps:$4 sm:$0xff]  }
0x1453   :  { %vm7618_vm5 = vcmp.lt.s32.totalorder %v7616_v46, %v7617_v49  ;;  %8079 = vmatpush1.bf16.msra.mxu0 %v10519_v23  ;;  %8039 = vmatprep.subr.bf16.mxu1 %v10524_v35  ;;  %v10579_v23 = vld [vmem:[%s14465_s5 + $0x148] ss:$16 sps:$4 sm:$0xff]   ;;  %v10584_v35 = vld [vmem:[%s14465_s5 + $0x124] ss:$16 sps:$4 sm:$0xff]  }
0x1454   :  { %v14032_v47 = vsel %vm7618_vm5, %v7616_v46, %v7617_v49  ;;  %8080 = vmatprep.subr.bf16.mxu0 %v10527_v26  ;;  %v10557_v46 = vld [vmem:[%s14465_s5 + $0x1cc] ss:$16 sps:$4 sm:$0xff]   ;;  %v10552_v49 = vld [vmem:[%s14465_s5 + $0x1c0] ss:$16 sps:$4 sm:$0xff]  }
0x1455   :  { %v7621_v22 = vshra.s32 %v14032_v47, 16  ;;  %v10587_v26 = vld [vmem:[%s14465_s5 + $0x12c] ss:$16 sps:$4 sm:$0xff]  }
0x1456   :  { %8040 = vmatpush1.bf16.msra.mxu1 %v10522_v30  ;;  %v10582_v30 = vld [vmem:[%s14465_s5 + $0x120] ss:$16 sps:$4 sm:$0xff]  }
0x1457   :  { %v14035_v51 = vcvt.s32.f32 %v7621_v22  ;;  %8081 = vmatpush1.bf16.msra.mxu0 %v10525_v21  ;;  %8041 = vmatprep.subr.bf16.mxu1 %v10530_v25  ;;  %v10555_v22 = vld [vmem:[%s14465_s5 + $0x1c8] ss:$16 sps:$4 sm:$0xff]   ;;  %v7620_v25 = vand.u32 65535, %v14032_v47 }
0x1458   :  { %8082 = vmatprep.subr.bf16.mxu0 %v10533_v24  ;;  %v10585_v21 = vld [vmem:[%s14465_s5 + $0x128] ss:$16 sps:$4 sm:$0xff]  }
0x1459   :  { %7624 = vmin.xlane.f32.xlu1 %v14035_v51  ;;  %v10591_v47 = vld [vmem:[%s14465_s5 + $0x108] ss:$16 sps:$4 sm:$0xff]  }
0x145a   :  { %8042 = vmatpush1.bf16.msra.mxu1 %v10528_v39  ;;  %v7622_v39 = vcvt.s32.f32 %v7620_v25 }
0x145b   :  { %8083 = vmatpush1.bf16.msra.mxu0 %v10531_v42  ;;  %8043 = vmatprep.subr.bf16.mxu1 %v10536_v29  ;;  %v10590_v29 = vld [vmem:[%s14465_s5 + $0x104] ss:$16 sps:$4 sm:$0xff]  }
0x145c   :  { %8084 = vmatprep.subr.bf16.mxu0 %v10539_v17  ;;  %v10593_v17 = vld [vmem:[%s14465_s5 + $0x10c] ss:$16 sps:$4 sm:$0xff]  }
0x145e   :  { %8044 = vmatpush1.bf16.msra.mxu1 %v10534_v27  ;;  %v10588_v27 = vld [vmem:[%s14465_s5 + $0x100] ss:$16 sps:$4 sm:$0xff]  }
0x145f   :  { %8085 = vmatpush1.bf16.msra.mxu0 %v10537_v57  ;;  %8045 = vmatprep.subr.bf16.mxu1 %v10542_v13 }
0x1460   :  { %8086 = vmatprep.subr.bf16.mxu0 %v10545_v56 }
0x1462   :  { %8046 = vmatpush1.bf16.msra.mxu1 %v10540_v20 }
0x1463   :  { %8087 = vmatpush1.bf16.msra.mxu0 %v10543_v33  ;;  %8047 = vmatprep.subr.bf16.mxu1 %v10548_v37  ;;  %v8171_v33 = vld [vmem:[%s14459_s1 + $0x1c8] sm:$0xff] }
0x1464   :  { %8088 = vmatprep.subr.bf16.mxu0 %v10551_v15 }
0x1466   :  { %8048 = vmatpush2.bf16.msra.mxu1 %v10546_v63 }
0x1467   :  { %8089 = vmatpush2.bf16.msra.mxu0 %v10549_v28  ;;  %8049 = vmatprep.subr.bf16.mxu1 %v10554_v32  ;;  %v8166_v32 = vld [vmem:[%s14459_s1 + $0x180] sm:$0xff] }
0x1468   :  { %8090 = vmatprep.subr.bf16.mxu0 %v10557_v46  ;;  %v8168_v46 = vld [vmem:[%s14459_s1 + $0x1a0] sm:$0xff] }
0x146a   :  { %8050 = vmatpush2.bf16.msra.mxu1 %v10552_v49  ;;  %v8167_v49 = vld [vmem:[%s14459_s1 + $0x188] sm:$0xff] }
0x146b   :  { %8091 = vmatpush2.bf16.msra.mxu0 %v10555_v22  ;;  %8051 = vmatprep.subr.bf16.mxu1 %v10560_v53  ;;  %v9717_v22 = vcombine.high %v8166_v32, %v8168_v46  ;;  %v8169_v53 = vld [vmem:[%s14459_s1 + $0x1a8] sm:$0xff] }
0x146c   :  { %8092 = vmatprep.subr.bf16.mxu0 %v10563_v4  ;;  %v9716_v4 = vcombine.low %v8166_v32, %v8168_v46  ;;  %v8142_v46 = vld [vmem:[%s14459_s1] sm:$0xff] }
0x146e   :  { %8052 = vmatpush2.bf16.msra.mxu1 %v10558_v62  ;;  %v9718_v62 = vcombine.low %v8167_v49, %v8169_v53 }
0x146f   :  { %8093 = vmatpush2.bf16.msra.mxu0 %v10561_v0  ;;  %8053 = vmatprep.subr.bf16.mxu1 %v10566_v5  ;;  %v9719_v0 = vcombine.high %v8167_v49, %v8169_v53  ;;  %v8162_v5 = vld [vmem:[%s14459_s1 + $0x140] sm:$0xff]  ;;  %v8145_v53 = vld [vmem:[%s14459_s1 + $0x28] sm:$0xff] }
0x1470   :  { %8094 = vmatprep.subr.bf16.mxu0 %v10569_v14  ;;  %v8164_v14 = vld [vmem:[%s14459_s1 + $0x160] sm:$0xff] }
0x1471   :  { %v8144_v49 = vld [vmem:[%s14459_s1 + $0x20] sm:$0xff] }
0x1472   :  { %8054 = vmatpush2.bf16.msra.mxu1 %v10564_v54  ;;  %v8163_v54 = vld [vmem:[%s14459_s1 + $0x148] sm:$0xff] }
0x1473   :  { %8095 = vmatpush2.bf16.msra.mxu0 %v10567_v7  ;;  %8055 = vmatprep.subr.bf16.mxu1 %v10572_v40  ;;  %v9713_v7 = vcombine.high %v8162_v5, %v8164_v14  ;;  %v8165_v40 = vld [vmem:[%s14459_s1 + $0x168] sm:$0xff] }
0x1474   :  { %8096 = vmatprep.subr.bf16.mxu0 %v10575_v6  ;;  %v9712_v6 = vcombine.low %v8162_v5, %v8164_v14  ;;  %v9692_v14 = vcombine.low %v8142_v46, %v8144_v49 }
0x1476   :  { %8056 = vmatpush2.bf16.msra.mxu1 %v10570_v31  ;;  %v9714_v31 = vcombine.low %v8163_v54, %v8165_v40 }
0x1477   :  { %8097 = vmatpush2.bf16.msra.mxu0 %v10573_v9  ;;  %8057 = vmatprep.subr.bf16.mxu1 %v10578_v8  ;;  %v9715_v9 = vcombine.high %v8163_v54, %v8165_v40  ;;  %v8158_v8 = vld [vmem:[%s14459_s1 + $0x100] sm:$0xff] }
0x1478   :  { %8098 = vmatprep.subr.bf16.mxu0 %v10581_v12  ;;  %v8160_v12 = vld [vmem:[%s14459_s1 + $0x120] sm:$0xff] }
0x147a   :  { %8058 = vmatpush2.bf16.msra.mxu1 %v10576_v58  ;;  %v8159_v58 = vld [vmem:[%s14459_s1 + $0x108] sm:$0xff] }
0x147b   :  { %8099 = vmatpush2.bf16.msra.mxu0 %v10579_v23  ;;  %8059 = vmatprep.subr.bf16.mxu1 %v10584_v35  ;;  %v9708_v23 = vcombine.low %v8158_v8, %v8160_v12  ;;  %v9709_v35 = vcombine.high %v8158_v8, %v8160_v12 }
0x147c   :  { %8100 = vmatprep.subr.bf16.mxu0 %v10587_v26  ;;  %v8161_v26 = vld [vmem:[%s14459_s1 + $0x128] sm:$0xff] }
0x147d   :  { %v9710_v25 = vcombine.low %v8159_v58, %v8161_v26 }
0x147e   :  { %8060 = vmatpush2.bf16.msra.mxu1 %v10582_v30  ;;  %v8154_v30 = vld [vmem:[%s14459_s1 + $0xc0] sm:$0xff] }
0x147f   :  { %8101 = vmatpush2.bf16.msra.mxu0 %v10585_v21  ;;  %8061 = vmatprep.subr.bf16.mxu1 %v10590_v29  ;;  %v8156_v21 = vld [vmem:[%s14459_s1 + $0xe0] sm:$0xff]  ;;  %v8157_v29 = vld [vmem:[%s14459_s1 + $0xe8] sm:$0xff] }
0x1480   :  { %8102 = vmatprep.subr.bf16.mxu0 %v10593_v17  ;;  %v8150_v17 = vld [vmem:[%s14459_s1 + $0x80] sm:$0xff] }
0x1482   :  { %8062 = vmatpush2.bf16.msra.mxu1 %v10588_v27 }
0x1483   :  { %8103 = vmatpush2.bf16.msra.mxu0 %v10591_v47  ;;  %v8152_v47 = vld [vmem:[%s14459_s1 + $0xa0] sm:$0xff] }
0x14e2   :  { %v7625_v24 = vpop.xlane.xlu1 %7624 }
0x14e3   :  { %vm7626_vm6 = vcmp.eq.f32.partialorder %v14035_v51, %v7625_v24  ;;  %v7631_v51 = vcvt.f32.s32 %v7625_v24  ;;  %v9711_v24 = vcombine.high %v8159_v58, %v8161_v26 }
0x14e4   :  { %v7627_v42 = vsel %vm7626_vm6, %v7622_v39, inf  ;;  %v9705_v39 = vcombine.high %v8154_v30, %v8156_v21 }
0x14e5   :  { %7628 = vmin.xlane.f32.xlu0 %v7627_v42  ;;  %v7632_v13 = vshll.u32 %v7631_v51, 16  ;;  %v8155_v42 = vld [vmem:[%s14459_s1 + $0xc8] sm:$0xff] }
0x14e6   :  { %v9707_v27 = vcombine.high %v8155_v42, %v8157_v29  ;;  %v8151_v51 = vld [vmem:[%s14459_s1 + $0x88] sm:$0xff] }
0x156e   :  { %v7629_v57 = vpop.xlane.xlu0 %7628 }
0x156f   :  { %v7630_v56 = vcvt.f32.s32 %v7629_v57  ;;  %v8153_v57 = vld [vmem:[%s14459_s1 + $0xa8] sm:$0xff] }
0x1571   :  { %v7633_v20 = vadd.s32 %v7632_v13, %v7630_v56  ;;  %v9704_v13 = vcombine.low %v8154_v30, %v8156_v21  ;;  %v9706_v56 = vcombine.low %v8155_v42, %v8157_v29  ;;  %v9616_v42 = vld [vmem:[%s14460_s0 + $0xb8] sm:$0xff] }
0x1573   :  { %vm7634_vm7 = vcmp.eq.s32.totalorder %v11325_v44, %v7633_v20  ;;  %vm7635_vm8 = vcmp.eq.s32.totalorder %v11328_v45, %v7633_v20  ;;  %v8170_v44 = vld [vmem:[%s14459_s1 + $0x1c0] sm:$0xff]  ;;  %v9701_v20 = vcombine.high %v8150_v17, %v8152_v47 }
0x1574   :  { %vm9683_vm9 = vmpackc.low %vm7634_vm7, %vm7634_vm7  ;;  %v8172_v45 = vld [vmem:[%s14459_s1 + $0x1e0] sm:$0xff] }
0x1575   :  { %vm9681_vm10 = vmpackc.low %vm7635_vm8, %vm7635_vm8  ;;  %v9721_v37 = vcombine.high %v8170_v44, %v8172_v45  ;;  %v9720_v15 = vcombine.low %v8170_v44, %v8172_v45  ;;  %v9703_v44 = vcombine.high %v8151_v51, %v8153_v57  ;;  %v8146_v45 = vld [vmem:[%s14459_s1 + $0x40] sm:$0xff] }
0x1576   :  { %9682 = vmatprep.mubr.msk.bf16.mxu1 %vm9681_vm10, %v10812_v34  ;;  %9686 = vmatprep.mubr.msk.bf16.mxu0 %vm9681_vm10, %v10812_v34 }
0x1577   :  { %9684 = vmatmul.mubr.msk.bf16.vlgmr.msra.gmra.mxu1 %vm9683_vm9, %v10812_v34  ;;  %9688 = vmatmul.mubr.msk.bf16.vlgmr.msra.gmra.mxu0 %vm9683_vm9, %v10812_v34  ;;  %v8173_v34 = vld [vmem:[%s14459_s1 + $0x1e8] sm:$0xff] }
0x1578   :  { %8366 = vmatprep.mubr.bf16.mxu1 %v10810_v3  ;;  %8407 = vmatprep.mubr.bf16.mxu0 %v10810_v3  ;;  %v9722_v63 = vcombine.low %v8171_v33, %v8173_v34  ;;  %v9723_v28 = vcombine.high %v8171_v33, %v8173_v34  ;;  %v8148_v33 = vld [vmem:[%s14459_s1 + $0x60] sm:$0xff]  ;;  %v8149_v34 = vld [vmem:[%s14459_s1 + $0x68] sm:$0xff] }
0x1579   :  { %8334 = vmatprep.subr.bf16.mxu1 %v9721_v37  ;;  %v8147_v37 = vld [vmem:[%s14459_s1 + $0x48] sm:$0xff] }
0x157a   :  { %8375 = vmatprep.subr.bf16.mxu0 %v9723_v28  ;;  %8335 = vmatpush1.bf16.msra.mxu1 %v9720_v15  ;;  %v9700_v15 = vcombine.low %v8150_v17, %v8152_v47  ;;  %v9697_v28 = vcombine.high %v8146_v45, %v8148_v33  ;;  %v9699_v32 = vcombine.high %v8147_v37, %v8149_v34 }
0x157b   :  { %8376 = vmatpush1.bf16.msra.mxu0 %v9722_v63  ;;  %8336 = vmatprep.subr.bf16.mxu1 %v9717_v22  ;;  %v9702_v63 = vcombine.low %v8151_v51, %v8153_v57  ;;  %v8143_v22 = vld [vmem:[%s14459_s1 + $0x8] sm:$0xff] }
0x157c   :  { %8377 = vmatprep.subr.bf16.mxu0 %v9719_v0  ;;  %v9693_v0 = vcombine.high %v8142_v46, %v8144_v49  ;;  %v9695_v5 = vcombine.high %v8143_v22, %v8145_v53  ;;  %v9694_v54 = vcombine.low %v8143_v22, %v8145_v53  ;;  %v10596_v46 = vld [vmem:[%s14461_s2 + $0x154] ss:$24 sps:$4 sm:$0xff]   ;;  %v10594_v49 = vld [vmem:[%s14461_s2 + $0x150] ss:$24 sps:$4 sm:$0xff]   ;;  %v10597_v22 = vld [vmem:[%s14461_s2 + $0x120] ss:$24 sps:$4 sm:$0xff]  }
0x157d   :  { %v10600_v53 = vld [vmem:[%s14461_s2 + $0xf0] ss:$24 sps:$4 sm:$0xff]  }
0x157e   :  { %8337 = vmatpush1.bf16.msra.mxu1 %v9716_v4  ;;  %v9696_v4 = vcombine.low %v8146_v45, %v8148_v33 }
0x157f   :  { %8378 = vmatpush1.bf16.msra.mxu0 %v9718_v62  ;;  %8338 = vmatprep.subr.bf16.mxu1 %v9713_v7  ;;  %v9698_v62 = vcombine.low %v8147_v37, %v8149_v34  ;;  %v9613_v7 = vld [vmem:[%s14460_s0 + $0xa0] sm:$0xff] }
0x1580   :  { %8379 = vmatprep.subr.bf16.mxu0 %v9715_v9 }
0x1582   :  { %8339 = vmatpush1.bf16.msra.mxu1 %v9712_v6 }
0x1583   :  { %8380 = vmatpush1.bf16.msra.mxu0 %v9714_v31  ;;  %8340 = vmatprep.subr.bf16.mxu1 %v9709_v35  ;;  %v9614_v31 = vld [vmem:[%s14460_s0 + $0xa8] sm:$0xff] }
0x1584   :  { %8381 = vmatprep.subr.bf16.mxu0 %v9711_v24 }
0x1586   :  { %8341 = vmatpush1.bf16.msra.mxu1 %v9708_v23 }
0x1587   :  { %8382 = vmatpush1.bf16.msra.mxu0 %v9710_v25  ;;  %8342 = vmatprep.subr.bf16.mxu1 %v9705_v39 }
0x1588   :  { %8383 = vmatprep.subr.bf16.mxu0 %v9707_v27 }
0x158a   :  { %8343 = vmatpush1.bf16.msra.mxu1 %v9704_v13 }
0x158b   :  { %8384 = vmatpush1.bf16.msra.mxu0 %v9706_v56  ;;  %8344 = vmatprep.subr.bf16.mxu1 %v9701_v20 }
0x158c   :  { %8385 = vmatprep.subr.bf16.mxu0 %v9703_v44 }
0x158e   :  { %8345 = vmatpush1.bf16.msra.mxu1 %v9700_v15 }
0x158f   :  { %8386 = vmatpush1.bf16.msra.mxu0 %v9702_v63  ;;  %8346 = vmatprep.subr.bf16.mxu1 %v9697_v28 }
0x1590   :  { %8387 = vmatprep.subr.bf16.mxu0 %v9699_v32 }
0x1592   :  { %8347 = vmatpush1.bf16.msra.mxu1 %v9696_v4  ;;  %v10603_v4 = vld [vmem:[%s14461_s2 + $0xc0] ss:$24 sps:$4 sm:$0xff]  }
0x1593   :  { %8388 = vmatpush1.bf16.msra.mxu0 %v9698_v62  ;;  %8348 = vmatprep.subr.bf16.mxu1 %v9693_v0  ;;  %v10605_v62 = vld [vmem:[%s14461_s2 + $0xc4] ss:$24 sps:$4 sm:$0xff]   ;;  %v10608_v0 = vld [vmem:[%s14461_s2 + $0x94] ss:$24 sps:$4 sm:$0xff]  }
0x1594   :  { %8389 = vmatprep.subr.bf16.mxu0 %v9695_v5  ;;  %v10606_v5 = vld [vmem:[%s14461_s2 + $0x90] ss:$24 sps:$4 sm:$0xff]  }
0x1596   :  { %8349 = vmatpush1.bf16.msra.mxu1 %v9692_v14  ;;  %v10611_v14 = vld [vmem:[%s14461_s2 + $0x64] ss:$24 sps:$4 sm:$0xff]  }
0x1597   :  { %8390 = vmatpush1.bf16.msra.mxu0 %v9694_v54  ;;  %8541 = vmatprep.subr.bf16.mxu1 %v10596_v46  ;;  %v10609_v54 = vld [vmem:[%s14461_s2 + $0x60] ss:$24 sps:$4 sm:$0xff]  }
0x1637   :  { %v8065_v40 = vpop.f32.mrf.mxu1  ;;  %v8106_v6 = vpop.f32.mrf.mxu0 }
0x1638   :  { %v8066_v9 = vadd.f32 %v9613_v7, %v8065_v40  ;;  %v10614_v7 = vld [vmem:[%s14461_s2 + $0x34] ss:$24 sps:$4 sm:$0xff]   ;;  %v10612_v40 = vld [vmem:[%s14461_s2 + $0x30] ss:$24 sps:$4 sm:$0xff]  }
0x1639   :  { %v8067_v8 = vpop.f32.mrf.mxu1  ;;  %v8108_v12 = vpop.f32.mrf.mxu0 }
0x163a   :  { %v8113_v58 = vadd.f32 %v8066_v9, %v13916_v43  ;;  %v8068_v23 = vadd.f32 %v9614_v31, %v8067_v8  ;;  %v8109_v29 = vadd.f32 %v9616_v42, %v8108_v12  ;;  %v9615_v43 = vld [vmem:[%s14460_s0 + $0xb0] sm:$0xff]  ;;  %v10615_v31 = vld [vmem:[%s14461_s2] ss:$24 sps:$4 sm:$0xff]  }
0x163b   :  { %v8069_v35 = vpop.f32.mrf.mxu1  ;;  %v8110_v26 = vpop.f32.mrf.mxu0  ;;  %v8107_v27 = vadd.f32 %v9615_v43, %v8106_v6  ;;  %v10617_v6 = vld [vmem:[%s14461_s2 + $0x4] ss:$24 sps:$4 sm:$0xff]  }
0x163c   :  { %v9689_v30 = vmul.f32 -1.442695, %v8113_v58  ;;  %v8114_v21 = vadd.f32 %v8068_v23, %v13920_v55  ;;  %v8116_v17 = vadd.f32 %v8109_v29, %v13922_v41 }
0x163d   :  { %v8070_v25 = vpop.f32.mrf.mxu1  ;;  %v8111_v24 = vpop.f32.mrf.mxu0  ;;  %v8115_v55 = vadd.f32 %v8107_v27, %v13918_v50 }
0x163e   :  { %10778 = vpow2.f32 %v9689_v30  ;;  %v9690_v39 = vmul.f32 -1.442695, %v8114_v21  ;;  %v9691_v47 = vmul.f32 -1.442695, %v8116_v17 }
0x1640   :  { %10780 = vpow2.f32 %v9690_v39 }
0x1641   :  { %10782 = vpow2.f32 %v9691_v47 }
0x164b   :  { %v10779_v51 = vpop.eup %10778 }
0x164c   :  { %v8120_v57 = vadd.f32 1.0, %v10779_v51 }
0x164d   :  { %v10781_v13 = vpop.eup %10780 }
0x164e   :  { %10784 = vrcp.f32 %v8120_v57  ;;  %v8126_v56 = vadd.f32 1.0, %v10781_v13  ;;  %v10783_v20 = vpop.eup %10782 }
0x164f   :  { %10786 = vtanh.f32 %v8115_v55  ;;  %v8133_v37 = vadd.f32 1.0, %v10783_v20 }
0x1650   :  { %10788 = vrcp.f32 %v8126_v56 }
0x1651   :  { %10790 = vrcp.f32 %v8133_v37 }
0x165b   :  { %v10785_v44 = vpop.eup %10784 }
0x165c   :  { %v10787_v45 = vpop.eup %10786 }
0x165d   :  { %v10789_v33 = vpop.eup %10788  ;;  %v8137_v34 = vmul.f32 %v10787_v45, %v10785_v44 }
0x165e   :  { %v8136_v41 = vmul.f32 %v10789_v33, %v13706_v48  ;;  %v10791_v63 = vpop.eup %10790  ;;  %v10599_v48 = vld [vmem:[%s14461_s2 + $0x124] ss:$24 sps:$4 sm:$0xff]  }
0x1660   :  { %v8138_v15 = vadd.f32 %v8137_v34, %v8136_v41 }
0x1662   :  { %10792 = vtanh.f32 %v8138_v15 }
0x166f   :  { %v10793_v50 = vpop.eup %10792 }
0x1670   :  { %v8140_v28 = vmul.f32 %v10793_v50, %v10791_v63 }
0x1672   :  { %v8141_v32 = vpack.c.bf16 %v8140_v28, %v8140_v28 }
0x1674   :  { %8367 = vmatmul.mubr.bf16.vlgmr.msra.gmra.mxu1 %v8141_v32  ;;  %8408 = vmatmul.mubr.bf16.vlgmr.msra.gmra.mxu0 %v8141_v32 }
0x1675   :  { %8573 = vmatprep.mubr.bf16.mxu1 %v10810_v3  ;;  %8542 = vmatpush1.bf16.msra.mxu1 %v10594_v49  ;;  %v10602_v3 = vld [vmem:[%s14461_s2 + $0xf4] ss:$24 sps:$4 sm:$0xff]  }
0x1676   :  { %8543 = vmatprep.subr.bf16.mxu1 %v10599_v48 }
0x1679   :  { %8544 = vmatpush1.bf16.msra.mxu1 %v10597_v22 }
0x167a   :  { %8545 = vmatprep.subr.bf16.mxu1 %v10602_v3 }
0x167d   :  { %8546 = vmatpush1.bf16.msra.mxu1 %v10600_v53 }
0x167e   :  { %8547 = vmatprep.subr.bf16.mxu1 %v10605_v62 }
0x1681   :  { %8548 = vmatpush1.bf16.msra.mxu1 %v10603_v4 }
0x1682   :  { %8549 = vmatprep.subr.bf16.mxu1 %v10608_v0 }
0x1685   :  { %8550 = vmatpush1.bf16.msra.mxu1 %v10606_v5 }
0x1686   :  { %8551 = vmatprep.subr.bf16.mxu1 %v10611_v14 }
0x1689   :  { %8552 = vmatpush1.bf16.msra.mxu1 %v10609_v54 }
0x168a   :  { %8553 = vmatprep.subr.bf16.mxu1 %v10614_v7 }
0x168d   :  { %8554 = vmatpush1.bf16.msra.mxu1 %v10612_v40 }
0x168e   :  { %8555 = vmatprep.subr.bf16.mxu1 %v10617_v6 }
0x1691   :  { %8556 = vmatpush1.bf16.msra.mxu1 %v10615_v31 }
0x1734   :  { %v8368_v9 = vpop.f32.mrf.mxu1  ;;  %v8409_v8 = vpop.f32.mrf.mxu0 }
0x1735   :  { %v8369_v12 = vadd.f32 %v8368_v9, %v11176_v1  ;;  %v8410_v17 = vadd.f32 %v8409_v8, %v11188_v19 }
0x1736   :  { %v8370_v58 = vpop.f32.mrf.mxu1  ;;  %v8411_v23 = vpop.f32.mrf.mxu0 }
0x1737   :  { %v8416_v35 = vadd.f32 %v8369_v12, %v13974_v60  ;;  %v8371_v26 = vadd.f32 %v8370_v58, %v11180_v2  ;;  %v8412_v43 = vadd.f32 %v8411_v23, %v11186_v18  ;;  %v8418_v2 = vadd.f32 %v8410_v17, %v14026_v59 }
0x1738   :  { %v8372_v30 = vpop.f32.mrf.mxu1  ;;  %v8413_v21 = vpop.f32.mrf.mxu0 }
0x1739   :  { %v9724_v25 = vmul.f32 -1.442695, %v8416_v35  ;;  %v8417_v24 = vadd.f32 %v8371_v26, %v13976_v38  ;;  %v8419_v1 = vadd.f32 %v8412_v43, %v14028_v52 }
0x173a   :  { %v8373_v39 = vpop.f32.mrf.mxu1  ;;  %v8414_v42 = vpop.f32.mrf.mxu0 }
0x173b   :  { %10794 = vpow2.f32 %v9724_v25  ;;  %v9725_v29 = vmul.f32 -1.442695, %v8417_v24  ;;  %v9726_v27 = vmul.f32 -1.442695, %v8419_v1 }
0x173d   :  { %10796 = vpow2.f32 %v9725_v29 }
0x173e   :  { %10798 = vpow2.f32 %v9726_v27 }
0x1748   :  { %v10795_v60 = vpop.eup %10794 }
0x1749   :  { %v8423_v47 = vadd.f32 1.0, %v10795_v60 }
0x174a   :  { %v10797_v51 = vpop.eup %10796 }
0x174b   :  { %10800 = vrcp.f32 %v8423_v47  ;;  %v8429_v38 = vadd.f32 1.0, %v10797_v51  ;;  %v10799_v55 = vpop.eup %10798 }
0x174c   :  { %10802 = vtanh.f32 %v8418_v2  ;;  %v8436_v18 = vadd.f32 1.0, %v10799_v55 }
0x174d   :  { %10804 = vrcp.f32 %v8429_v38 }
0x174e   :  { %10806 = vrcp.f32 %v8436_v18 }
0x1758   :  { %v10801_v57 = vpop.eup %10800 }
0x1759   :  { %v10803_v13 = vpop.eup %10802 }
0x175a   :  { %v10805_v56 = vpop.eup %10804  ;;  %v8440_v20 = vmul.f32 %v10803_v13, %v10801_v57 }
0x175b   :  { %v8439_v52 = vmul.f32 %v10805_v56, %v13925_v36  ;;  %v10807_v44 = vpop.eup %10806 }
0x175d   :  { %v8441_v19 = vadd.f32 %v8440_v20, %v8439_v52 }
0x175f   :  { %10808 = vtanh.f32 %v8441_v19 }
0x176c   :  { %v10809_v59 = vpop.eup %10808 }
0x176d   :  { %v8443_v45 = vmul.f32 %v10809_v59, %v10807_v44 }
0x176f   :  { %v8444_v33 = vpack.c.bf16 %v8443_v45, %v8443_v45 }
0x1771   :  { %8574 = vmatmul.mubr.bf16.vlgmr.msra.gmra.mxu1 %v8444_v33 }
0x1831   :  { %v8575_v37 = vpop.f32.mrf.mxu1 }
0x1832   :  { %v8576_v41 = vadd.f32 %v8575_v37, %v11254_v10 }
0x1833   :  { %v8577_v34 = vpop.f32.mrf.mxu1 }
0x1834   :  { %v8578_v15 = vadd.f32 %v8577_v34, %v11258_v11 }
0x1835   :  { %v8579_v63 = vpop.f32.mrf.mxu1 }
0x1836   :  { %v8584_v50 = vcombine.low %v8576_v41, %v8578_v15  ;;  %v8585_v28 = vcombine.high %v8576_v41, %v8578_v15 }
0x1837   :  { %v8580_v32 = vpop.f32.mrf.mxu1 }
0x1838   :  { %v8592_v36 = vrot.slane %v8584_v50, %v11265_v16  ;;  %v8599_v46 = vrot.slane %v8585_v28, %v11265_v16 }
0x183a   :  { %v8600_v49 = vcombine.high %v8592_v36, %v8592_v36  ;;  %v8601_v48 = vcombine.high %v8599_v46, %v8599_v46  ;;  %v8608_v22 = vrot.slane %v8592_v36, %v11265_v16  ;;  %v8615_v3 = vrot.slane %v8599_v46, %v11265_v16 }
0x183c   :  { %v8622_v53 = vrot.slane %v8600_v49, %v11265_v16  ;;  %v8629_v10 = vrot.slane %v8601_v48, %v11265_v16  ;;  %v8630_v4 = vcombine.high %v8608_v22, %v8608_v22  ;;  %v8631_v11 = vcombine.high %v8615_v3, %v8615_v3  ;;  %9743 = vst.msk [vmem:[%s14464_s6 + $0x5] ss:$8 sm:$0x3] %vm11272_vm0, %v8608_v22 }
0x183d   :  { %9747 = vst.msk [vmem:[%s14464_s6 + $0x45] ss:$8 sm:$0x3] %vm11272_vm0, %v8615_v3 }
0x183e   :  { %v8632_v62 = vcombine.high %v8622_v53, %v8622_v53  ;;  %v8633_v0 = vcombine.high %v8629_v10, %v8629_v10  ;;  %9744 = vst.msk [vmem:[%s14464_s6 + $0x15] ss:$8 sm:$0x3] %vm11272_vm0, %v8622_v53  ;;  %9745 = vst.msk [vmem:[%s14464_s6 + $0x25] ss:$8 sm:$0x3] %vm11272_vm0, %v8630_v4 }
0x183f   :  { %9748 = vst.msk [vmem:[%s14464_s6 + $0x55] ss:$8 sm:$0x3] %vm11272_vm0, %v8629_v10  ;;  %9749 = vst.msk [vmem:[%s14464_s6 + $0x65] ss:$8 sm:$0x3] %vm11272_vm0, %v8631_v11 }
0x1840   :  { %9746 = vst.msk [vmem:[%s14464_s6 + $0x35] ss:$8 sm:$0x3] %vm11272_vm0, %v8632_v62  ;;  %9750 = vst.msk [vmem:[%s14464_s6 + $0x75] ss:$8 sm:$0x3] %vm11272_vm0, %v8633_v0 }

</bundles_post_ra>
